<compile_context>
chip_gen: v6e
topology: v6e:2x2x1
jax: 0.10.0
libtpu: 0.0.40
codegen_flags: <defaults>
</compile_context>

<pallas_src>
import functools

import jax
import jax.numpy as jnp
from jax.experimental import pallas as pl
from jax.experimental.pallas import tpu as pltpu


# -----------------------------------------------------------------------------
# Fused kernel: q/f linears + tanh + filter linear + grouped conv + output linear
# -----------------------------------------------------------------------------
def _fused_attention_kernel(q_ref, f_ref, x_ref,
                            wq_ref, bq_ref, wf_ref, bf_ref,
                            wflt_ref, bflt_ref, wout_ref, bout_ref,
                            o_ref, hid_ref,
                            *, fd, ho, wo, nf, hidden):
    # ---- Stage 1: data-dependent fd x fd filter per group (f32 MXU, f32 accumulate) ----
    qh = jnp.dot(q_ref[0], wq_ref[...], preferred_element_type=jnp.float32) + bq_ref[...]
    fh = jnp.dot(f_ref[0], wf_ref[...], preferred_element_type=jnp.float32) + bf_ref[...]
    # torch cat(..., dim=2): write tanh halves into adjacent lane halves of one (G, 2H) tile.
    hid_ref[:, :hidden] = jnp.tanh(qh)
    hid_ref[:, hidden:] = jnp.tanh(fh)
    filt = (jnp.dot(hid_ref[...], wflt_ref[...], preferred_element_type=jnp.float32)
            + bflt_ref[...])                                          # (G, fd*fd)

    # ---- Stage 2+3: grouped "valid" conv fused with the output GEMM ----
    # att[g,i,j,f] = sum_{di,dj} x[g, i+di, j+dj, f] * filt[g, di, dj]
    # out[g,:]     = sum_i att[g,i,:,:].reshape(-1) @ W_out3[i] + b_out
    # Row-wise fusion: the (G, Ho, Wo*F) attended map is never materialised or reshaped.
    x = x_ref[...]                                                    # (G, D, D*F) f32, vreg-resident
    d_rows = x.shape[1]
    rows = [x[:, r, :] for r in range(d_rows)]                        # D slices of (G, D*F)

    acc = None                                                        # (G, out_dim) accumulator
    for i in range(ho):
        row = None                                                    # attended row i: (G, Wo*F)
        for di in range(fd):
            xr = rows[i + di]
            for dj in range(fd):
                win = xr[:, dj * nf: dj * nf + wo * nf]               # (G, Wo*F)
                coef = filt[:, di * fd + dj: di * fd + dj + 1]        # (G, 1), lane-broadcast
                term = win * coef
                row = term if row is None else row + term
        part = jnp.dot(row, wout_ref[i], preferred_element_type=jnp.float32)  # (G, out_dim)
        acc = part if acc is None else acc + part
    o_ref[...] = acc + bout_ref[...]


# -----------------------------------------------------------------------------
# Forward pass (single pallas_call; wrapper does only zero-cost contiguous reshapes)
# -----------------------------------------------------------------------------
def attention_forward(params, cnn_features, question_encoding, fact_encoding, *, filter_dim):
    g, d, _, nf = cnn_features.shape
    hidden = params['w_question'].shape[1]
    out_dim = params['w_output'].shape[1]
    ho = d - filter_dim + 1
    wo = ho

    # Contiguous reshapes only (bitcasts under jit): no dtype converts, no HBM copies.
    x_flat = cnn_features.reshape(g, d, d * nf)                        # (G, D, D*F)
    w_out3 = params['w_output'].reshape(ho, wo * nf, out_dim)          # (Ho, Wo*F, out_dim)

    kernel = functools.partial(_fused_attention_kernel,
                               fd=filter_dim, ho=ho, wo=wo, nf=nf, hidden=hidden)
    out = pl.pallas_call(
        kernel,
        out_shape=jax.ShapeDtypeStruct((g, out_dim), jnp.float32),
        scratch_shapes=[pltpu.VMEM((g, 2 * hidden), jnp.float32)],     # (G, 2H) "concat" tile
    )(question_encoding, fact_encoding, x_flat,
      params['w_question'], params['b_question'],
      params['w_fact'], params['b_fact'],
      params['w_filter'], params['b_filter'],
      w_out3, params['b_output'])
    return out[None]                                                   # (1, G, output_dim)


# -----------------------------------------------------------------------------
# Pure-JAX reference (f32) for a numerical sanity check
# -----------------------------------------------------------------------------
def attention_reference(params, cnn_features, question_encoding, fact_encoding, filter_dim):
    g, d, _, nf = cnn_features.shape
    ho = d - filter_dim + 1
    q2 = question_encoding.reshape(-1, question_encoding.shape[-1])
    f2 = fact_encoding.reshape(-1, fact_encoding.shape[-1])
    qh = q2 @ params['w_question'] + params['b_question']
    fh = f2 @ params['w_fact'] + params['b_fact']
    hid = jnp.tanh(jnp.concatenate([qh, fh], axis=-1))
    flt = (hid @ params['w_filter'] + params['b_filter']).reshape(g, filter_dim, filter_dim)
    att = jnp.zeros((g, ho, ho, nf), jnp.float32)
    for di in range(filter_dim):
        for dj in range(filter_dim):
            att = att + cnn_features[:, di:di + ho, dj:dj + ho, :] * flt[:, di, dj][:, None, None, None]
    out = att.reshape(g, -1) @ params['w_output'] + params['b_output']
    return out[None, :, :]


# -----------------------------------------------------------------------------
# Deterministic synthetic parameters (weights (in, out) = torch weight.T; biases (1, out))
# -----------------------------------------------------------------------------
def init_params(key, question_dim, fact_dim, hidden_dim, filter_dim, image_dim,
                image_feature, output_dim):
    conv_flat = (image_dim - filter_dim + 1) ** 2 * image_feature
    spec = {
        'w_question': ((question_dim, hidden_dim), question_dim),
        'b_question': ((1, hidden_dim), question_dim),
        'w_fact': ((fact_dim, hidden_dim), fact_dim),
        'b_fact': ((1, hidden_dim), fact_dim),
        'w_filter': ((2 * hidden_dim, filter_dim ** 2), 2 * hidden_dim),
        'b_filter': ((1, filter_dim ** 2), 2 * hidden_dim),
        'w_output': ((conv_flat, output_dim), conv_flat),
        'b_output': ((1, output_dim), conv_flat),
    }
    params = {}
    for sub, (name, (shape, fan_in)) in zip(jax.random.split(key, len(spec)), spec.items()):
        bound = 1.0 / (fan_in ** 0.5)
        params[name] = jax.random.uniform(sub, shape, jnp.float32, -bound, bound)
    return params


# -----------------------------------------------------------------------------
if __name__ == "__main__":
    question_dim = 32
    fact_dim = 32
    hidden_dim = 32
    filter_dim = 3
    image_dim = 16
    image_feature = 4
    output_dim = 32
    groups = 2   # batch of groups; question/fact encodings are (1, groups, dim)

    root = jax.random.PRNGKey(0)
    k_cnn, k_q, k_f, k_p = jax.random.split(root, 4)
    cnn_features = jax.random.normal(
        k_cnn, (groups, image_dim, image_dim, image_feature), jnp.float32)
    question_encoding = jax.random.normal(k_q, (1, groups, question_dim), jnp.float32)
    fact_encoding = jax.random.normal(k_f, (1, groups, fact_dim), jnp.float32)
    params = init_params(k_p, question_dim, fact_dim, hidden_dim, filter_dim,
                         image_dim, image_feature, output_dim)

    fwd = jax.jit(functools.partial(attention_forward, filter_dim=filter_dim))
    out = fwd(params, cnn_features, question_encoding, fact_encoding)
    out = jax.block_until_ready(out)

    assert out.shape == (1, groups, output_dim), out.shape
    assert bool(jnp.all(jnp.isfinite(out)))

    # Numerical sanity check against the pure-JAX f32 reference. The fused kernel keeps
    # everything f32 (f32 MXU accumulation), so the tolerance is much tighter than the
    # earlier bf16 version.
    ref = attention_reference(params, cnn_features, question_encoding, fact_encoding, filter_dim)
    max_err = float(jnp.max(jnp.abs(out - ref)))
    assert max_err < 5e-2, f"max abs error vs reference: {max_err}"

    print("KERNEL_OK")
</pallas_src>

<mosaic_0001>
module attributes {stable_mosaic.version = 11 : i64} {
  func.func @_fused_attention_kernel(%arg0: memref<1x2x32xf32, #tpu.memory_space<vmem>>, %arg1: memref<1x2x32xf32, #tpu.memory_space<vmem>>, %arg2: memref<2x16x64xf32, #tpu.memory_space<vmem>>, %arg3: memref<32x32xf32, #tpu.memory_space<vmem>>, %arg4: memref<1x32xf32, #tpu.memory_space<vmem>>, %arg5: memref<32x32xf32, #tpu.memory_space<vmem>>, %arg6: memref<1x32xf32, #tpu.memory_space<vmem>>, %arg7: memref<64x9xf32, #tpu.memory_space<vmem>>, %arg8: memref<1x9xf32, #tpu.memory_space<vmem>>, %arg9: memref<14x56x32xf32, #tpu.memory_space<vmem>>, %arg10: memref<1x32xf32, #tpu.memory_space<vmem>>, %arg11: memref<2x32xf32, #tpu.memory_space<vmem>>, %arg12: memref<2x64xf32, #tpu.memory_space<vmem>>) attributes {dimension_semantics = [], scalar_prefetch = 0 : i64, scratch_operands = 1 : i64, tpu.core_type = #tpu.core_type<tc>} {
    %c0 = arith.constant 0 : index
    %c0_0 = arith.constant 0 : index
    %c0_1 = arith.constant 0 : index
    %0 = vector.load %arg0[%c0, %c0_0, %c0_1] : memref<1x2x32xf32, #tpu.memory_space<vmem>>, vector<1x2x32xf32>
    %1 = vector.shape_cast %0 : vector<1x2x32xf32> to vector<2x32xf32>
    %c0_2 = arith.constant 0 : index
    %c0_3 = arith.constant 0 : index
    %2 = vector.load %arg3[%c0_2, %c0_3] : memref<32x32xf32, #tpu.memory_space<vmem>>, vector<32x32xf32>
    %cst = arith.constant dense<0.000000e+00> : vector<2x32xf32>
    %3 = tpu.matmul %1, %2, %cst {dimension_numbers = #tpu.dot_dimension_numbers<[1], [0], [0], [1], [0, 0, 1, 1], [], []>} : vector<2x32xf32>, vector<32x32xf32>, vector<2x32xf32> -> vector<2x32xf32>
    %c0_4 = arith.constant 0 : index
    %c0_5 = arith.constant 0 : index
    %4 = vector.load %arg4[%c0_4, %c0_5] : memref<1x32xf32, #tpu.memory_space<vmem>>, vector<1x32xf32>
    %5 = vector.broadcast %4 : vector<1x32xf32> to vector<2x32xf32>
    %6 = arith.addf %3, %5 : vector<2x32xf32>
    %c0_6 = arith.constant 0 : index
    %c0_7 = arith.constant 0 : index
    %c0_8 = arith.constant 0 : index
    %7 = vector.load %arg1[%c0_6, %c0_7, %c0_8] : memref<1x2x32xf32, #tpu.memory_space<vmem>>, vector<1x2x32xf32>
    %8 = vector.shape_cast %7 : vector<1x2x32xf32> to vector<2x32xf32>
    %c0_9 = arith.constant 0 : index
    %c0_10 = arith.constant 0 : index
    %9 = vector.load %arg5[%c0_9, %c0_10] : memref<32x32xf32, #tpu.memory_space<vmem>>, vector<32x32xf32>
    %cst_11 = arith.constant dense<0.000000e+00> : vector<2x32xf32>
    %10 = tpu.matmul %8, %9, %cst_11 {dimension_numbers = #tpu.dot_dimension_numbers<[1], [0], [0], [1], [0, 0, 1, 1], [], []>} : vector<2x32xf32>, vector<32x32xf32>, vector<2x32xf32> -> vector<2x32xf32>
    %c0_12 = arith.constant 0 : index
    %c0_13 = arith.constant 0 : index
    %11 = vector.load %arg6[%c0_12, %c0_13] : memref<1x32xf32, #tpu.memory_space<vmem>>, vector<1x32xf32>
    %12 = vector.broadcast %11 : vector<1x32xf32> to vector<2x32xf32>
    %13 = arith.addf %10, %12 : vector<2x32xf32>
    %14 = math.tanh %6 : vector<2x32xf32>
    %c0_14 = arith.constant 0 : index
    %c0_15 = arith.constant 0 : index
    %15 = vector.load %arg12[%c0_14, %c0_15] : memref<2x64xf32, #tpu.memory_space<vmem>>, vector<2x32xf32>
    tpu.vector_store %arg12[%c0_14, %c0_15], %14 {strides = array<i32>} : memref<2x64xf32, #tpu.memory_space<vmem>>, vector<2x32xf32>,
    %16 = math.tanh %13 : vector<2x32xf32>
    %c0_16 = arith.constant 0 : index
    %c32 = arith.constant 32 : index
    %17 = vector.load %arg12[%c0_16, %c32] : memref<2x64xf32, #tpu.memory_space<vmem>>, vector<2x32xf32>
    tpu.vector_store %arg12[%c0_16, %c32], %16 {strides = array<i32>} : memref<2x64xf32, #tpu.memory_space<vmem>>, vector<2x32xf32>,
    %c0_17 = arith.constant 0 : index
    %c0_18 = arith.constant 0 : index
    %18 = vector.load %arg12[%c0_17, %c0_18] : memref<2x64xf32, #tpu.memory_space<vmem>>, vector<2x64xf32>
    %c0_19 = arith.constant 0 : index
    %c0_20 = arith.constant 0 : index
    %19 = vector.load %arg7[%c0_19, %c0_20] : memref<64x9xf32, #tpu.memory_space<vmem>>, vector<64x9xf32>
    %cst_21 = arith.constant dense<0.000000e+00> : vector<2x9xf32>
    %20 = tpu.matmul %18, %19, %cst_21 {dimension_numbers = #tpu.dot_dimension_numbers<[1], [0], [0], [1], [0, 0, 1, 1], [], []>} : vector<2x64xf32>, vector<64x9xf32>, vector<2x9xf32> -> vector<2x9xf32>
    %c0_22 = arith.constant 0 : index
    %c0_23 = arith.constant 0 : index
    %21 = vector.load %arg8[%c0_22, %c0_23] : memref<1x9xf32, #tpu.memory_space<vmem>>, vector<1x9xf32>
    %22 = vector.broadcast %21 : vector<1x9xf32> to vector<2x9xf32>
    %23 = arith.addf %20, %22 : vector<2x9xf32>
    %c0_24 = arith.constant 0 : index
    %c0_25 = arith.constant 0 : index
    %c0_26 = arith.constant 0 : index
    %24 = vector.load %arg2[%c0_24, %c0_25, %c0_26] : memref<2x16x64xf32, #tpu.memory_space<vmem>>, vector<2x16x64xf32>
    %25 = vector.extract_strided_slice %24 {offsets = [0, 0, 0], sizes = [2, 1, 64], strides = [1, 1, 1]} : vector<2x16x64xf32> to vector<2x1x64xf32>
    %26 = vector.shape_cast %25 : vector<2x1x64xf32> to vector<2x64xf32>
    %27 = vector.extract_strided_slice %24 {offsets = [0, 1, 0], sizes = [2, 1, 64], strides = [1, 1, 1]} : vector<2x16x64xf32> to vector<2x1x64xf32>
    %28 = vector.shape_cast %27 : vector<2x1x64xf32> to vector<2x64xf32>
    %29 = vector.extract_strided_slice %24 {offsets = [0, 2, 0], sizes = [2, 1, 64], strides = [1, 1, 1]} : vector<2x16x64xf32> to vector<2x1x64xf32>
    %30 = vector.shape_cast %29 : vector<2x1x64xf32> to vector<2x64xf32>
    %31 = vector.extract_strided_slice %24 {offsets = [0, 3, 0], sizes = [2, 1, 64], strides = [1, 1, 1]} : vector<2x16x64xf32> to vector<2x1x64xf32>
    %32 = vector.shape_cast %31 : vector<2x1x64xf32> to vector<2x64xf32>
    %33 = vector.extract_strided_slice %24 {offsets = [0, 4, 0], sizes = [2, 1, 64], strides = [1, 1, 1]} : vector<2x16x64xf32> to vector<2x1x64xf32>
    %34 = vector.shape_cast %33 : vector<2x1x64xf32> to vector<2x64xf32>
    %35 = vector.extract_strided_slice %24 {offsets = [0, 5, 0], sizes = [2, 1, 64], strides = [1, 1, 1]} : vector<2x16x64xf32> to vector<2x1x64xf32>
    %36 = vector.shape_cast %35 : vector<2x1x64xf32> to vector<2x64xf32>
    %37 = vector.extract_strided_slice %24 {offsets = [0, 6, 0], sizes = [2, 1, 64], strides = [1, 1, 1]} : vector<2x16x64xf32> to vector<2x1x64xf32>
    %38 = vector.shape_cast %37 : vector<2x1x64xf32> to vector<2x64xf32>
    %39 = vector.extract_strided_slice %24 {offsets = [0, 7, 0], sizes = [2, 1, 64], strides = [1, 1, 1]} : vector<2x16x64xf32> to vector<2x1x64xf32>
    %40 = vector.shape_cast %39 : vector<2x1x64xf32> to vector<2x64xf32>
    %41 = vector.extract_strided_slice %24 {offsets = [0, 8, 0], sizes = [2, 1, 64], strides = [1, 1, 1]} : vector<2x16x64xf32> to vector<2x1x64xf32>
    %42 = vector.shape_cast %41 : vector<2x1x64xf32> to vector<2x64xf32>
    %43 = vector.extract_strided_slice %24 {offsets = [0, 9, 0], sizes = [2, 1, 64], strides = [1, 1, 1]} : vector<2x16x64xf32> to vector<2x1x64xf32>
    %44 = vector.shape_cast %43 : vector<2x1x64xf32> to vector<2x64xf32>
    %45 = vector.extract_strided_slice %24 {offsets = [0, 10, 0], sizes = [2, 1, 64], strides = [1, 1, 1]} : vector<2x16x64xf32> to vector<2x1x64xf32>
    %46 = vector.shape_cast %45 : vector<2x1x64xf32> to vector<2x64xf32>
    %47 = vector.extract_strided_slice %24 {offsets = [0, 11, 0], sizes = [2, 1, 64], strides = [1, 1, 1]} : vector<2x16x64xf32> to vector<2x1x64xf32>
    %48 = vector.shape_cast %47 : vector<2x1x64xf32> to vector<2x64xf32>
    %49 = vector.extract_strided_slice %24 {offsets = [0, 12, 0], sizes = [2, 1, 64], strides = [1, 1, 1]} : vector<2x16x64xf32> to vector<2x1x64xf32>
    %50 = vector.shape_cast %49 : vector<2x1x64xf32> to vector<2x64xf32>
    %51 = vector.extract_strided_slice %24 {offsets = [0, 13, 0], sizes = [2, 1, 64], strides = [1, 1, 1]} : vector<2x16x64xf32> to vector<2x1x64xf32>
    %52 = vector.shape_cast %51 : vector<2x1x64xf32> to vector<2x64xf32>
    %53 = vector.extract_strided_slice %24 {offsets = [0, 14, 0], sizes = [2, 1, 64], strides = [1, 1, 1]} : vector<2x16x64xf32> to vector<2x1x64xf32>
    %54 = vector.shape_cast %53 : vector<2x1x64xf32> to vector<2x64xf32>
    %55 = vector.extract_strided_slice %24 {offsets = [0, 15, 0], sizes = [2, 1, 64], strides = [1, 1, 1]} : vector<2x16x64xf32> to vector<2x1x64xf32>
    %56 = vector.shape_cast %55 : vector<2x1x64xf32> to vector<2x64xf32>
    %57 = vector.extract_strided_slice %26 {offsets = [0, 0], sizes = [2, 56], strides = [1, 1]} : vector<2x64xf32> to vector<2x56xf32>
    %58 = vector.extract_strided_slice %23 {offsets = [0, 0], sizes = [2, 1], strides = [1, 1]} : vector<2x9xf32> to vector<2x1xf32>
    %59 = vector.broadcast %58 : vector<2x1xf32> to vector<2x56xf32>
    %60 = arith.mulf %57, %59 : vector<2x56xf32>
    %61 = vector.extract_strided_slice %26 {offsets = [0, 4], sizes = [2, 56], strides = [1, 1]} : vector<2x64xf32> to vector<2x56xf32>
    %62 = vector.extract_strided_slice %23 {offsets = [0, 1], sizes = [2, 1], strides = [1, 1]} : vector<2x9xf32> to vector<2x1xf32>
    %63 = vector.broadcast %62 : vector<2x1xf32> to vector<2x56xf32>
    %64 = arith.mulf %61, %63 : vector<2x56xf32>
    %65 = arith.addf %60, %64 : vector<2x56xf32>
    %66 = vector.extract_strided_slice %26 {offsets = [0, 8], sizes = [2, 56], strides = [1, 1]} : vector<2x64xf32> to vector<2x56xf32>
    %67 = vector.extract_strided_slice %23 {offsets = [0, 2], sizes = [2, 1], strides = [1, 1]} : vector<2x9xf32> to vector<2x1xf32>
    %68 = vector.broadcast %67 : vector<2x1xf32> to vector<2x56xf32>
    %69 = arith.mulf %66, %68 : vector<2x56xf32>
    %70 = arith.addf %65, %69 : vector<2x56xf32>
    %71 = vector.extract_strided_slice %28 {offsets = [0, 0], sizes = [2, 56], strides = [1, 1]} : vector<2x64xf32> to vector<2x56xf32>
    %72 = vector.extract_strided_slice %23 {offsets = [0, 3], sizes = [2, 1], strides = [1, 1]} : vector<2x9xf32> to vector<2x1xf32>
    %73 = vector.broadcast %72 : vector<2x1xf32> to vector<2x56xf32>
    %74 = arith.mulf %71, %73 : vector<2x56xf32>
    %75 = arith.addf %70, %74 : vector<2x56xf32>
    %76 = vector.extract_strided_slice %28 {offsets = [0, 4], sizes = [2, 56], strides = [1, 1]} : vector<2x64xf32> to vector<2x56xf32>
    %77 = vector.extract_strided_slice %23 {offsets = [0, 4], sizes = [2, 1], strides = [1, 1]} : vector<2x9xf32> to vector<2x1xf32>
    %78 = vector.broadcast %77 : vector<2x1xf32> to vector<2x56xf32>
    %79 = arith.mulf %76, %78 : vector<2x56xf32>
    %80 = arith.addf %75, %79 : vector<2x56xf32>
    %81 = vector.extract_strided_slice %28 {offsets = [0, 8], sizes = [2, 56], strides = [1, 1]} : vector<2x64xf32> to vector<2x56xf32>
    %82 = vector.extract_strided_slice %23 {offsets = [0, 5], sizes = [2, 1], strides = [1, 1]} : vector<2x9xf32> to vector<2x1xf32>
    %83 = vector.broadcast %82 : vector<2x1xf32> to vector<2x56xf32>
    %84 = arith.mulf %81, %83 : vector<2x56xf32>
    %85 = arith.addf %80, %84 : vector<2x56xf32>
    %86 = vector.extract_strided_slice %30 {offsets = [0, 0], sizes = [2, 56], strides = [1, 1]} : vector<2x64xf32> to vector<2x56xf32>
    %87 = vector.extract_strided_slice %23 {offsets = [0, 6], sizes = [2, 1], strides = [1, 1]} : vector<2x9xf32> to vector<2x1xf32>
    %88 = vector.broadcast %87 : vector<2x1xf32> to vector<2x56xf32>
    %89 = arith.mulf %86, %88 : vector<2x56xf32>
    %90 = arith.addf %85, %89 : vector<2x56xf32>
    %91 = vector.extract_strided_slice %30 {offsets = [0, 4], sizes = [2, 56], strides = [1, 1]} : vector<2x64xf32> to vector<2x56xf32>
    %92 = vector.extract_strided_slice %23 {offsets = [0, 7], sizes = [2, 1], strides = [1, 1]} : vector<2x9xf32> to vector<2x1xf32>
    %93 = vector.broadcast %92 : vector<2x1xf32> to vector<2x56xf32>
    %94 = arith.mulf %91, %93 : vector<2x56xf32>
    %95 = arith.addf %90, %94 : vector<2x56xf32>
    %96 = vector.extract_strided_slice %30 {offsets = [0, 8], sizes = [2, 56], strides = [1, 1]} : vector<2x64xf32> to vector<2x56xf32>
    %97 = vector.extract_strided_slice %23 {offsets = [0, 8], sizes = [2, 1], strides = [1, 1]} : vector<2x9xf32> to vector<2x1xf32>
    %98 = vector.broadcast %97 : vector<2x1xf32> to vector<2x56xf32>
    %99 = arith.mulf %96, %98 : vector<2x56xf32>
    %100 = arith.addf %95, %99 : vector<2x56xf32>
    %c0_27 = arith.constant 0 : index
    %c0_28 = arith.constant 0 : index
    %c0_29 = arith.constant 0 : index
    %101 = vector.load %arg9[%c0_27, %c0_28, %c0_29] : memref<14x56x32xf32, #tpu.memory_space<vmem>>, vector<1x56x32xf32>
    %102 = vector.shape_cast %101 : vector<1x56x32xf32> to vector<56x32xf32>
    %cst_30 = arith.constant dense<0.000000e+00> : vector<2x32xf32>
    %103 = tpu.matmul %100, %102, %cst_30 {dimension_numbers = #tpu.dot_dimension_numbers<[1], [0], [0], [1], [0, 0, 1, 1], [], []>} : vector<2x56xf32>, vector<56x32xf32>, vector<2x32xf32> -> vector<2x32xf32>
    %104 = vector.extract_strided_slice %28 {offsets = [0, 0], sizes = [2, 56], strides = [1, 1]} : vector<2x64xf32> to vector<2x56xf32>
    %105 = vector.extract_strided_slice %23 {offsets = [0, 0], sizes = [2, 1], strides = [1, 1]} : vector<2x9xf32> to vector<2x1xf32>
    %106 = vector.broadcast %105 : vector<2x1xf32> to vector<2x56xf32>
    %107 = arith.mulf %104, %106 : vector<2x56xf32>
    %108 = vector.extract_strided_slice %28 {offsets = [0, 4], sizes = [2, 56], strides = [1, 1]} : vector<2x64xf32> to vector<2x56xf32>
    %109 = vector.extract_strided_slice %23 {offsets = [0, 1], sizes = [2, 1], strides = [1, 1]} : vector<2x9xf32> to vector<2x1xf32>
    %110 = vector.broadcast %109 : vector<2x1xf32> to vector<2x56xf32>
    %111 = arith.mulf %108, %110 : vector<2x56xf32>
    %112 = arith.addf %107, %111 : vector<2x56xf32>
    %113 = vector.extract_strided_slice %28 {offsets = [0, 8], sizes = [2, 56], strides = [1, 1]} : vector<2x64xf32> to vector<2x56xf32>
    %114 = vector.extract_strided_slice %23 {offsets = [0, 2], sizes = [2, 1], strides = [1, 1]} : vector<2x9xf32> to vector<2x1xf32>
    %115 = vector.broadcast %114 : vector<2x1xf32> to vector<2x56xf32>
    %116 = arith.mulf %113, %115 : vector<2x56xf32>
    %117 = arith.addf %112, %116 : vector<2x56xf32>
    %118 = vector.extract_strided_slice %30 {offsets = [0, 0], sizes = [2, 56], strides = [1, 1]} : vector<2x64xf32> to vector<2x56xf32>
    %119 = vector.extract_strided_slice %23 {offsets = [0, 3], sizes = [2, 1], strides = [1, 1]} : vector<2x9xf32> to vector<2x1xf32>
    %120 = vector.broadcast %119 : vector<2x1xf32> to vector<2x56xf32>
    %121 = arith.mulf %118, %120 : vector<2x56xf32>
    %122 = arith.addf %117, %121 : vector<2x56xf32>
    %123 = vector.extract_strided_slice %30 {offsets = [0, 4], sizes = [2, 56], strides = [1, 1]} : vector<2x64xf32> to vector<2x56xf32>
    %124 = vector.extract_strided_slice %23 {offsets = [0, 4], sizes = [2, 1], strides = [1, 1]} : vector<2x9xf32> to vector<2x1xf32>
    %125 = vector.broadcast %124 : vector<2x1xf32> to vector<2x56xf32>
    %126 = arith.mulf %123, %125 : vector<2x56xf32>
    %127 = arith.addf %122, %126 : vector<2x56xf32>
    %128 = vector.extract_strided_slice %30 {offsets = [0, 8], sizes = [2, 56], strides = [1, 1]} : vector<2x64xf32> to vector<2x56xf32>
    %129 = vector.extract_strided_slice %23 {offsets = [0, 5], sizes = [2, 1], strides = [1, 1]} : vector<2x9xf32> to vector<2x1xf32>
    %130 = vector.broadcast %129 : vector<2x1xf32> to vector<2x56xf32>
    %131 = arith.mulf %128, %130 : vector<2x56xf32>
    %132 = arith.addf %127, %131 : vector<2x56xf32>
    %133 = vector.extract_strided_slice %32 {offsets = [0, 0], sizes = [2, 56], strides = [1, 1]} : vector<2x64xf32> to vector<2x56xf32>
    %134 = vector.extract_strided_slice %23 {offsets = [0, 6], sizes = [2, 1], strides = [1, 1]} : vector<2x9xf32> to vector<2x1xf32>
    %135 = vector.broadcast %134 : vector<2x1xf32> to vector<2x56xf32>
    %136 = arith.mulf %133, %135 : vector<2x56xf32>
    %137 = arith.addf %132, %136 : vector<2x56xf32>
    %138 = vector.extract_strided_slice %32 {offsets = [0, 4], sizes = [2, 56], strides = [1, 1]} : vector<2x64xf32> to vector<2x56xf32>
    %139 = vector.extract_strided_slice %23 {offsets = [0, 7], sizes = [2, 1], strides = [1, 1]} : vector<2x9xf32> to vector<2x1xf32>
    %140 = vector.broadcast %139 : vector<2x1xf32> to vector<2x56xf32>
    %141 = arith.mulf %138, %140 : vector<2x56xf32>
    %142 = arith.addf %137, %141 : vector<2x56xf32>
    %143 = vector.extract_strided_slice %32 {offsets = [0, 8], sizes = [2, 56], strides = [1, 1]} : vector<2x64xf32> to vector<2x56xf32>
    %144 = vector.extract_strided_slice %23 {offsets = [0, 8], sizes = [2, 1], strides = [1, 1]} : vector<2x9xf32> to vector<2x1xf32>
    %145 = vector.broadcast %144 : vector<2x1xf32> to vector<2x56xf32>
    %146 = arith.mulf %143, %145 : vector<2x56xf32>
    %147 = arith.addf %142, %146 : vector<2x56xf32>
    %c1 = arith.constant 1 : index
    %c0_31 = arith.constant 0 : index
    %c0_32 = arith.constant 0 : index
    %148 = vector.load %arg9[%c1, %c0_31, %c0_32] : memref<14x56x32xf32, #tpu.memory_space<vmem>>, vector<1x56x32xf32>
    %149 = vector.shape_cast %148 : vector<1x56x32xf32> to vector<56x32xf32>
    %cst_33 = arith.constant dense<0.000000e+00> : vector<2x32xf32>
    %150 = tpu.matmul %147, %149, %cst_33 {dimension_numbers = #tpu.dot_dimension_numbers<[1], [0], [0], [1], [0, 0, 1, 1], [], []>} : vector<2x56xf32>, vector<56x32xf32>, vector<2x32xf32> -> vector<2x32xf32>
    %151 = arith.addf %103, %150 : vector<2x32xf32>
    %152 = vector.extract_strided_slice %30 {offsets = [0, 0], sizes = [2, 56], strides = [1, 1]} : vector<2x64xf32> to vector<2x56xf32>
    %153 = vector.extract_strided_slice %23 {offsets = [0, 0], sizes = [2, 1], strides = [1, 1]} : vector<2x9xf32> to vector<2x1xf32>
    %154 = vector.broadcast %153 : vector<2x1xf32> to vector<2x56xf32>
    %155 = arith.mulf %152, %154 : vector<2x56xf32>
    %156 = vector.extract_strided_slice %30 {offsets = [0, 4], sizes = [2, 56], strides = [1, 1]} : vector<2x64xf32> to vector<2x56xf32>
    %157 = vector.extract_strided_slice %23 {offsets = [0, 1], sizes = [2, 1], strides = [1, 1]} : vector<2x9xf32> to vector<2x1xf32>
    %158 = vector.broadcast %157 : vector<2x1xf32> to vector<2x56xf32>
    %159 = arith.mulf %156, %158 : vector<2x56xf32>
    %160 = arith.addf %155, %159 : vector<2x56xf32>
    %161 = vector.extract_strided_slice %30 {offsets = [0, 8], sizes = [2, 56], strides = [1, 1]} : vector<2x64xf32> to vector<2x56xf32>
    %162 = vector.extract_strided_slice %23 {offsets = [0, 2], sizes = [2, 1], strides = [1, 1]} : vector<2x9xf32> to vector<2x1xf32>
    %163 = vector.broadcast %162 : vector<2x1xf32> to vector<2x56xf32>
    %164 = arith.mulf %161, %163 : vector<2x56xf32>
    %165 = arith.addf %160, %164 : vector<2x56xf32>
    %166 = vector.extract_strided_slice %32 {offsets = [0, 0], sizes = [2, 56], strides = [1, 1]} : vector<2x64xf32> to vector<2x56xf32>
    %167 = vector.extract_strided_slice %23 {offsets = [0, 3], sizes = [2, 1], strides = [1, 1]} : vector<2x9xf32> to vector<2x1xf32>
    %168 = vector.broadcast %167 : vector<2x1xf32> to vector<2x56xf32>
    %169 = arith.mulf %166, %168 : vector<2x56xf32>
    %170 = arith.addf %165, %169 : vector<2x56xf32>
    %171 = vector.extract_strided_slice %32 {offsets = [0, 4], sizes = [2, 56], strides = [1, 1]} : vector<2x64xf32> to vector<2x56xf32>
    %172 = vector.extract_strided_slice %23 {offsets = [0, 4], sizes = [2, 1], strides = [1, 1]} : vector<2x9xf32> to vector<2x1xf32>
    %173 = vector.broadcast %172 : vector<2x1xf32> to vector<2x56xf32>
    %174 = arith.mulf %171, %173 : vector<2x56xf32>
    %175 = arith.addf %170, %174 : vector<2x56xf32>
    %176 = vector.extract_strided_slice %32 {offsets = [0, 8], sizes = [2, 56], strides = [1, 1]} : vector<2x64xf32> to vector<2x56xf32>
    %177 = vector.extract_strided_slice %23 {offsets = [0, 5], sizes = [2, 1], strides = [1, 1]} : vector<2x9xf32> to vector<2x1xf32>
    %178 = vector.broadcast %177 : vector<2x1xf32> to vector<2x56xf32>
    %179 = arith.mulf %176, %178 : vector<2x56xf32>
    %180 = arith.addf %175, %179 : vector<2x56xf32>
    %181 = vector.extract_strided_slice %34 {offsets = [0, 0], sizes = [2, 56], strides = [1, 1]} : vector<2x64xf32> to vector<2x56xf32>
    %182 = vector.extract_strided_slice %23 {offsets = [0, 6], sizes = [2, 1], strides = [1, 1]} : vector<2x9xf32> to vector<2x1xf32>
    %183 = vector.broadcast %182 : vector<2x1xf32> to vector<2x56xf32>
    %184 = arith.mulf %181, %183 : vector<2x56xf32>
    %185 = arith.addf %180, %184 : vector<2x56xf32>
    %186 = vector.extract_strided_slice %34 {offsets = [0, 4], sizes = [2, 56], strides = [1, 1]} : vector<2x64xf32> to vector<2x56xf32>
    %187 = vector.extract_strided_slice %23 {offsets = [0, 7], sizes = [2, 1], strides = [1, 1]} : vector<2x9xf32> to vector<2x1xf32>
    %188 = vector.broadcast %187 : vector<2x1xf32> to vector<2x56xf32>
    %189 = arith.mulf %186, %188 : vector<2x56xf32>
    %190 = arith.addf %185, %189 : vector<2x56xf32>
    %191 = vector.extract_strided_slice %34 {offsets = [0, 8], sizes = [2, 56], strides = [1, 1]} : vector<2x64xf32> to vector<2x56xf32>
    %192 = vector.extract_strided_slice %23 {offsets = [0, 8], sizes = [2, 1], strides = [1, 1]} : vector<2x9xf32> to vector<2x1xf32>
    %193 = vector.broadcast %192 : vector<2x1xf32> to vector<2x56xf32>
    %194 = arith.mulf %191, %193 : vector<2x56xf32>
    %195 = arith.addf %190, %194 : vector<2x56xf32>
    %c2 = arith.constant 2 : index
    %c0_34 = arith.constant 0 : index
    %c0_35 = arith.constant 0 : index
    %196 = vector.load %arg9[%c2, %c0_34, %c0_35] : memref<14x56x32xf32, #tpu.memory_space<vmem>>, vector<1x56x32xf32>
    %197 = vector.shape_cast %196 : vector<1x56x32xf32> to vector<56x32xf32>
    %cst_36 = arith.constant dense<0.000000e+00> : vector<2x32xf32>
    %198 = tpu.matmul %195, %197, %cst_36 {dimension_numbers = #tpu.dot_dimension_numbers<[1], [0], [0], [1], [0, 0, 1, 1], [], []>} : vector<2x56xf32>, vector<56x32xf32>, vector<2x32xf32> -> vector<2x32xf32>
    %199 = arith.addf %151, %198 : vector<2x32xf32>
    %200 = vector.extract_strided_slice %32 {offsets = [0, 0], sizes = [2, 56], strides = [1, 1]} : vector<2x64xf32> to vector<2x56xf32>
    %201 = vector.extract_strided_slice %23 {offsets = [0, 0], sizes = [2, 1], strides = [1, 1]} : vector<2x9xf32> to vector<2x1xf32>
    %202 = vector.broadcast %201 : vector<2x1xf32> to vector<2x56xf32>
    %203 = arith.mulf %200, %202 : vector<2x56xf32>
    %204 = vector.extract_strided_slice %32 {offsets = [0, 4], sizes = [2, 56], strides = [1, 1]} : vector<2x64xf32> to vector<2x56xf32>
    %205 = vector.extract_strided_slice %23 {offsets = [0, 1], sizes = [2, 1], strides = [1, 1]} : vector<2x9xf32> to vector<2x1xf32>
    %206 = vector.broadcast %205 : vector<2x1xf32> to vector<2x56xf32>
    %207 = arith.mulf %204, %206 : vector<2x56xf32>
    %208 = arith.addf %203, %207 : vector<2x56xf32>
    %209 = vector.extract_strided_slice %32 {offsets = [0, 8], sizes = [2, 56], strides = [1, 1]} : vector<2x64xf32> to vector<2x56xf32>
    %210 = vector.extract_strided_slice %23 {offsets = [0, 2], sizes = [2, 1], strides = [1, 1]} : vector<2x9xf32> to vector<2x1xf32>
    %211 = vector.broadcast %210 : vector<2x1xf32> to vector<2x56xf32>
    %212 = arith.mulf %209, %211 : vector<2x56xf32>
    %213 = arith.addf %208, %212 : vector<2x56xf32>
    %214 = vector.extract_strided_slice %34 {offsets = [0, 0], sizes = [2, 56], strides = [1, 1]} : vector<2x64xf32> to vector<2x56xf32>
    %215 = vector.extract_strided_slice %23 {offsets = [0, 3], sizes = [2, 1], strides = [1, 1]} : vector<2x9xf32> to vector<2x1xf32>
    %216 = vector.broadcast %215 : vector<2x1xf32> to vector<2x56xf32>
    %217 = arith.mulf %214, %216 : vector<2x56xf32>
    %218 = arith.addf %213, %217 : vector<2x56xf32>
    %219 = vector.extract_strided_slice %34 {offsets = [0, 4], sizes = [2, 56], strides = [1, 1]} : vector<2x64xf32> to vector<2x56xf32>
    %220 = vector.extract_strided_slice %23 {offsets = [0, 4], sizes = [2, 1], strides = [1, 1]} : vector<2x9xf32> to vector<2x1xf32>
    %221 = vector.broadcast %220 : vector<2x1xf32> to vector<2x56xf32>
    %222 = arith.mulf %219, %221 : vector<2x56xf32>
    %223 = arith.addf %218, %222 : vector<2x56xf32>
    %224 = vector.extract_strided_slice %34 {offsets = [0, 8], sizes = [2, 56], strides = [1, 1]} : vector<2x64xf32> to vector<2x56xf32>
    %225 = vector.extract_strided_slice %23 {offsets = [0, 5], sizes = [2, 1], strides = [1, 1]} : vector<2x9xf32> to vector<2x1xf32>
    %226 = vector.broadcast %225 : vector<2x1xf32> to vector<2x56xf32>
    %227 = arith.mulf %224, %226 : vector<2x56xf32>
    %228 = arith.addf %223, %227 : vector<2x56xf32>
    %229 = vector.extract_strided_slice %36 {offsets = [0, 0], sizes = [2, 56], strides = [1, 1]} : vector<2x64xf32> to vector<2x56xf32>
    %230 = vector.extract_strided_slice %23 {offsets = [0, 6], sizes = [2, 1], strides = [1, 1]} : vector<2x9xf32> to vector<2x1xf32>
    %231 = vector.broadcast %230 : vector<2x1xf32> to vector<2x56xf32>
    %232 = arith.mulf %229, %231 : vector<2x56xf32>
    %233 = arith.addf %228, %232 : vector<2x56xf32>
    %234 = vector.extract_strided_slice %36 {offsets = [0, 4], sizes = [2, 56], strides = [1, 1]} : vector<2x64xf32> to vector<2x56xf32>
    %235 = vector.extract_strided_slice %23 {offsets = [0, 7], sizes = [2, 1], strides = [1, 1]} : vector<2x9xf32> to vector<2x1xf32>
    %236 = vector.broadcast %235 : vector<2x1xf32> to vector<2x56xf32>
    %237 = arith.mulf %234, %236 : vector<2x56xf32>
    %238 = arith.addf %233, %237 : vector<2x56xf32>
    %239 = vector.extract_strided_slice %36 {offsets = [0, 8], sizes = [2, 56], strides = [1, 1]} : vector<2x64xf32> to vector<2x56xf32>
    %240 = vector.extract_strided_slice %23 {offsets = [0, 8], sizes = [2, 1], strides = [1, 1]} : vector<2x9xf32> to vector<2x1xf32>
    %241 = vector.broadcast %240 : vector<2x1xf32> to vector<2x56xf32>
    %242 = arith.mulf %239, %241 : vector<2x56xf32>
    %243 = arith.addf %238, %242 : vector<2x56xf32>
    %c3 = arith.constant 3 : index
    %c0_37 = arith.constant 0 : index
    %c0_38 = arith.constant 0 : index
    %244 = vector.load %arg9[%c3, %c0_37, %c0_38] : memref<14x56x32xf32, #tpu.memory_space<vmem>>, vector<1x56x32xf32>
    %245 = vector.shape_cast %244 : vector<1x56x32xf32> to vector<56x32xf32>
    %cst_39 = arith.constant dense<0.000000e+00> : vector<2x32xf32>
    %246 = tpu.matmul %243, %245, %cst_39 {dimension_numbers = #tpu.dot_dimension_numbers<[1], [0], [0], [1], [0, 0, 1, 1], [], []>} : vector<2x56xf32>, vector<56x32xf32>, vector<2x32xf32> -> vector<2x32xf32>
    %247 = arith.addf %199, %246 : vector<2x32xf32>
    %248 = vector.extract_strided_slice %34 {offsets = [0, 0], sizes = [2, 56], strides = [1, 1]} : vector<2x64xf32> to vector<2x56xf32>
    %249 = vector.extract_strided_slice %23 {offsets = [0, 0], sizes = [2, 1], strides = [1, 1]} : vector<2x9xf32> to vector<2x1xf32>
    %250 = vector.broadcast %249 : vector<2x1xf32> to vector<2x56xf32>
    %251 = arith.mulf %248, %250 : vector<2x56xf32>
    %252 = vector.extract_strided_slice %34 {offsets = [0, 4], sizes = [2, 56], strides = [1, 1]} : vector<2x64xf32> to vector<2x56xf32>
    %253 = vector.extract_strided_slice %23 {offsets = [0, 1], sizes = [2, 1], strides = [1, 1]} : vector<2x9xf32> to vector<2x1xf32>
    %254 = vector.broadcast %253 : vector<2x1xf32> to vector<2x56xf32>
    %255 = arith.mulf %252, %254 : vector<2x56xf32>
    %256 = arith.addf %251, %255 : vector<2x56xf32>
    %257 = vector.extract_strided_slice %34 {offsets = [0, 8], sizes = [2, 56], strides = [1, 1]} : vector<2x64xf32> to vector<2x56xf32>
    %258 = vector.extract_strided_slice %23 {offsets = [0, 2], sizes = [2, 1], strides = [1, 1]} : vector<2x9xf32> to vector<2x1xf32>
    %259 = vector.broadcast %258 : vector<2x1xf32> to vector<2x56xf32>
    %260 = arith.mulf %257, %259 : vector<2x56xf32>
    %261 = arith.addf %256, %260 : vector<2x56xf32>
    %262 = vector.extract_strided_slice %36 {offsets = [0, 0], sizes = [2, 56], strides = [1, 1]} : vector<2x64xf32> to vector<2x56xf32>
    %263 = vector.extract_strided_slice %23 {offsets = [0, 3], sizes = [2, 1], strides = [1, 1]} : vector<2x9xf32> to vector<2x1xf32>
    %264 = vector.broadcast %263 : vector<2x1xf32> to vector<2x56xf32>
    %265 = arith.mulf %262, %264 : vector<2x56xf32>
    %266 = arith.addf %261, %265 : vector<2x56xf32>
    %267 = vector.extract_strided_slice %36 {offsets = [0, 4], sizes = [2, 56], strides = [1, 1]} : vector<2x64xf32> to vector<2x56xf32>
    %268 = vector.extract_strided_slice %23 {offsets = [0, 4], sizes = [2, 1], strides = [1, 1]} : vector<2x9xf32> to vector<2x1xf32>
    %269 = vector.broadcast %268 : vector<2x1xf32> to vector<2x56xf32>
    %270 = arith.mulf %267, %269 : vector<2x56xf32>
    %271 = arith.addf %266, %270 : vector<2x56xf32>
    %272 = vector.extract_strided_slice %36 {offsets = [0, 8], sizes = [2, 56], strides = [1, 1]} : vector<2x64xf32> to vector<2x56xf32>
    %273 = vector.extract_strided_slice %23 {offsets = [0, 5], sizes = [2, 1], strides = [1, 1]} : vector<2x9xf32> to vector<2x1xf32>
    %274 = vector.broadcast %273 : vector<2x1xf32> to vector<2x56xf32>
    %275 = arith.mulf %272, %274 : vector<2x56xf32>
    %276 = arith.addf %271, %275 : vector<2x56xf32>
    %277 = vector.extract_strided_slice %38 {offsets = [0, 0], sizes = [2, 56], strides = [1, 1]} : vector<2x64xf32> to vector<2x56xf32>
    %278 = vector.extract_strided_slice %23 {offsets = [0, 6], sizes = [2, 1], strides = [1, 1]} : vector<2x9xf32> to vector<2x1xf32>
    %279 = vector.broadcast %278 : vector<2x1xf32> to vector<2x56xf32>
    %280 = arith.mulf %277, %279 : vector<2x56xf32>
    %281 = arith.addf %276, %280 : vector<2x56xf32>
    %282 = vector.extract_strided_slice %38 {offsets = [0, 4], sizes = [2, 56], strides = [1, 1]} : vector<2x64xf32> to vector<2x56xf32>
    %283 = vector.extract_strided_slice %23 {offsets = [0, 7], sizes = [2, 1], strides = [1, 1]} : vector<2x9xf32> to vector<2x1xf32>
    %284 = vector.broadcast %283 : vector<2x1xf32> to vector<2x56xf32>
    %285 = arith.mulf %282, %284 : vector<2x56xf32>
    %286 = arith.addf %281, %285 : vector<2x56xf32>
    %287 = vector.extract_strided_slice %38 {offsets = [0, 8], sizes = [2, 56], strides = [1, 1]} : vector<2x64xf32> to vector<2x56xf32>
    %288 = vector.extract_strided_slice %23 {offsets = [0, 8], sizes = [2, 1], strides = [1, 1]} : vector<2x9xf32> to vector<2x1xf32>
    %289 = vector.broadcast %288 : vector<2x1xf32> to vector<2x56xf32>
    %290 = arith.mulf %287, %289 : vector<2x56xf32>
    %291 = arith.addf %286, %290 : vector<2x56xf32>
    %c4 = arith.constant 4 : index
    %c0_40 = arith.constant 0 : index
    %c0_41 = arith.constant 0 : index
    %292 = vector.load %arg9[%c4, %c0_40, %c0_41] : memref<14x56x32xf32, #tpu.memory_space<vmem>>, vector<1x56x32xf32>
    %293 = vector.shape_cast %292 : vector<1x56x32xf32> to vector<56x32xf32>
    %cst_42 = arith.constant dense<0.000000e+00> : vector<2x32xf32>
    %294 = tpu.matmul %291, %293, %cst_42 {dimension_numbers = #tpu.dot_dimension_numbers<[1], [0], [0], [1], [0, 0, 1, 1], [], []>} : vector<2x56xf32>, vector<56x32xf32>, vector<2x32xf32> -> vector<2x32xf32>
    %295 = arith.addf %247, %294 : vector<2x32xf32>
    %296 = vector.extract_strided_slice %36 {offsets = [0, 0], sizes = [2, 56], strides = [1, 1]} : vector<2x64xf32> to vector<2x56xf32>
    %297 = vector.extract_strided_slice %23 {offsets = [0, 0], sizes = [2, 1], strides = [1, 1]} : vector<2x9xf32> to vector<2x1xf32>
    %298 = vector.broadcast %297 : vector<2x1xf32> to vector<2x56xf32>
    %299 = arith.mulf %296, %298 : vector<2x56xf32>
    %300 = vector.extract_strided_slice %36 {offsets = [0, 4], sizes = [2, 56], strides = [1, 1]} : vector<2x64xf32> to vector<2x56xf32>
    %301 = vector.extract_strided_slice %23 {offsets = [0, 1], sizes = [2, 1], strides = [1, 1]} : vector<2x9xf32> to vector<2x1xf32>
    %302 = vector.broadcast %301 : vector<2x1xf32> to vector<2x56xf32>
    %303 = arith.mulf %300, %302 : vector<2x56xf32>
    %304 = arith.addf %299, %303 : vector<2x56xf32>
    %305 = vector.extract_strided_slice %36 {offsets = [0, 8], sizes = [2, 56], strides = [1, 1]} : vector<2x64xf32> to vector<2x56xf32>
    %306 = vector.extract_strided_slice %23 {offsets = [0, 2], sizes = [2, 1], strides = [1, 1]} : vector<2x9xf32> to vector<2x1xf32>
    %307 = vector.broadcast %306 : vector<2x1xf32> to vector<2x56xf32>
    %308 = arith.mulf %305, %307 : vector<2x56xf32>
    %309 = arith.addf %304, %308 : vector<2x56xf32>
    %310 = vector.extract_strided_slice %38 {offsets = [0, 0], sizes = [2, 56], strides = [1, 1]} : vector<2x64xf32> to vector<2x56xf32>
    %311 = vector.extract_strided_slice %23 {offsets = [0, 3], sizes = [2, 1], strides = [1, 1]} : vector<2x9xf32> to vector<2x1xf32>
    %312 = vector.broadcast %311 : vector<2x1xf32> to vector<2x56xf32>
    %313 = arith.mulf %310, %312 : vector<2x56xf32>
    %314 = arith.addf %309, %313 : vector<2x56xf32>
    %315 = vector.extract_strided_slice %38 {offsets = [0, 4], sizes = [2, 56], strides = [1, 1]} : vector<2x64xf32> to vector<2x56xf32>
    %316 = vector.extract_strided_slice %23 {offsets = [0, 4], sizes = [2, 1], strides = [1, 1]} : vector<2x9xf32> to vector<2x1xf32>
    %317 = vector.broadcast %316 : vector<2x1xf32> to vector<2x56xf32>
    %318 = arith.mulf %315, %317 : vector<2x56xf32>
    %319 = arith.addf %314, %318 : vector<2x56xf32>
    %320 = vector.extract_strided_slice %38 {offsets = [0, 8], sizes = [2, 56], strides = [1, 1]} : vector<2x64xf32> to vector<2x56xf32>
    %321 = vector.extract_strided_slice %23 {offsets = [0, 5], sizes = [2, 1], strides = [1, 1]} : vector<2x9xf32> to vector<2x1xf32>
    %322 = vector.broadcast %321 : vector<2x1xf32> to vector<2x56xf32>
    %323 = arith.mulf %320, %322 : vector<2x56xf32>
    %324 = arith.addf %319, %323 : vector<2x56xf32>
    %325 = vector.extract_strided_slice %40 {offsets = [0, 0], sizes = [2, 56], strides = [1, 1]} : vector<2x64xf32> to vector<2x56xf32>
    %326 = vector.extract_strided_slice %23 {offsets = [0, 6], sizes = [2, 1], strides = [1, 1]} : vector<2x9xf32> to vector<2x1xf32>
    %327 = vector.broadcast %326 : vector<2x1xf32> to vector<2x56xf32>
    %328 = arith.mulf %325, %327 : vector<2x56xf32>
    %329 = arith.addf %324, %328 : vector<2x56xf32>
    %330 = vector.extract_strided_slice %40 {offsets = [0, 4], sizes = [2, 56], strides = [1, 1]} : vector<2x64xf32> to vector<2x56xf32>
    %331 = vector.extract_strided_slice %23 {offsets = [0, 7], sizes = [2, 1], strides = [1, 1]} : vector<2x9xf32> to vector<2x1xf32>
    %332 = vector.broadcast %331 : vector<2x1xf32> to vector<2x56xf32>
    %333 = arith.mulf %330, %332 : vector<2x56xf32>
    %334 = arith.addf %329, %333 : vector<2x56xf32>
    %335 = vector.extract_strided_slice %40 {offsets = [0, 8], sizes = [2, 56], strides = [1, 1]} : vector<2x64xf32> to vector<2x56xf32>
    %336 = vector.extract_strided_slice %23 {offsets = [0, 8], sizes = [2, 1], strides = [1, 1]} : vector<2x9xf32> to vector<2x1xf32>
    %337 = vector.broadcast %336 : vector<2x1xf32> to vector<2x56xf32>
    %338 = arith.mulf %335, %337 : vector<2x56xf32>
    %339 = arith.addf %334, %338 : vector<2x56xf32>
    %c5 = arith.constant 5 : index
    %c0_43 = arith.constant 0 : index
    %c0_44 = arith.constant 0 : index
    %340 = vector.load %arg9[%c5, %c0_43, %c0_44] : memref<14x56x32xf32, #tpu.memory_space<vmem>>, vector<1x56x32xf32>
    %341 = vector.shape_cast %340 : vector<1x56x32xf32> to vector<56x32xf32>
    %cst_45 = arith.constant dense<0.000000e+00> : vector<2x32xf32>
    %342 = tpu.matmul %339, %341, %cst_45 {dimension_numbers = #tpu.dot_dimension_numbers<[1], [0], [0], [1], [0, 0, 1, 1], [], []>} : vector<2x56xf32>, vector<56x32xf32>, vector<2x32xf32> -> vector<2x32xf32>
    %343 = arith.addf %295, %342 : vector<2x32xf32>
    %344 = vector.extract_strided_slice %38 {offsets = [0, 0], sizes = [2, 56], strides = [1, 1]} : vector<2x64xf32> to vector<2x56xf32>
    %345 = vector.extract_strided_slice %23 {offsets = [0, 0], sizes = [2, 1], strides = [1, 1]} : vector<2x9xf32> to vector<2x1xf32>
    %346 = vector.broadcast %345 : vector<2x1xf32> to vector<2x56xf32>
    %347 = arith.mulf %344, %346 : vector<2x56xf32>
    %348 = vector.extract_strided_slice %38 {offsets = [0, 4], sizes = [2, 56], strides = [1, 1]} : vector<2x64xf32> to vector<2x56xf32>
    %349 = vector.extract_strided_slice %23 {offsets = [0, 1], sizes = [2, 1], strides = [1, 1]} : vector<2x9xf32> to vector<2x1xf32>
    %350 = vector.broadcast %349 : vector<2x1xf32> to vector<2x56xf32>
    %351 = arith.mulf %348, %350 : vector<2x56xf32>
    %352 = arith.addf %347, %351 : vector<2x56xf32>
    %353 = vector.extract_strided_slice %38 {offsets = [0, 8], sizes = [2, 56], strides = [1, 1]} : vector<2x64xf32> to vector<2x56xf32>
    %354 = vector.extract_strided_slice %23 {offsets = [0, 2], sizes = [2, 1], strides = [1, 1]} : vector<2x9xf32> to vector<2x1xf32>
    %355 = vector.broadcast %354 : vector<2x1xf32> to vector<2x56xf32>
    %356 = arith.mulf %353, %355 : vector<2x56xf32>
    %357 = arith.addf %352, %356 : vector<2x56xf32>
    %358 = vector.extract_strided_slice %40 {offsets = [0, 0], sizes = [2, 56], strides = [1, 1]} : vector<2x64xf32> to vector<2x56xf32>
    %359 = vector.extract_strided_slice %23 {offsets = [0, 3], sizes = [2, 1], strides = [1, 1]} : vector<2x9xf32> to vector<2x1xf32>
    %360 = vector.broadcast %359 : vector<2x1xf32> to vector<2x56xf32>
    %361 = arith.mulf %358, %360 : vector<2x56xf32>
    %362 = arith.addf %357, %361 : vector<2x56xf32>
    %363 = vector.extract_strided_slice %40 {offsets = [0, 4], sizes = [2, 56], strides = [1, 1]} : vector<2x64xf32> to vector<2x56xf32>
    %364 = vector.extract_strided_slice %23 {offsets = [0, 4], sizes = [2, 1], strides = [1, 1]} : vector<2x9xf32> to vector<2x1xf32>
    %365 = vector.broadcast %364 : vector<2x1xf32> to vector<2x56xf32>
    %366 = arith.mulf %363, %365 : vector<2x56xf32>
    %367 = arith.addf %362, %366 : vector<2x56xf32>
    %368 = vector.extract_strided_slice %40 {offsets = [0, 8], sizes = [2, 56], strides = [1, 1]} : vector<2x64xf32> to vector<2x56xf32>
    %369 = vector.extract_strided_slice %23 {offsets = [0, 5], sizes = [2, 1], strides = [1, 1]} : vector<2x9xf32> to vector<2x1xf32>
    %370 = vector.broadcast %369 : vector<2x1xf32> to vector<2x56xf32>
    %371 = arith.mulf %368, %370 : vector<2x56xf32>
    %372 = arith.addf %367, %371 : vector<2x56xf32>
    %373 = vector.extract_strided_slice %42 {offsets = [0, 0], sizes = [2, 56], strides = [1, 1]} : vector<2x64xf32> to vector<2x56xf32>
    %374 = vector.extract_strided_slice %23 {offsets = [0, 6], sizes = [2, 1], strides = [1, 1]} : vector<2x9xf32> to vector<2x1xf32>
    %375 = vector.broadcast %374 : vector<2x1xf32> to vector<2x56xf32>
    %376 = arith.mulf %373, %375 : vector<2x56xf32>
    %377 = arith.addf %372, %376 : vector<2x56xf32>
    %378 = vector.extract_strided_slice %42 {offsets = [0, 4], sizes = [2, 56], strides = [1, 1]} : vector<2x64xf32> to vector<2x56xf32>
    %379 = vector.extract_strided_slice %23 {offsets = [0, 7], sizes = [2, 1], strides = [1, 1]} : vector<2x9xf32> to vector<2x1xf32>
    %380 = vector.broadcast %379 : vector<2x1xf32> to vector<2x56xf32>
    %381 = arith.mulf %378, %380 : vector<2x56xf32>
    %382 = arith.addf %377, %381 : vector<2x56xf32>
    %383 = vector.extract_strided_slice %42 {offsets = [0, 8], sizes = [2, 56], strides = [1, 1]} : vector<2x64xf32> to vector<2x56xf32>
    %384 = vector.extract_strided_slice %23 {offsets = [0, 8], sizes = [2, 1], strides = [1, 1]} : vector<2x9xf32> to vector<2x1xf32>
    %385 = vector.broadcast %384 : vector<2x1xf32> to vector<2x56xf32>
    %386 = arith.mulf %383, %385 : vector<2x56xf32>
    %387 = arith.addf %382, %386 : vector<2x56xf32>
    %c6 = arith.constant 6 : index
    %c0_46 = arith.constant 0 : index
    %c0_47 = arith.constant 0 : index
    %388 = vector.load %arg9[%c6, %c0_46, %c0_47] : memref<14x56x32xf32, #tpu.memory_space<vmem>>, vector<1x56x32xf32>
    %389 = vector.shape_cast %388 : vector<1x56x32xf32> to vector<56x32xf32>
    %cst_48 = arith.constant dense<0.000000e+00> : vector<2x32xf32>
    %390 = tpu.matmul %387, %389, %cst_48 {dimension_numbers = #tpu.dot_dimension_numbers<[1], [0], [0], [1], [0, 0, 1, 1], [], []>} : vector<2x56xf32>, vector<56x32xf32>, vector<2x32xf32> -> vector<2x32xf32>
    %391 = arith.addf %343, %390 : vector<2x32xf32>
    %392 = vector.extract_strided_slice %40 {offsets = [0, 0], sizes = [2, 56], strides = [1, 1]} : vector<2x64xf32> to vector<2x56xf32>
    %393 = vector.extract_strided_slice %23 {offsets = [0, 0], sizes = [2, 1], strides = [1, 1]} : vector<2x9xf32> to vector<2x1xf32>
    %394 = vector.broadcast %393 : vector<2x1xf32> to vector<2x56xf32>
    %395 = arith.mulf %392, %394 : vector<2x56xf32>
    %396 = vector.extract_strided_slice %40 {offsets = [0, 4], sizes = [2, 56], strides = [1, 1]} : vector<2x64xf32> to vector<2x56xf32>
    %397 = vector.extract_strided_slice %23 {offsets = [0, 1], sizes = [2, 1], strides = [1, 1]} : vector<2x9xf32> to vector<2x1xf32>
    %398 = vector.broadcast %397 : vector<2x1xf32> to vector<2x56xf32>
    %399 = arith.mulf %396, %398 : vector<2x56xf32>
    %400 = arith.addf %395, %399 : vector<2x56xf32>
    %401 = vector.extract_strided_slice %40 {offsets = [0, 8], sizes = [2, 56], strides = [1, 1]} : vector<2x64xf32> to vector<2x56xf32>
    %402 = vector.extract_strided_slice %23 {offsets = [0, 2], sizes = [2, 1], strides = [1, 1]} : vector<2x9xf32> to vector<2x1xf32>
    %403 = vector.broadcast %402 : vector<2x1xf32> to vector<2x56xf32>
    %404 = arith.mulf %401, %403 : vector<2x56xf32>
    %405 = arith.addf %400, %404 : vector<2x56xf32>
    %406 = vector.extract_strided_slice %42 {offsets = [0, 0], sizes = [2, 56], strides = [1, 1]} : vector<2x64xf32> to vector<2x56xf32>
    %407 = vector.extract_strided_slice %23 {offsets = [0, 3], sizes = [2, 1], strides = [1, 1]} : vector<2x9xf32> to vector<2x1xf32>
    %408 = vector.broadcast %407 : vector<2x1xf32> to vector<2x56xf32>
    %409 = arith.mulf %406, %408 : vector<2x56xf32>
    %410 = arith.addf %405, %409 : vector<2x56xf32>
    %411 = vector.extract_strided_slice %42 {offsets = [0, 4], sizes = [2, 56], strides = [1, 1]} : vector<2x64xf32> to vector<2x56xf32>
    %412 = vector.extract_strided_slice %23 {offsets = [0, 4], sizes = [2, 1], strides = [1, 1]} : vector<2x9xf32> to vector<2x1xf32>
    %413 = vector.broadcast %412 : vector<2x1xf32> to vector<2x56xf32>
    %414 = arith.mulf %411, %413 : vector<2x56xf32>
    %415 = arith.addf %410, %414 : vector<2x56xf32>
    %416 = vector.extract_strided_slice %42 {offsets = [0, 8], sizes = [2, 56], strides = [1, 1]} : vector<2x64xf32> to vector<2x56xf32>
    %417 = vector.extract_strided_slice %23 {offsets = [0, 5], sizes = [2, 1], strides = [1, 1]} : vector<2x9xf32> to vector<2x1xf32>
    %418 = vector.broadcast %417 : vector<2x1xf32> to vector<2x56xf32>
    %419 = arith.mulf %416, %418 : vector<2x56xf32>
    %420 = arith.addf %415, %419 : vector<2x56xf32>
    %421 = vector.extract_strided_slice %44 {offsets = [0, 0], sizes = [2, 56], strides = [1, 1]} : vector<2x64xf32> to vector<2x56xf32>
    %422 = vector.extract_strided_slice %23 {offsets = [0, 6], sizes = [2, 1], strides = [1, 1]} : vector<2x9xf32> to vector<2x1xf32>
    %423 = vector.broadcast %422 : vector<2x1xf32> to vector<2x56xf32>
    %424 = arith.mulf %421, %423 : vector<2x56xf32>
    %425 = arith.addf %420, %424 : vector<2x56xf32>
    %426 = vector.extract_strided_slice %44 {offsets = [0, 4], sizes = [2, 56], strides = [1, 1]} : vector<2x64xf32> to vector<2x56xf32>
    %427 = vector.extract_strided_slice %23 {offsets = [0, 7], sizes = [2, 1], strides = [1, 1]} : vector<2x9xf32> to vector<2x1xf32>
    %428 = vector.broadcast %427 : vector<2x1xf32> to vector<2x56xf32>
    %429 = arith.mulf %426, %428 : vector<2x56xf32>
    %430 = arith.addf %425, %429 : vector<2x56xf32>
    %431 = vector.extract_strided_slice %44 {offsets = [0, 8], sizes = [2, 56], strides = [1, 1]} : vector<2x64xf32> to vector<2x56xf32>
    %432 = vector.extract_strided_slice %23 {offsets = [0, 8], sizes = [2, 1], strides = [1, 1]} : vector<2x9xf32> to vector<2x1xf32>
    %433 = vector.broadcast %432 : vector<2x1xf32> to vector<2x56xf32>
    %434 = arith.mulf %431, %433 : vector<2x56xf32>
    %435 = arith.addf %430, %434 : vector<2x56xf32>
    %c7 = arith.constant 7 : index
    %c0_49 = arith.constant 0 : index
    %c0_50 = arith.constant 0 : index
    %436 = vector.load %arg9[%c7, %c0_49, %c0_50] : memref<14x56x32xf32, #tpu.memory_space<vmem>>, vector<1x56x32xf32>
    %437 = vector.shape_cast %436 : vector<1x56x32xf32> to vector<56x32xf32>
    %cst_51 = arith.constant dense<0.000000e+00> : vector<2x32xf32>
    %438 = tpu.matmul %435, %437, %cst_51 {dimension_numbers = #tpu.dot_dimension_numbers<[1], [0], [0], [1], [0, 0, 1, 1], [], []>} : vector<2x56xf32>, vector<56x32xf32>, vector<2x32xf32> -> vector<2x32xf32>
    %439 = arith.addf %391, %438 : vector<2x32xf32>
    %440 = vector.extract_strided_slice %42 {offsets = [0, 0], sizes = [2, 56], strides = [1, 1]} : vector<2x64xf32> to vector<2x56xf32>
    %441 = vector.extract_strided_slice %23 {offsets = [0, 0], sizes = [2, 1], strides = [1, 1]} : vector<2x9xf32> to vector<2x1xf32>
    %442 = vector.broadcast %441 : vector<2x1xf32> to vector<2x56xf32>
    %443 = arith.mulf %440, %442 : vector<2x56xf32>
    %444 = vector.extract_strided_slice %42 {offsets = [0, 4], sizes = [2, 56], strides = [1, 1]} : vector<2x64xf32> to vector<2x56xf32>
    %445 = vector.extract_strided_slice %23 {offsets = [0, 1], sizes = [2, 1], strides = [1, 1]} : vector<2x9xf32> to vector<2x1xf32>
    %446 = vector.broadcast %445 : vector<2x1xf32> to vector<2x56xf32>
    %447 = arith.mulf %444, %446 : vector<2x56xf32>
    %448 = arith.addf %443, %447 : vector<2x56xf32>
    %449 = vector.extract_strided_slice %42 {offsets = [0, 8], sizes = [2, 56], strides = [1, 1]} : vector<2x64xf32> to vector<2x56xf32>
    %450 = vector.extract_strided_slice %23 {offsets = [0, 2], sizes = [2, 1], strides = [1, 1]} : vector<2x9xf32> to vector<2x1xf32>
    %451 = vector.broadcast %450 : vector<2x1xf32> to vector<2x56xf32>
    %452 = arith.mulf %449, %451 : vector<2x56xf32>
    %453 = arith.addf %448, %452 : vector<2x56xf32>
    %454 = vector.extract_strided_slice %44 {offsets = [0, 0], sizes = [2, 56], strides = [1, 1]} : vector<2x64xf32> to vector<2x56xf32>
    %455 = vector.extract_strided_slice %23 {offsets = [0, 3], sizes = [2, 1], strides = [1, 1]} : vector<2x9xf32> to vector<2x1xf32>
    %456 = vector.broadcast %455 : vector<2x1xf32> to vector<2x56xf32>
    %457 = arith.mulf %454, %456 : vector<2x56xf32>
    %458 = arith.addf %453, %457 : vector<2x56xf32>
    %459 = vector.extract_strided_slice %44 {offsets = [0, 4], sizes = [2, 56], strides = [1, 1]} : vector<2x64xf32> to vector<2x56xf32>
    %460 = vector.extract_strided_slice %23 {offsets = [0, 4], sizes = [2, 1], strides = [1, 1]} : vector<2x9xf32> to vector<2x1xf32>
    %461 = vector.broadcast %460 : vector<2x1xf32> to vector<2x56xf32>
    %462 = arith.mulf %459, %461 : vector<2x56xf32>
    %463 = arith.addf %458, %462 : vector<2x56xf32>
    %464 = vector.extract_strided_slice %44 {offsets = [0, 8], sizes = [2, 56], strides = [1, 1]} : vector<2x64xf32> to vector<2x56xf32>
    %465 = vector.extract_strided_slice %23 {offsets = [0, 5], sizes = [2, 1], strides = [1, 1]} : vector<2x9xf32> to vector<2x1xf32>
    %466 = vector.broadcast %465 : vector<2x1xf32> to vector<2x56xf32>
    %467 = arith.mulf %464, %466 : vector<2x56xf32>
    %468 = arith.addf %463, %467 : vector<2x56xf32>
    %469 = vector.extract_strided_slice %46 {offsets = [0, 0], sizes = [2, 56], strides = [1, 1]} : vector<2x64xf32> to vector<2x56xf32>
    %470 = vector.extract_strided_slice %23 {offsets = [0, 6], sizes = [2, 1], strides = [1, 1]} : vector<2x9xf32> to vector<2x1xf32>
    %471 = vector.broadcast %470 : vector<2x1xf32> to vector<2x56xf32>
    %472 = arith.mulf %469, %471 : vector<2x56xf32>
    %473 = arith.addf %468, %472 : vector<2x56xf32>
    %474 = vector.extract_strided_slice %46 {offsets = [0, 4], sizes = [2, 56], strides = [1, 1]} : vector<2x64xf32> to vector<2x56xf32>
    %475 = vector.extract_strided_slice %23 {offsets = [0, 7], sizes = [2, 1], strides = [1, 1]} : vector<2x9xf32> to vector<2x1xf32>
    %476 = vector.broadcast %475 : vector<2x1xf32> to vector<2x56xf32>
    %477 = arith.mulf %474, %476 : vector<2x56xf32>
    %478 = arith.addf %473, %477 : vector<2x56xf32>
    %479 = vector.extract_strided_slice %46 {offsets = [0, 8], sizes = [2, 56], strides = [1, 1]} : vector<2x64xf32> to vector<2x56xf32>
    %480 = vector.extract_strided_slice %23 {offsets = [0, 8], sizes = [2, 1], strides = [1, 1]} : vector<2x9xf32> to vector<2x1xf32>
    %481 = vector.broadcast %480 : vector<2x1xf32> to vector<2x56xf32>
    %482 = arith.mulf %479, %481 : vector<2x56xf32>
    %483 = arith.addf %478, %482 : vector<2x56xf32>
    %c8 = arith.constant 8 : index
    %c0_52 = arith.constant 0 : index
    %c0_53 = arith.constant 0 : index
    %484 = vector.load %arg9[%c8, %c0_52, %c0_53] : memref<14x56x32xf32, #tpu.memory_space<vmem>>, vector<1x56x32xf32>
    %485 = vector.shape_cast %484 : vector<1x56x32xf32> to vector<56x32xf32>
    %cst_54 = arith.constant dense<0.000000e+00> : vector<2x32xf32>
    %486 = tpu.matmul %483, %485, %cst_54 {dimension_numbers = #tpu.dot_dimension_numbers<[1], [0], [0], [1], [0, 0, 1, 1], [], []>} : vector<2x56xf32>, vector<56x32xf32>, vector<2x32xf32> -> vector<2x32xf32>
    %487 = arith.addf %439, %486 : vector<2x32xf32>
    %488 = vector.extract_strided_slice %44 {offsets = [0, 0], sizes = [2, 56], strides = [1, 1]} : vector<2x64xf32> to vector<2x56xf32>
    %489 = vector.extract_strided_slice %23 {offsets = [0, 0], sizes = [2, 1], strides = [1, 1]} : vector<2x9xf32> to vector<2x1xf32>
    %490 = vector.broadcast %489 : vector<2x1xf32> to vector<2x56xf32>
    %491 = arith.mulf %488, %490 : vector<2x56xf32>
    %492 = vector.extract_strided_slice %44 {offsets = [0, 4], sizes = [2, 56], strides = [1, 1]} : vector<2x64xf32> to vector<2x56xf32>
    %493 = vector.extract_strided_slice %23 {offsets = [0, 1], sizes = [2, 1], strides = [1, 1]} : vector<2x9xf32> to vector<2x1xf32>
    %494 = vector.broadcast %493 : vector<2x1xf32> to vector<2x56xf32>
    %495 = arith.mulf %492, %494 : vector<2x56xf32>
    %496 = arith.addf %491, %495 : vector<2x56xf32>
    %497 = vector.extract_strided_slice %44 {offsets = [0, 8], sizes = [2, 56], strides = [1, 1]} : vector<2x64xf32> to vector<2x56xf32>
    %498 = vector.extract_strided_slice %23 {offsets = [0, 2], sizes = [2, 1], strides = [1, 1]} : vector<2x9xf32> to vector<2x1xf32>
    %499 = vector.broadcast %498 : vector<2x1xf32> to vector<2x56xf32>
    %500 = arith.mulf %497, %499 : vector<2x56xf32>
    %501 = arith.addf %496, %500 : vector<2x56xf32>
    %502 = vector.extract_strided_slice %46 {offsets = [0, 0], sizes = [2, 56], strides = [1, 1]} : vector<2x64xf32> to vector<2x56xf32>
    %503 = vector.extract_strided_slice %23 {offsets = [0, 3], sizes = [2, 1], strides = [1, 1]} : vector<2x9xf32> to vector<2x1xf32>
    %504 = vector.broadcast %503 : vector<2x1xf32> to vector<2x56xf32>
    %505 = arith.mulf %502, %504 : vector<2x56xf32>
    %506 = arith.addf %501, %505 : vector<2x56xf32>
    %507 = vector.extract_strided_slice %46 {offsets = [0, 4], sizes = [2, 56], strides = [1, 1]} : vector<2x64xf32> to vector<2x56xf32>
    %508 = vector.extract_strided_slice %23 {offsets = [0, 4], sizes = [2, 1], strides = [1, 1]} : vector<2x9xf32> to vector<2x1xf32>
    %509 = vector.broadcast %508 : vector<2x1xf32> to vector<2x56xf32>
    %510 = arith.mulf %507, %509 : vector<2x56xf32>
    %511 = arith.addf %506, %510 : vector<2x56xf32>
    %512 = vector.extract_strided_slice %46 {offsets = [0, 8], sizes = [2, 56], strides = [1, 1]} : vector<2x64xf32> to vector<2x56xf32>
    %513 = vector.extract_strided_slice %23 {offsets = [0, 5], sizes = [2, 1], strides = [1, 1]} : vector<2x9xf32> to vector<2x1xf32>
    %514 = vector.broadcast %513 : vector<2x1xf32> to vector<2x56xf32>
    %515 = arith.mulf %512, %514 : vector<2x56xf32>
    %516 = arith.addf %511, %515 : vector<2x56xf32>
    %517 = vector.extract_strided_slice %48 {offsets = [0, 0], sizes = [2, 56], strides = [1, 1]} : vector<2x64xf32> to vector<2x56xf32>
    %518 = vector.extract_strided_slice %23 {offsets = [0, 6], sizes = [2, 1], strides = [1, 1]} : vector<2x9xf32> to vector<2x1xf32>
    %519 = vector.broadcast %518 : vector<2x1xf32> to vector<2x56xf32>
    %520 = arith.mulf %517, %519 : vector<2x56xf32>
    %521 = arith.addf %516, %520 : vector<2x56xf32>
    %522 = vector.extract_strided_slice %48 {offsets = [0, 4], sizes = [2, 56], strides = [1, 1]} : vector<2x64xf32> to vector<2x56xf32>
    %523 = vector.extract_strided_slice %23 {offsets = [0, 7], sizes = [2, 1], strides = [1, 1]} : vector<2x9xf32> to vector<2x1xf32>
    %524 = vector.broadcast %523 : vector<2x1xf32> to vector<2x56xf32>
    %525 = arith.mulf %522, %524 : vector<2x56xf32>
    %526 = arith.addf %521, %525 : vector<2x56xf32>
    %527 = vector.extract_strided_slice %48 {offsets = [0, 8], sizes = [2, 56], strides = [1, 1]} : vector<2x64xf32> to vector<2x56xf32>
    %528 = vector.extract_strided_slice %23 {offsets = [0, 8], sizes = [2, 1], strides = [1, 1]} : vector<2x9xf32> to vector<2x1xf32>
    %529 = vector.broadcast %528 : vector<2x1xf32> to vector<2x56xf32>
    %530 = arith.mulf %527, %529 : vector<2x56xf32>
    %531 = arith.addf %526, %530 : vector<2x56xf32>
    %c9 = arith.constant 9 : index
    %c0_55 = arith.constant 0 : index
    %c0_56 = arith.constant 0 : index
    %532 = vector.load %arg9[%c9, %c0_55, %c0_56] : memref<14x56x32xf32, #tpu.memory_space<vmem>>, vector<1x56x32xf32>
    %533 = vector.shape_cast %532 : vector<1x56x32xf32> to vector<56x32xf32>
    %cst_57 = arith.constant dense<0.000000e+00> : vector<2x32xf32>
    %534 = tpu.matmul %531, %533, %cst_57 {dimension_numbers = #tpu.dot_dimension_numbers<[1], [0], [0], [1], [0, 0, 1, 1], [], []>} : vector<2x56xf32>, vector<56x32xf32>, vector<2x32xf32> -> vector<2x32xf32>
    %535 = arith.addf %487, %534 : vector<2x32xf32>
    %536 = vector.extract_strided_slice %46 {offsets = [0, 0], sizes = [2, 56], strides = [1, 1]} : vector<2x64xf32> to vector<2x56xf32>
    %537 = vector.extract_strided_slice %23 {offsets = [0, 0], sizes = [2, 1], strides = [1, 1]} : vector<2x9xf32> to vector<2x1xf32>
    %538 = vector.broadcast %537 : vector<2x1xf32> to vector<2x56xf32>
    %539 = arith.mulf %536, %538 : vector<2x56xf32>
    %540 = vector.extract_strided_slice %46 {offsets = [0, 4], sizes = [2, 56], strides = [1, 1]} : vector<2x64xf32> to vector<2x56xf32>
    %541 = vector.extract_strided_slice %23 {offsets = [0, 1], sizes = [2, 1], strides = [1, 1]} : vector<2x9xf32> to vector<2x1xf32>
    %542 = vector.broadcast %541 : vector<2x1xf32> to vector<2x56xf32>
    %543 = arith.mulf %540, %542 : vector<2x56xf32>
    %544 = arith.addf %539, %543 : vector<2x56xf32>
    %545 = vector.extract_strided_slice %46 {offsets = [0, 8], sizes = [2, 56], strides = [1, 1]} : vector<2x64xf32> to vector<2x56xf32>
    %546 = vector.extract_strided_slice %23 {offsets = [0, 2], sizes = [2, 1], strides = [1, 1]} : vector<2x9xf32> to vector<2x1xf32>
    %547 = vector.broadcast %546 : vector<2x1xf32> to vector<2x56xf32>
    %548 = arith.mulf %545, %547 : vector<2x56xf32>
    %549 = arith.addf %544, %548 : vector<2x56xf32>
    %550 = vector.extract_strided_slice %48 {offsets = [0, 0], sizes = [2, 56], strides = [1, 1]} : vector<2x64xf32> to vector<2x56xf32>
    %551 = vector.extract_strided_slice %23 {offsets = [0, 3], sizes = [2, 1], strides = [1, 1]} : vector<2x9xf32> to vector<2x1xf32>
    %552 = vector.broadcast %551 : vector<2x1xf32> to vector<2x56xf32>
    %553 = arith.mulf %550, %552 : vector<2x56xf32>
    %554 = arith.addf %549, %553 : vector<2x56xf32>
    %555 = vector.extract_strided_slice %48 {offsets = [0, 4], sizes = [2, 56], strides = [1, 1]} : vector<2x64xf32> to vector<2x56xf32>
    %556 = vector.extract_strided_slice %23 {offsets = [0, 4], sizes = [2, 1], strides = [1, 1]} : vector<2x9xf32> to vector<2x1xf32>
    %557 = vector.broadcast %556 : vector<2x1xf32> to vector<2x56xf32>
    %558 = arith.mulf %555, %557 : vector<2x56xf32>
    %559 = arith.addf %554, %558 : vector<2x56xf32>
    %560 = vector.extract_strided_slice %48 {offsets = [0, 8], sizes = [2, 56], strides = [1, 1]} : vector<2x64xf32> to vector<2x56xf32>
    %561 = vector.extract_strided_slice %23 {offsets = [0, 5], sizes = [2, 1], strides = [1, 1]} : vector<2x9xf32> to vector<2x1xf32>
    %562 = vector.broadcast %561 : vector<2x1xf32> to vector<2x56xf32>
    %563 = arith.mulf %560, %562 : vector<2x56xf32>
    %564 = arith.addf %559, %563 : vector<2x56xf32>
    %565 = vector.extract_strided_slice %50 {offsets = [0, 0], sizes = [2, 56], strides = [1, 1]} : vector<2x64xf32> to vector<2x56xf32>
    %566 = vector.extract_strided_slice %23 {offsets = [0, 6], sizes = [2, 1], strides = [1, 1]} : vector<2x9xf32> to vector<2x1xf32>
    %567 = vector.broadcast %566 : vector<2x1xf32> to vector<2x56xf32>
    %568 = arith.mulf %565, %567 : vector<2x56xf32>
    %569 = arith.addf %564, %568 : vector<2x56xf32>
    %570 = vector.extract_strided_slice %50 {offsets = [0, 4], sizes = [2, 56], strides = [1, 1]} : vector<2x64xf32> to vector<2x56xf32>
    %571 = vector.extract_strided_slice %23 {offsets = [0, 7], sizes = [2, 1], strides = [1, 1]} : vector<2x9xf32> to vector<2x1xf32>
    %572 = vector.broadcast %571 : vector<2x1xf32> to vector<2x56xf32>
    %573 = arith.mulf %570, %572 : vector<2x56xf32>
    %574 = arith.addf %569, %573 : vector<2x56xf32>
    %575 = vector.extract_strided_slice %50 {offsets = [0, 8], sizes = [2, 56], strides = [1, 1]} : vector<2x64xf32> to vector<2x56xf32>
    %576 = vector.extract_strided_slice %23 {offsets = [0, 8], sizes = [2, 1], strides = [1, 1]} : vector<2x9xf32> to vector<2x1xf32>
    %577 = vector.broadcast %576 : vector<2x1xf32> to vector<2x56xf32>
    %578 = arith.mulf %575, %577 : vector<2x56xf32>
    %579 = arith.addf %574, %578 : vector<2x56xf32>
    %c10 = arith.constant 10 : index
    %c0_58 = arith.constant 0 : index
    %c0_59 = arith.constant 0 : index
    %580 = vector.load %arg9[%c10, %c0_58, %c0_59] : memref<14x56x32xf32, #tpu.memory_space<vmem>>, vector<1x56x32xf32>
    %581 = vector.shape_cast %580 : vector<1x56x32xf32> to vector<56x32xf32>
    %cst_60 = arith.constant dense<0.000000e+00> : vector<2x32xf32>
    %582 = tpu.matmul %579, %581, %cst_60 {dimension_numbers = #tpu.dot_dimension_numbers<[1], [0], [0], [1], [0, 0, 1, 1], [], []>} : vector<2x56xf32>, vector<56x32xf32>, vector<2x32xf32> -> vector<2x32xf32>
    %583 = arith.addf %535, %582 : vector<2x32xf32>
    %584 = vector.extract_strided_slice %48 {offsets = [0, 0], sizes = [2, 56], strides = [1, 1]} : vector<2x64xf32> to vector<2x56xf32>
    %585 = vector.extract_strided_slice %23 {offsets = [0, 0], sizes = [2, 1], strides = [1, 1]} : vector<2x9xf32> to vector<2x1xf32>
    %586 = vector.broadcast %585 : vector<2x1xf32> to vector<2x56xf32>
    %587 = arith.mulf %584, %586 : vector<2x56xf32>
    %588 = vector.extract_strided_slice %48 {offsets = [0, 4], sizes = [2, 56], strides = [1, 1]} : vector<2x64xf32> to vector<2x56xf32>
    %589 = vector.extract_strided_slice %23 {offsets = [0, 1], sizes = [2, 1], strides = [1, 1]} : vector<2x9xf32> to vector<2x1xf32>
    %590 = vector.broadcast %589 : vector<2x1xf32> to vector<2x56xf32>
    %591 = arith.mulf %588, %590 : vector<2x56xf32>
    %592 = arith.addf %587, %591 : vector<2x56xf32>
    %593 = vector.extract_strided_slice %48 {offsets = [0, 8], sizes = [2, 56], strides = [1, 1]} : vector<2x64xf32> to vector<2x56xf32>
    %594 = vector.extract_strided_slice %23 {offsets = [0, 2], sizes = [2, 1], strides = [1, 1]} : vector<2x9xf32> to vector<2x1xf32>
    %595 = vector.broadcast %594 : vector<2x1xf32> to vector<2x56xf32>
    %596 = arith.mulf %593, %595 : vector<2x56xf32>
    %597 = arith.addf %592, %596 : vector<2x56xf32>
    %598 = vector.extract_strided_slice %50 {offsets = [0, 0], sizes = [2, 56], strides = [1, 1]} : vector<2x64xf32> to vector<2x56xf32>
    %599 = vector.extract_strided_slice %23 {offsets = [0, 3], sizes = [2, 1], strides = [1, 1]} : vector<2x9xf32> to vector<2x1xf32>
    %600 = vector.broadcast %599 : vector<2x1xf32> to vector<2x56xf32>
    %601 = arith.mulf %598, %600 : vector<2x56xf32>
    %602 = arith.addf %597, %601 : vector<2x56xf32>
    %603 = vector.extract_strided_slice %50 {offsets = [0, 4], sizes = [2, 56], strides = [1, 1]} : vector<2x64xf32> to vector<2x56xf32>
    %604 = vector.extract_strided_slice %23 {offsets = [0, 4], sizes = [2, 1], strides = [1, 1]} : vector<2x9xf32> to vector<2x1xf32>
    %605 = vector.broadcast %604 : vector<2x1xf32> to vector<2x56xf32>
    %606 = arith.mulf %603, %605 : vector<2x56xf32>
    %607 = arith.addf %602, %606 : vector<2x56xf32>
    %608 = vector.extract_strided_slice %50 {offsets = [0, 8], sizes = [2, 56], strides = [1, 1]} : vector<2x64xf32> to vector<2x56xf32>
    %609 = vector.extract_strided_slice %23 {offsets = [0, 5], sizes = [2, 1], strides = [1, 1]} : vector<2x9xf32> to vector<2x1xf32>
    %610 = vector.broadcast %609 : vector<2x1xf32> to vector<2x56xf32>
    %611 = arith.mulf %608, %610 : vector<2x56xf32>
    %612 = arith.addf %607, %611 : vector<2x56xf32>
    %613 = vector.extract_strided_slice %52 {offsets = [0, 0], sizes = [2, 56], strides = [1, 1]} : vector<2x64xf32> to vector<2x56xf32>
    %614 = vector.extract_strided_slice %23 {offsets = [0, 6], sizes = [2, 1], strides = [1, 1]} : vector<2x9xf32> to vector<2x1xf32>
    %615 = vector.broadcast %614 : vector<2x1xf32> to vector<2x56xf32>
    %616 = arith.mulf %613, %615 : vector<2x56xf32>
    %617 = arith.addf %612, %616 : vector<2x56xf32>
    %618 = vector.extract_strided_slice %52 {offsets = [0, 4], sizes = [2, 56], strides = [1, 1]} : vector<2x64xf32> to vector<2x56xf32>
    %619 = vector.extract_strided_slice %23 {offsets = [0, 7], sizes = [2, 1], strides = [1, 1]} : vector<2x9xf32> to vector<2x1xf32>
    %620 = vector.broadcast %619 : vector<2x1xf32> to vector<2x56xf32>
    %621 = arith.mulf %618, %620 : vector<2x56xf32>
    %622 = arith.addf %617, %621 : vector<2x56xf32>
    %623 = vector.extract_strided_slice %52 {offsets = [0, 8], sizes = [2, 56], strides = [1, 1]} : vector<2x64xf32> to vector<2x56xf32>
    %624 = vector.extract_strided_slice %23 {offsets = [0, 8], sizes = [2, 1], strides = [1, 1]} : vector<2x9xf32> to vector<2x1xf32>
    %625 = vector.broadcast %624 : vector<2x1xf32> to vector<2x56xf32>
    %626 = arith.mulf %623, %625 : vector<2x56xf32>
    %627 = arith.addf %622, %626 : vector<2x56xf32>
    %c11 = arith.constant 11 : index
    %c0_61 = arith.constant 0 : index
    %c0_62 = arith.constant 0 : index
    %628 = vector.load %arg9[%c11, %c0_61, %c0_62] : memref<14x56x32xf32, #tpu.memory_space<vmem>>, vector<1x56x32xf32>
    %629 = vector.shape_cast %628 : vector<1x56x32xf32> to vector<56x32xf32>
    %cst_63 = arith.constant dense<0.000000e+00> : vector<2x32xf32>
    %630 = tpu.matmul %627, %629, %cst_63 {dimension_numbers = #tpu.dot_dimension_numbers<[1], [0], [0], [1], [0, 0, 1, 1], [], []>} : vector<2x56xf32>, vector<56x32xf32>, vector<2x32xf32> -> vector<2x32xf32>
    %631 = arith.addf %583, %630 : vector<2x32xf32>
    %632 = vector.extract_strided_slice %50 {offsets = [0, 0], sizes = [2, 56], strides = [1, 1]} : vector<2x64xf32> to vector<2x56xf32>
    %633 = vector.extract_strided_slice %23 {offsets = [0, 0], sizes = [2, 1], strides = [1, 1]} : vector<2x9xf32> to vector<2x1xf32>
    %634 = vector.broadcast %633 : vector<2x1xf32> to vector<2x56xf32>
    %635 = arith.mulf %632, %634 : vector<2x56xf32>
    %636 = vector.extract_strided_slice %50 {offsets = [0, 4], sizes = [2, 56], strides = [1, 1]} : vector<2x64xf32> to vector<2x56xf32>
    %637 = vector.extract_strided_slice %23 {offsets = [0, 1], sizes = [2, 1], strides = [1, 1]} : vector<2x9xf32> to vector<2x1xf32>
    %638 = vector.broadcast %637 : vector<2x1xf32> to vector<2x56xf32>
    %639 = arith.mulf %636, %638 : vector<2x56xf32>
    %640 = arith.addf %635, %639 : vector<2x56xf32>
    %641 = vector.extract_strided_slice %50 {offsets = [0, 8], sizes = [2, 56], strides = [1, 1]} : vector<2x64xf32> to vector<2x56xf32>
    %642 = vector.extract_strided_slice %23 {offsets = [0, 2], sizes = [2, 1], strides = [1, 1]} : vector<2x9xf32> to vector<2x1xf32>
    %643 = vector.broadcast %642 : vector<2x1xf32> to vector<2x56xf32>
    %644 = arith.mulf %641, %643 : vector<2x56xf32>
    %645 = arith.addf %640, %644 : vector<2x56xf32>
    %646 = vector.extract_strided_slice %52 {offsets = [0, 0], sizes = [2, 56], strides = [1, 1]} : vector<2x64xf32> to vector<2x56xf32>
    %647 = vector.extract_strided_slice %23 {offsets = [0, 3], sizes = [2, 1], strides = [1, 1]} : vector<2x9xf32> to vector<2x1xf32>
    %648 = vector.broadcast %647 : vector<2x1xf32> to vector<2x56xf32>
    %649 = arith.mulf %646, %648 : vector<2x56xf32>
    %650 = arith.addf %645, %649 : vector<2x56xf32>
    %651 = vector.extract_strided_slice %52 {offsets = [0, 4], sizes = [2, 56], strides = [1, 1]} : vector<2x64xf32> to vector<2x56xf32>
    %652 = vector.extract_strided_slice %23 {offsets = [0, 4], sizes = [2, 1], strides = [1, 1]} : vector<2x9xf32> to vector<2x1xf32>
    %653 = vector.broadcast %652 : vector<2x1xf32> to vector<2x56xf32>
    %654 = arith.mulf %651, %653 : vector<2x56xf32>
    %655 = arith.addf %650, %654 : vector<2x56xf32>
    %656 = vector.extract_strided_slice %52 {offsets = [0, 8], sizes = [2, 56], strides = [1, 1]} : vector<2x64xf32> to vector<2x56xf32>
    %657 = vector.extract_strided_slice %23 {offsets = [0, 5], sizes = [2, 1], strides = [1, 1]} : vector<2x9xf32> to vector<2x1xf32>
    %658 = vector.broadcast %657 : vector<2x1xf32> to vector<2x56xf32>
    %659 = arith.mulf %656, %658 : vector<2x56xf32>
    %660 = arith.addf %655, %659 : vector<2x56xf32>
    %661 = vector.extract_strided_slice %54 {offsets = [0, 0], sizes = [2, 56], strides = [1, 1]} : vector<2x64xf32> to vector<2x56xf32>
    %662 = vector.extract_strided_slice %23 {offsets = [0, 6], sizes = [2, 1], strides = [1, 1]} : vector<2x9xf32> to vector<2x1xf32>
    %663 = vector.broadcast %662 : vector<2x1xf32> to vector<2x56xf32>
    %664 = arith.mulf %661, %663 : vector<2x56xf32>
    %665 = arith.addf %660, %664 : vector<2x56xf32>
    %666 = vector.extract_strided_slice %54 {offsets = [0, 4], sizes = [2, 56], strides = [1, 1]} : vector<2x64xf32> to vector<2x56xf32>
    %667 = vector.extract_strided_slice %23 {offsets = [0, 7], sizes = [2, 1], strides = [1, 1]} : vector<2x9xf32> to vector<2x1xf32>
    %668 = vector.broadcast %667 : vector<2x1xf32> to vector<2x56xf32>
    %669 = arith.mulf %666, %668 : vector<2x56xf32>
    %670 = arith.addf %665, %669 : vector<2x56xf32>
    %671 = vector.extract_strided_slice %54 {offsets = [0, 8], sizes = [2, 56], strides = [1, 1]} : vector<2x64xf32> to vector<2x56xf32>
    %672 = vector.extract_strided_slice %23 {offsets = [0, 8], sizes = [2, 1], strides = [1, 1]} : vector<2x9xf32> to vector<2x1xf32>
    %673 = vector.broadcast %672 : vector<2x1xf32> to vector<2x56xf32>
    %674 = arith.mulf %671, %673 : vector<2x56xf32>
    %675 = arith.addf %670, %674 : vector<2x56xf32>
    %c12 = arith.constant 12 : index
    %c0_64 = arith.constant 0 : index
    %c0_65 = arith.constant 0 : index
    %676 = vector.load %arg9[%c12, %c0_64, %c0_65] : memref<14x56x32xf32, #tpu.memory_space<vmem>>, vector<1x56x32xf32>
    %677 = vector.shape_cast %676 : vector<1x56x32xf32> to vector<56x32xf32>
    %cst_66 = arith.constant dense<0.000000e+00> : vector<2x32xf32>
    %678 = tpu.matmul %675, %677, %cst_66 {dimension_numbers = #tpu.dot_dimension_numbers<[1], [0], [0], [1], [0, 0, 1, 1], [], []>} : vector<2x56xf32>, vector<56x32xf32>, vector<2x32xf32> -> vector<2x32xf32>
    %679 = arith.addf %631, %678 : vector<2x32xf32>
    %680 = vector.extract_strided_slice %52 {offsets = [0, 0], sizes = [2, 56], strides = [1, 1]} : vector<2x64xf32> to vector<2x56xf32>
    %681 = vector.extract_strided_slice %23 {offsets = [0, 0], sizes = [2, 1], strides = [1, 1]} : vector<2x9xf32> to vector<2x1xf32>
    %682 = vector.broadcast %681 : vector<2x1xf32> to vector<2x56xf32>
    %683 = arith.mulf %680, %682 : vector<2x56xf32>
    %684 = vector.extract_strided_slice %52 {offsets = [0, 4], sizes = [2, 56], strides = [1, 1]} : vector<2x64xf32> to vector<2x56xf32>
    %685 = vector.extract_strided_slice %23 {offsets = [0, 1], sizes = [2, 1], strides = [1, 1]} : vector<2x9xf32> to vector<2x1xf32>
    %686 = vector.broadcast %685 : vector<2x1xf32> to vector<2x56xf32>
    %687 = arith.mulf %684, %686 : vector<2x56xf32>
    %688 = arith.addf %683, %687 : vector<2x56xf32>
    %689 = vector.extract_strided_slice %52 {offsets = [0, 8], sizes = [2, 56], strides = [1, 1]} : vector<2x64xf32> to vector<2x56xf32>
    %690 = vector.extract_strided_slice %23 {offsets = [0, 2], sizes = [2, 1], strides = [1, 1]} : vector<2x9xf32> to vector<2x1xf32>
    %691 = vector.broadcast %690 : vector<2x1xf32> to vector<2x56xf32>
    %692 = arith.mulf %689, %691 : vector<2x56xf32>
    %693 = arith.addf %688, %692 : vector<2x56xf32>
    %694 = vector.extract_strided_slice %54 {offsets = [0, 0], sizes = [2, 56], strides = [1, 1]} : vector<2x64xf32> to vector<2x56xf32>
    %695 = vector.extract_strided_slice %23 {offsets = [0, 3], sizes = [2, 1], strides = [1, 1]} : vector<2x9xf32> to vector<2x1xf32>
    %696 = vector.broadcast %695 : vector<2x1xf32> to vector<2x56xf32>
    %697 = arith.mulf %694, %696 : vector<2x56xf32>
    %698 = arith.addf %693, %697 : vector<2x56xf32>
    %699 = vector.extract_strided_slice %54 {offsets = [0, 4], sizes = [2, 56], strides = [1, 1]} : vector<2x64xf32> to vector<2x56xf32>
    %700 = vector.extract_strided_slice %23 {offsets = [0, 4], sizes = [2, 1], strides = [1, 1]} : vector<2x9xf32> to vector<2x1xf32>
    %701 = vector.broadcast %700 : vector<2x1xf32> to vector<2x56xf32>
    %702 = arith.mulf %699, %701 : vector<2x56xf32>
    %703 = arith.addf %698, %702 : vector<2x56xf32>
    %704 = vector.extract_strided_slice %54 {offsets = [0, 8], sizes = [2, 56], strides = [1, 1]} : vector<2x64xf32> to vector<2x56xf32>
    %705 = vector.extract_strided_slice %23 {offsets = [0, 5], sizes = [2, 1], strides = [1, 1]} : vector<2x9xf32> to vector<2x1xf32>
    %706 = vector.broadcast %705 : vector<2x1xf32> to vector<2x56xf32>
    %707 = arith.mulf %704, %706 : vector<2x56xf32>
    %708 = arith.addf %703, %707 : vector<2x56xf32>
    %709 = vector.extract_strided_slice %56 {offsets = [0, 0], sizes = [2, 56], strides = [1, 1]} : vector<2x64xf32> to vector<2x56xf32>
    %710 = vector.extract_strided_slice %23 {offsets = [0, 6], sizes = [2, 1], strides = [1, 1]} : vector<2x9xf32> to vector<2x1xf32>
    %711 = vector.broadcast %710 : vector<2x1xf32> to vector<2x56xf32>
    %712 = arith.mulf %709, %711 : vector<2x56xf32>
    %713 = arith.addf %708, %712 : vector<2x56xf32>
    %714 = vector.extract_strided_slice %56 {offsets = [0, 4], sizes = [2, 56], strides = [1, 1]} : vector<2x64xf32> to vector<2x56xf32>
    %715 = vector.extract_strided_slice %23 {offsets = [0, 7], sizes = [2, 1], strides = [1, 1]} : vector<2x9xf32> to vector<2x1xf32>
    %716 = vector.broadcast %715 : vector<2x1xf32> to vector<2x56xf32>
    %717 = arith.mulf %714, %716 : vector<2x56xf32>
    %718 = arith.addf %713, %717 : vector<2x56xf32>
    %719 = vector.extract_strided_slice %56 {offsets = [0, 8], sizes = [2, 56], strides = [1, 1]} : vector<2x64xf32> to vector<2x56xf32>
    %720 = vector.extract_strided_slice %23 {offsets = [0, 8], sizes = [2, 1], strides = [1, 1]} : vector<2x9xf32> to vector<2x1xf32>
    %721 = vector.broadcast %720 : vector<2x1xf32> to vector<2x56xf32>
    %722 = arith.mulf %719, %721 : vector<2x56xf32>
    %723 = arith.addf %718, %722 : vector<2x56xf32>
    %c13 = arith.constant 13 : index
    %c0_67 = arith.constant 0 : index
    %c0_68 = arith.constant 0 : index
    %724 = vector.load %arg9[%c13, %c0_67, %c0_68] : memref<14x56x32xf32, #tpu.memory_space<vmem>>, vector<1x56x32xf32>
    %725 = vector.shape_cast %724 : vector<1x56x32xf32> to vector<56x32xf32>
    %cst_69 = arith.constant dense<0.000000e+00> : vector<2x32xf32>
    %726 = tpu.matmul %723, %725, %cst_69 {dimension_numbers = #tpu.dot_dimension_numbers<[1], [0], [0], [1], [0, 0, 1, 1], [], []>} : vector<2x56xf32>, vector<56x32xf32>, vector<2x32xf32> -> vector<2x32xf32>
    %727 = arith.addf %679, %726 : vector<2x32xf32>
    %c0_70 = arith.constant 0 : index
    %c0_71 = arith.constant 0 : index
    %728 = vector.load %arg10[%c0_70, %c0_71] : memref<1x32xf32, #tpu.memory_space<vmem>>, vector<1x32xf32>
    %729 = vector.broadcast %728 : vector<1x32xf32> to vector<2x32xf32>
    %730 = arith.addf %727, %729 : vector<2x32xf32>
    %c0_72 = arith.constant 0 : index
    %c0_73 = arith.constant 0 : index
    %731 = vector.load %arg11[%c0_72, %c0_73] : memref<2x32xf32, #tpu.memory_space<vmem>>, vector<2x32xf32>
    tpu.vector_store %arg11[%c0_72, %c0_73], %730 {strides = array<i32>} : memref<2x32xf32, #tpu.memory_space<vmem>>, vector<2x32xf32>,
    return
  }
}

</mosaic_0001>

<bundles_post_ra>
// kernel: attention_forward.1
= control target key start
LH: loop header
LB: loop body
LE: loop exit
PB: predicated region body
PF: predicated region fallthrough
CT: control target
= control target key end

     0   :  { %v5513_v1 = vmov 0.0   ;;  %vm3707_vm0 = vmmov 0   ;;  %s5501_s0 = inlined_call_operand.vmem [shape: f32[1,2,32], index: 0, kind: input, shape index: {}]   ;;  %s5502_s1 = inlined_call_operand.vmem [shape: f32[1,2,32], index: 1, kind: input, shape index: {}]   ;;  %s5503_s2 = inlined_call_operand.vmem [shape: f32[2,16,64], index: 2, kind: input, shape index: {}]   ;;  %s5504_s3 = inlined_call_operand.vmem [shape: f32[32,32], index: 3, kind: input, shape index: {}]   ;;  %s5505_s4 = inlined_call_operand.vmem [shape: f32[1,32], index: 4, kind: input, shape index: {}]   ;;  %s5506_s5 = inlined_call_operand.vmem [shape: f32[32,32], index: 5, kind: input, shape index: {}]   ;;  %s5507_s6 = inlined_call_operand.vmem [shape: f32[1,32], index: 6, kind: input, shape index: {}]   ;;  %s5508_s7 = inlined_call_operand.vmem [shape: f32[64,9], index: 7, kind: input, shape index: {}]   ;;  %s5509_s8 = inlined_call_operand.vmem [shape: f32[1,9], index: 8, kind: input, shape index: {}]   ;;  %s5510_s9 = inlined_call_operand.vmem [shape: f32[14,56,32], index: 9, kind: input, shape index: {}]   ;;  %s5511_s10 = inlined_call_operand.vmem [shape: f32[1,32], index: 10, kind: input, shape index: {}]   ;;  %s5512_s11 = inlined_call_operand.hbm [shape: f32[2,32], index: 11, kind: output, shape index: {}]  }
   0x1   :  { %v43_v0 = vld [vmem:[%s5504_s3 + $0x18] sm:$0xff]  ;;  %3370 = vmatprep.subr.mxu0 %v5513_v1  ;;  %v42_v2 = vld [vmem:[%s5504_s3 + $0x10] sm:$0xff]  ;;  %3378 = vmatprep.mubr.msk.f32.mxu0 %vm3707_vm0, %v5513_v1  ;;  %v41_v3 = vld [vmem:[%s5504_s3 + $0x8] sm:$0xff] }
   0x2   :  { %3371 = vmatpush3.msra.mxu0 %v43_v0  ;;  %3411 = vmatprep.subr.mxu1 %v5513_v1 }
   0x3   :  { %3372 = vmatprep.subr.mxu0 %v5513_v1  ;;  %3425 = vmatprep.mubr.msk.f32.mxu1 %vm3707_vm0, %v5513_v1 }
   0x4   :  { %16 = vsyncpa [#allocation4], 0  ;;  %3373 = vmatpush3.msra.mxu0 %v42_v2  ;;  %v40_v4 = vld [vmem:[%s5504_s3] sm:$0xff]  ;;  %vm51_vm1 = vcmask 261120   ;;  %v129_v6 = vld [vmem:[%s5506_s5 + $0x18] sm:$0xff]  ;;  %vm211_vm2 = vcmask 254976  }
   0x5   :  { %3374 = vmatprep.subr.mxu0 %v5513_v1  ;;  %v39_v5 = vld [vmem:[%s5501_s0] sm:$0x3]  ;;  %v128_v7 = vld [vmem:[%s5506_s5 + $0x10] sm:$0xff]  ;;  %v127_v8 = vld [vmem:[%s5506_s5 + $0x8] sm:$0xff]  ;;  %s3708_s3 = smov 32   ;;  %vm218_vm3 = vcmask 517376  }
   0x6   :  { %3375 = vmatpush3.msra.mxu0 %v41_v3  ;;  %v126_v9 = vld [vmem:[%s5506_s5] sm:$0xff]  ;;  %v228_v11 = vld [vmem:[%s5508_s7 + $0x38] sm:$0xff]  ;;  %v227_v12 = vld [vmem:[%s5508_s7 + $0x30] sm:$0xff]  ;;  %vm236_vm4 = vcmask 523264   ;;  %v3709_v31 = vmov 2   ;;  %v3710_v32 = vmov 1  }
   0x7   :  { %3376 = vmatprep.subr.mxu0 %v5513_v1  ;;  %v125_v10 = vld [vmem:[%s5502_s1] sm:$0x3]  ;;  %v226_v13 = vld [vmem:[%s5508_s7 + $0x28] sm:$0xff]  ;;  %v224_v23 = vld [vmem:[%s5508_s7 + $0x18] sm:$0xff]  ;;  %3665 = vset.pattern.permute.xlu1 %v3709_v31  ;;  %v3711_v37 = vmov 4   ;;  %v3712_v38 = vmov 7  }
   0x8   :  { %3377 = vmatpush3.msra.mxu0 %v40_v4  ;;  %v225_v14 = vld [vmem:[%s5508_s7 + $0x20] sm:$0xff]  ;;  %v223_v24 = vld [vmem:[%s5508_s7 + $0x10] sm:$0xff]  ;;  %v222_v25 = vld [vmem:[%s5508_s7 + $0x8] sm:$0xff]  ;;  %3664 = vset.pattern.permute.xlu0 %v3710_v32  ;;  %v3713_v39 = vmov 5   ;;  %v3714_v40 = vmov 3   ;;  %v3715_v41 = vmov 8  }
   0x9   :  { %3379 = vmatmul.mubr.msk.f32.vlgmr.msra.gmra.mxu0 %vm51_vm1, %v39_v5  ;;  %3381 = vmatprep.subr.mxu0 %v5513_v1  ;;  %v3127_v15 = vld [vmem:[%s5505_s4] ss:$0 sm:$0xff]  ;;  %v3716_v42 = vmov 0   ;;  %v3717_v43 = vmov 6   ;;  %v3878_v44 = vld [vmem:[%s5503_s2 + $0x10] sm:$0xff]  ;;  %v3896_v50 = vld [vmem:[%s5503_s2 + $0x8] sm:$0xff] }
   0xa   :  { %3382 = vmatpush3.msra.mxu0 %v129_v6  ;;  %3389 = vmatprep.mubr.msk.f32.mxu0 %vm3707_vm0, %v5513_v1  ;;  %v3129_v19 = vld [vmem:[%s5507_s6] ss:$0 sm:$0xff]  ;;  %s3718_s5 = smov 124   ;;  %v3907_v53 = vld [vmem:[%s5503_s2 + $0x18] sm:$0xff]  ;;  %s3719_s19 = smov 120   ;;  %vm612_vm5 = vcmask 1041409  }
   0xb   :  { %3383 = vmatprep.subr.mxu0 %v5513_v1  ;;  %v221_v27 = vld [vmem:[%s5508_s7] sm:$0xff]  ;;  %vm614_vm6 = vcmask 457728   ;;  %s3720_s15 = smov [#allocation3]  }
   0xc   :  { %3384 = vmatpush3.msra.mxu0 %v128_v7  ;;  %v3131_v33 = vld [vmem:[%s5509_s8] ss:$0 sm:$0xff]  ;;  %s3119_s16 = sshll.u32 %s3720_s15, 4  ;;  %s3120_s16 = int_to_ptr.vmem [resolvable:$true] %s3119_s16 }
   0xd   :  { %3385 = vmatprep.subr.mxu0 %v5513_v1  ;;  %v3883_v45 = vld [vmem:[%s5503_s2] sm:$0xff]  ;;  %s3684_s17 = scalar_lea.vmem %s3120_s16, 32  ;;  %p3689_p1 = scmp.lt.s32.totalorder %s3120_s16, %s3120_s16 }
   0xe   :  { %3386 = vmatpush3.msra.mxu0 %v127_v8  ;;  %p3685_p0 = scmp.ne.s32.totalorder %s3120_s16, %s3684_s17  ;;  %p3690_p2 = scmp.lt.s32.totalorder %s3684_s17, %s3684_s17 }
   0xf   :  { %3387 = vmatprep.subr.mxu0 %v5513_v1 }
  0x10   :  { %3388 = vmatpush3.msra.mxu0 %v126_v9  ;;  %p3691_p3 = por %p3690_p2, %p3689_p1 }
  0x11   :  { %3390 = vmatmul.mubr.msk.f32.vlgmr.msra.gmra.mxu0 %vm51_vm1, %v125_v10  ;;  %3392 = vmatprep.subr.mxu0 %v5513_v1 }
  0x12   :  { %3408 = vmatprep.mubr.msk.f32.mxu0 %vm3707_vm0, %v5513_v1  ;;  %3393 = vmatpush3.msra.mxu0 %v228_v11  ;;  %p3692_p4 = pnand %p3691_p3, %p3685_p0 }
  0x13   :  { %3394 = vmatprep.subr.mxu0 %v5513_v1 }
  0x14   :  { %3395 = vmatpush3.msra.mxu0 %v227_v12 }
  0x15   :  { %3396 = vmatprep.subr.mxu0 %v5513_v1 }
  0x16   :  { %3397 = vmatpush3.msra.mxu0 %v226_v13 }
  0x17   :  { %3398 = vmatprep.subr.mxu0 %v5513_v1 }
  0x18   :  { %3399 = vmatpush3.msra.mxu0 %v225_v14 }
  0x19   :  { %3400 = vmatprep.subr.mxu0 %v5513_v1 }
  0x1a   :  { %3401 = vmatpush3.msra.mxu0 %v224_v23 }
  0x1b   :  { %3402 = vmatprep.subr.mxu0 %v5513_v1 }
  0x1c   :  { %3403 = vmatpush3.msra.mxu0 %v223_v24 }
  0x1d   :  { %3404 = vmatprep.subr.mxu0 %v5513_v1 }
  0x1e   :  { %3405 = vmatpush3.msra.mxu0 %v222_v25 }
  0x1f   :  { %3406 = vmatprep.subr.mxu0 %v5513_v1 }
  0x20   :  { %3407 = vmatpush3.msra.mxu0 %v221_v27 }
  0x21   :  { %3445 = vmatprep.subr.mxu0 %v5513_v1 }
  0xc9   :  { %v121_v16 = vpop.f32.mrf.mxu0 }
  0xca   :  { %v122_v17 = vadd.f32 %v3127_v15, %v121_v16 }
  0xcb   :  { %v3380_v18 = vpop.f32.mrf.mxu0 }
  0xcc   :  { %3674 = vtanh.f32 %v122_v17 }
  0xd1   :  { %v206_v20 = vpop.f32.mrf.mxu0 }
  0xd2   :  { %v207_v21 = vadd.f32 %v3129_v19, %v206_v20 }
  0xd3   :  { %v3391_v22 = vpop.f32.mrf.mxu0 }
  0xd4   :  { %3676 = vtanh.f32 %v207_v21 }
  0xd9   :  { %v3675_v26 = vpop.eup %3674 }
  0xda   :  { %212 = vst.msk [vmem:[#allocation2] sm:$0x3] %vm211_vm2, %v3675_v26 }
  0xe1   :  { %v3677_v28 = vpop.eup %3676 }
  0xe2   :  { %215 = vrot.lane.b32.xlu0 %v3677_v28, %s3708_s3 }
 0x154   :  { %v216_v29 = vpop.permute.xlu0 %215 }
 0x155   :  { %219 = vst.msk [vmem:[#allocation2] sm:$0x3] %vm218_vm3, %v216_v29 }
 0x15c   :  { %v220_v30 = vld [vmem:[#allocation2] sm:$0x3] }
 0x15d   :  { %3409 = vmatmul.mubr.msk.f32.vlgmr.msra.gmra.mxu0 %vm236_vm4, %v220_v30 }
 0x15e   :  { %3459 = vmatprep.mubr.msk.f32.mxu0 %vm3707_vm0, %v5513_v1 }
 0x21d   :  { %v306_v34 = vpop.f32.mrf.mxu0 }
 0x21e   :  { %v307_v35 = vadd.f32 %v3131_v33, %v306_v34 }
 0x21f   :  { %v3410_v36 = vpop.f32.mrf.mxu0 }
 0x220   :  { %342 = vperm.xlu1 %3665, %v307_v35   ;;  %324 = vperm.xlu0 %3664, %v307_v35  }
 0x224   :  { %3666 = vset.pattern.permute.xlu1 %v3711_v37  ;;  %3668 = vset.pattern.permute.xlu0 %v3712_v38 }
 0x225   :  { %376 = vperm.xlu1 %3666, %v307_v35   ;;  %433 = vperm.xlu0 %3668, %v307_v35  }
 0x229   :  { %3667 = vset.pattern.permute.xlu1 %v3713_v39  ;;  %3671 = vset.pattern.permute.xlu0 %v3714_v40 }
 0x22a   :  { %396 = vperm.xlu1 %3667, %v307_v35   ;;  %360 = vperm.xlu0 %3671, %v307_v35  }
 0x22e   :  { %3669 = vset.pattern.permute.xlu1 %v3715_v41  ;;  %3673 = vset.pattern.permute.xlu0 %v3715_v41 }
 0x22f   :  { %454 = vperm.xlu1 %3669, %v307_v35  }
 0x233   :  { %3670 = vset.pattern.permute.xlu1 %v3716_v42 }
 0x234   :  { %316 = vperm.xlu1 %3670, %v307_v35  }
 0x238   :  { %3672 = vset.pattern.permute.xlu1 %v3717_v43 }
 0x239   :  { %416 = vperm.xlu1 %3672, %v307_v35  }
 0x29b   :  { %v3885_v46 = vpop.permute.xlu0 %324  ;;  %v3891_v49 = vpop.permute.xlu1 %342 }
 0x29c   :  { %v488_v47 = vmul.f32 %v3885_v46, %v3878_v44  ;;  %v329_v48 = vmul.f32 %v3885_v46, %v3883_v45  ;;  %v502_v51 = vmul.f32 %v3891_v49, %v3878_v44  ;;  %v1992_v52 = vmul.f32 %v3891_v49, %v3896_v50 }
 0x29d   :  { %v347_v54 = vmul.f32 %v3891_v49, %v3883_v45  ;;  %v2180_v55 = vmul.f32 %v3891_v49, %v3907_v53  ;;  %v3916_v56 = vrot.slane %v3885_v46, 7  ;;  %v1980_v58 = vmul.f32 %v3885_v46, %v3896_v50 }
 0x29e   :  { %493 = vrot.lane.b32.xlu0 %v488_v47, %s3718_s5  ;;  %333 = vrot.lane.b32.xlu1 %v329_v48, %s3718_s5  ;;  %v3927_v60 = vrot.slane %v3891_v49, 7  ;;  %v2168_v61 = vmul.f32 %v3885_v46, %v3907_v53  ;;  %v3938_v0 = vrot.slane %v3885_v46, 1  ;;  %v3949_v6 = vrot.slane %v3891_v49, 1 }
 0x29f   :  { %v487_v59 = vmul.f32 %v3916_v56, %v3883_v45  ;;  %v3956_v9 = vrot.slane %v3885_v46, 6  ;;  %v770_v10 = vmul.f32 %v3916_v56, %v3878_v44  ;;  %v3965_v12 = vrot.slane %v3891_v49, 6 }
 0x2a0   :  { %v3920_v57 = vpop.permute.xlu1 %376  ;;  %v501_v62 = vmul.f32 %v3927_v60, %v3883_v45  ;;  %v330_v4 = vmul.f32 %v3938_v0, %v3878_v44  ;;  %v348_v8 = vmul.f32 %v3949_v6, %v3878_v44  ;;  %v784_v13 = vmul.f32 %v3927_v60, %v3878_v44  ;;  %v4044_v41 = vpop.permute.xlu0 %433 }
 0x2a1   :  { %v382_v63 = vmul.f32 %v3920_v57, %v3878_v44  ;;  %v769_v11 = vmul.f32 %v3956_v9, %v3883_v45  ;;  %v783_v14 = vmul.f32 %v3965_v12, %v3883_v45  ;;  %v3974_v15 = vrot.slane %v3885_v46, 5 }
 0x2a2   :  { %507 = vrot.lane.b32.xlu0 %v502_v51, %s3719_s19  ;;  %1996 = vrot.lane.b32.xlu1 %v1992_v52, %s3719_s19  ;;  %v976_v16 = vmul.f32 %v3956_v9, %v3878_v44  ;;  %v3983_v18 = vrot.slane %v3891_v49, 5  ;;  %v990_v20 = vmul.f32 %v3965_v12, %v3878_v44  ;;  %v3992_v21 = vrot.slane %v3885_v46, 4 }
 0x2a3   :  { %v386_v3 = vrot.slane %v382_v63, 1  ;;  %v975_v17 = vmul.f32 %v3974_v15, %v3883_v45  ;;  %v1182_v23 = vmul.f32 %v3974_v15, %v3878_v44  ;;  %v4001_v24 = vrot.slane %v3891_v49, 4 }
 0x2a4   :  { %v989_v19 = vmul.f32 %v3983_v18, %v3883_v45  ;;  %v1181_v22 = vmul.f32 %v3992_v21, %v3883_v45  ;;  %v1196_v26 = vmul.f32 %v3983_v18, %v3878_v44  ;;  %v4010_v27 = vrot.slane %v3885_v46, 3 }
 0x2a5   :  { %v3940_v2 = vpop.permute.xlu1 %396  ;;  %v1195_v25 = vmul.f32 %v4001_v24, %v3883_v45  ;;  %v1388_v29 = vmul.f32 %v3992_v21, %v3878_v44  ;;  %v4019_v30 = vrot.slane %v3891_v49, 3  ;;  %v1402_v32 = vmul.f32 %v4001_v24, %v3878_v44 }
 0x2a6   :  { %351 = vrot.lane.b32.xlu0 %v347_v54, %s3719_s19  ;;  %2185 = vrot.lane.b32.xlu1 %v2180_v55, %s3719_s19  ;;  %v402_v5 = vmul.f32 %v3940_v2, %v3878_v44  ;;  %v1387_v28 = vmul.f32 %v4010_v27, %v3883_v45  ;;  %v1591_v33 = vrot.slane %v3885_v46, 2  ;;  %v1594_v35 = vmul.f32 %v4010_v27, %v3878_v44 }
 0x2a7   :  { %v1401_v31 = vmul.f32 %v4019_v30, %v3883_v45  ;;  %v1605_v36 = vrot.slane %v3891_v49, 2  ;;  %v1608_v38 = vmul.f32 %v4019_v30, %v3878_v44  ;;  %v1792_v39 = vmul.f32 %v3938_v0, %v3883_v45 }
 0x2a8   :  { %v406_v7 = vrot.slane %v402_v5, 1  ;;  %v1593_v34 = vmul.f32 %v1591_v33, %v3883_v45  ;;  %v1793_v40 = vmul.f32 %v1591_v33, %v3878_v44  ;;  %v1804_v42 = vmul.f32 %v3949_v6, %v3883_v45 }
 0x2a9   :  { %v1607_v37 = vmul.f32 %v1605_v36, %v3883_v45  ;;  %v1805_v43 = vmul.f32 %v1605_v36, %v3878_v44  ;;  %v1826_v46 = vmul.f32 %v3920_v57, %v3896_v50  ;;  %v1865_v47 = vmul.f32 %v4044_v41, %v3907_v53 }
 0x2aa   :  { %1984 = vrot.lane.b32.xlu0 %v1980_v58, %s3718_s5  ;;  %491 = vrot.lane.b32.xlu1 %v487_v59, %s3718_s5  ;;  %v1840_v51 = vmul.f32 %v3940_v2, %v3896_v50  ;;  %v2167_v54 = vmul.f32 %v3916_v56, %v3896_v50  ;;  %v2015_v55 = vmul.f32 %v3920_v57, %v3907_v53  ;;  %v4067_v59 = vpop.permute.xlu1 %454 }
 0x2ab   :  { %v1830_v48 = vrot.slane %v1826_v46, 1  ;;  %v1869_v49 = vrot.slane %v1865_v47, 2  ;;  %v1675_v58 = vmul.f32 %v4044_v41, %v3896_v50  ;;  %v1690_v63 = vmul.f32 %v4067_v59, %v3896_v50 }
 0x2ac   :  { %v1844_v52 = vrot.slane %v1840_v51, 1  ;;  %v2366_v5 = vmul.f32 %v3965_v12, %v3896_v50  ;;  %v2543_v36 = vmul.f32 %v3956_v9, %v3907_v53 }
 0x2ae   :  { %2173 = vrot.lane.b32.xlu0 %v2168_v61, %s3718_s5  ;;  %505 = vrot.lane.b32.xlu1 %v501_v62, %s3719_s19  ;;  %v2019_v61 = vrot.slane %v2015_v55, 1  ;;  %v1679_v62 = vrot.slane %v1675_v58, 2  ;;  %v2918_v58 = vmul.f32 %v4010_v27, %v3896_v50  ;;  %v3138_v27 = vld [vmem:[%s5510_s9 + $0x60] sm:$0xff] }
 0x2b2   :  { %389 = vrot.lane.b32.xlu1 %v386_v3, %s3718_s5  ;;  %335 = vrot.lane.b32.xlu0 %v330_v4, %s3718_s5  ;;  %v2355_v3 = vmul.f32 %v3916_v56, %v3907_v53  ;;  %v1694_v4 = vrot.slane %v1690_v63, 2  ;;  %v2542_v56 = vmul.f32 %v3974_v15, %v3896_v50 }
 0x2b6   :  { %409 = vrot.lane.b32.xlu1 %v406_v7, %s3719_s19  ;;  %353 = vrot.lane.b32.xlu0 %v348_v8, %s3719_s19  ;;  %v1981_v7 = vmul.f32 %v3938_v0, %v3907_v53  ;;  %v1879_v8 = vmul.f32 %v4067_v59, %v3907_v53  ;;  %v1993_v0 = vmul.f32 %v3949_v6, %v3907_v53 }
 0x2b7   :  { %v2743_v6 = vmul.f32 %v3983_v18, %v3907_v53 }
 0x2ba   :  { %775 = vrot.lane.b32.xlu1 %v770_v10, %s3718_s5  ;;  %773 = vrot.lane.b32.xlu0 %v769_v11, %s3718_s5  ;;  %v1883_v10 = vrot.slane %v1879_v8, 2  ;;  %v2555_v11 = vmul.f32 %v3965_v12, %v3907_v53 }
 0x2be   :  { %789 = vrot.lane.b32.xlu1 %v784_v13, %s3719_s19  ;;  %787 = vrot.lane.b32.xlu0 %v783_v14, %s3719_s19  ;;  %v2731_v13 = vmul.f32 %v3974_v15, %v3907_v53  ;;  %v2179_v14 = vmul.f32 %v3927_v60, %v3896_v50  ;;  %v4111_v15 = vpop.permute.xlu0 %360 }
 0x2c2   :  { %981 = vrot.lane.b32.xlu1 %v976_v16, %s3718_s5  ;;  %979 = vrot.lane.b32.xlu0 %v975_v17, %s3718_s5  ;;  %v2029_v16 = vmul.f32 %v3940_v2, %v3907_v53  ;;  %v4103_v17 = vpop.permute.xlu1 %316 }
 0x2c4   :  { %v2033_v12 = vrot.slane %v2029_v16, 1 }
 0x2c6   :  { %993 = vrot.lane.b32.xlu1 %v989_v19, %s3719_s19  ;;  %995 = vrot.lane.b32.xlu0 %v990_v20, %s3719_s19  ;;  %v4113_v19 = vpop.permute.xlu1 %416  ;;  %v2919_v20 = vmul.f32 %v3992_v21, %v3907_v53 }
 0x2ca   :  { %1185 = vrot.lane.b32.xlu1 %v1181_v22, %s3718_s5  ;;  %1187 = vrot.lane.b32.xlu0 %v1182_v23, %s3718_s5  ;;  %v2354_v22 = vmul.f32 %v3956_v9, %v3896_v50  ;;  %v4120_v23 = vrot.slane %v3920_v57, 7 }
 0x2ce   :  { %1199 = vrot.lane.b32.xlu1 %v1195_v25, %s3719_s19  ;;  %1201 = vrot.lane.b32.xlu0 %v1196_v26, %s3719_s19 }
 0x2d2   :  { %1391 = vrot.lane.b32.xlu1 %v1387_v28, %s3718_s5  ;;  %1393 = vrot.lane.b32.xlu0 %v1388_v29, %s3718_s5  ;;  %v2931_v28 = vmul.f32 %v4001_v24, %v3907_v53  ;;  %v2367_v29 = vmul.f32 %v3927_v60, %v3907_v53 }
 0x2d6   :  { %1405 = vrot.lane.b32.xlu1 %v1401_v31, %s3719_s19  ;;  %1407 = vrot.lane.b32.xlu0 %v1402_v32, %s3719_s19  ;;  %v528_v31 = vmul.f32 %v4120_v23, %v3878_v44  ;;  %v4135_v32 = vrot.slane %v3940_v2, 7 }
 0x2d8   :  { %v544_v60 = vmul.f32 %v4135_v32, %v3878_v44  ;;  %v401_v55 = vmul.f32 %v4135_v32, %v3883_v45 }
 0x2da   :  { %1597 = vrot.lane.b32.xlu1 %v1593_v34, %s3718_s5  ;;  %1599 = vrot.lane.b32.xlu0 %v1594_v35, %s3718_s5  ;;  %v532_v35 = vrot.slane %v528_v31, 1  ;;  %v405_v63 = vrot.slane %v401_v55, 1 }
 0x2de   :  { %1611 = vrot.lane.b32.xlu1 %v1607_v37, %s3719_s19  ;;  %1613 = vrot.lane.b32.xlu0 %v1608_v38, %s3719_s19  ;;  %v4148_v37 = vrot.slane %v4067_v59, 5 }
 0x2e0   :  { %v587_v9 = vmul.f32 %v4148_v37, %v3883_v45 }
 0x2e2   :  { %1796 = vrot.lane.b32.xlu1 %v1792_v39, %s3718_s5  ;;  %1798 = vrot.lane.b32.xlu0 %v1793_v40, %s3718_s5  ;;  %v548_v40 = vrot.slane %v544_v60, 1  ;;  %v591_v47 = vrot.slane %v587_v9, 2  ;;  %v4252_v9 = vrot.slane %v3920_v57, 5 }
 0x2e6   :  { %1808 = vrot.lane.b32.xlu1 %v1804_v42, %s3719_s19  ;;  %1810 = vrot.lane.b32.xlu0 %v1805_v43, %s3719_s19  ;;  %v2554_v42 = vmul.f32 %v3983_v18, %v3896_v50 }
 0x2ea   :  { %1832 = vrot.lane.b32.xlu1 %v1830_v48, %s3718_s5  ;;  %1872 = vrot.lane.b32.xlu0 %v1869_v49, %s3718_s5  ;;  %v2730_v48 = vmul.f32 %v3992_v21, %v3896_v50  ;;  %v381_v49 = vmul.f32 %v4120_v23, %v3883_v45  ;;  %v4181_v21 = vrot.slane %v4044_v41, 6 }
 0x2ec   :  { %v572_v55 = vmul.f32 %v4181_v21, %v3878_v44 }
 0x2ee   :  { %1846 = vrot.lane.b32.xlu1 %v1844_v52, %s3719_s19  ;;  %2171 = vrot.lane.b32.xlu0 %v2167_v54, %s3718_s5  ;;  %v385_v52 = vrot.slane %v381_v49, 1  ;;  %v2742_v54 = vmul.f32 %v4001_v24, %v3896_v50  ;;  %v439_v24 = vmul.f32 %v4181_v21, %v3883_v45 }
 0x2f2   :  { %2022 = vrot.lane.b32.xlu0 %v2019_v61, %s3718_s5  ;;  %1681 = vrot.lane.b32.xlu1 %v1679_v62, %s3718_s5 }
 0x2f6   :  { %2360 = vrot.lane.b32.xlu0 %v2355_v3, %s3718_s5  ;;  %1696 = vrot.lane.b32.xlu1 %v1694_v4, %s3719_s19  ;;  %v4194_v3 = vrot.slane %v3920_v57, 6  ;;  %v4197_v4 = vrot.slane %v4067_v59, 6 }
 0x2fa   :  { %2370 = vrot.lane.b32.xlu0 %v2366_v5, %s3719_s19  ;;  %1986 = vrot.lane.b32.xlu1 %v1981_v7, %s3718_s5  ;;  %v3139_v5 = vld [vmem:[%s5510_s9 + $0x68] sm:$0xff]  ;;  %v2930_v7 = vmul.f32 %v4019_v30, %v3896_v50  ;;  %v4224_v30 = vrot.slane %v4044_v41, 5 }
 0x2fb   :  { %3412 = vmatpush3.msra.mxu1 %v3139_v5  ;;  %v3133_v5 = vld [vmem:[%s5510_s9 + $0x38] sm:$0xff] }
 0x2fc   :  { %3413 = vmatprep.subr.mxu1 %v5513_v1  ;;  %v571_v31 = vmul.f32 %v4224_v30, %v3883_v45 }
 0x2fd   :  { %3414 = vmatpush3.msra.mxu1 %v3138_v27  ;;  %v588_v27 = vmul.f32 %v4197_v4, %v3878_v44 }
 0x2fe   :  { %2546 = vrot.lane.b32.xlu0 %v2542_v56, %s3718_s5  ;;  %1886 = vrot.lane.b32.xlu1 %v1883_v10, %s3719_s19  ;;  %v443_v10 = vrot.slane %v439_v24, 2  ;;  %v3134_v24 = vld [vmem:[%s5510_s9 + $0x40] sm:$0xff] }
 0x2ff   :  { %3415 = vmatprep.subr.mxu1 %v5513_v1 }
 0x302   :  { %2560 = vrot.lane.b32.xlu0 %v2555_v11, %s3719_s19  ;;  %1998 = vrot.lane.b32.xlu1 %v1993_v0, %s3719_s19  ;;  %v527_v11 = vmul.f32 %v4194_v3, %v3883_v45  ;;  %v460_v0 = vmul.f32 %v4197_v4, %v3883_v45 }
 0x306   :  { %2736 = vrot.lane.b32.xlu0 %v2731_v13, %s3718_s5  ;;  %2183 = vrot.lane.b32.xlu1 %v2179_v14, %s3719_s19  ;;  %v4218_v13 = vrot.slane %v3940_v2, 6 }
 0x30a   :  { %2748 = vrot.lane.b32.xlu0 %v2743_v6, %s3719_s19  ;;  %2036 = vrot.lane.b32.xlu1 %v2033_v12, %s3719_s19  ;;  %v531_v6 = vrot.slane %v527_v11, 1  ;;  %v464_v12 = vrot.slane %v460_v0, 2  ;;  %v576_v11 = vrot.slane %v572_v55, 2 }
 0x30e   :  { %2924 = vrot.lane.b32.xlu0 %v2919_v20, %s3718_s5  ;;  %2358 = vrot.lane.b32.xlu1 %v2354_v22, %s3718_s5  ;;  %v543_v20 = vmul.f32 %v4218_v13, %v3883_v45  ;;  %v810_v22 = vmul.f32 %v4194_v3, %v3878_v44 }
 0x310   :  { %v4124_v25 = vpop.permute.xlu1 %333  ;;  %v4126_v26 = vpop.permute.xlu0 %493  ;;  %v547_v60 = vrot.slane %v543_v20, 1  ;;  %v854_v20 = vmul.f32 %v4224_v30, %v3878_v44 }
 0x312   :  { %2936 = vrot.lane.b32.xlu0 %v2931_v28, %s3719_s19  ;;  %2372 = vrot.lane.b32.xlu1 %v2367_v29, %s3719_s19  ;;  %v3137_v28 = vld [vmem:[%s5510_s9 + $0x58] sm:$0xff]  ;;  %v3136_v29 = vld [vmem:[%s5510_s9 + $0x50] sm:$0xff] }
 0x313   :  { %3416 = vmatpush3.msra.mxu1 %v3137_v28 }
 0x314   :  { %v4139_v33 = vpop.permute.xlu1 %1996  ;;  %v4141_v34 = vpop.permute.xlu0 %507  ;;  %3417 = vmatprep.subr.mxu1 %v5513_v1 }
 0x315   :  { %5541 = vst [vmem:[#allocation6_spill] sm:$0xff] %v4139_v33  ;;  %3418 = vmatpush3.msra.mxu1 %v3136_v29  ;;  %v592_v29 = vrot.slane %v588_v27, 2 }
 0x316   :  { %535 = vrot.lane.b32.xlu0 %v532_v35, %s3718_s5  ;;  %2548 = vrot.lane.b32.xlu1 %v2543_v36, %s3718_s5 }
 0x317   :  { %3419 = vmatprep.subr.mxu1 %v5513_v1 }
 0x318   :  { %v4152_v38 = vpop.permute.xlu1 %2185  ;;  %v4154_v39 = vpop.permute.xlu0 %351 }
 0x319   :  { %5542 = vst [vmem:[#allocation7_spill] sm:$0xff] %v4152_v38  ;;  %5543 = vst [vmem:[#allocation8_spill] sm:$0xff] %v4154_v39 }
 0x31a   :  { %551 = vrot.lane.b32.xlu0 %v548_v40, %s3719_s19  ;;  %2558 = vrot.lane.b32.xlu1 %v2554_v42, %s3719_s19  ;;  %v814_v40 = vrot.slane %v810_v22, 1  ;;  %v826_v42 = vmul.f32 %v4218_v13, %v3878_v44 }
 0x31c   :  { %v4162_v43 = vpop.permute.xlu1 %491  ;;  %v4164_v46 = vpop.permute.xlu0 %1984 }
 0x31d   :  { %5544 = vst [vmem:[#allocation9_spill] sm:$0xff] %v4164_v46 }
 0x31e   :  { %593 = vrot.lane.b32.xlu0 %v591_v47, %s3719_s19  ;;  %2734 = vrot.lane.b32.xlu1 %v2730_v48, %s3718_s5  ;;  %v3135_v47 = vld [vmem:[%s5510_s9 + $0x48] sm:$0xff]  ;;  %v575_v48 = vrot.slane %v571_v31, 2 }
 0x31f   :  { %3420 = vmatpush3.msra.mxu1 %v3135_v47 }
 0x320   :  { %v4172_v18 = vpop.permute.xlu1 %505  ;;  %v4174_v51 = vpop.permute.xlu0 %2173  ;;  %3421 = vmatprep.subr.mxu1 %v5513_v1 }
 0x321   :  { %5545 = vst [vmem:[#allocation10_spill] sm:$0xff] %v4174_v51  ;;  %3422 = vmatpush3.msra.mxu1 %v3134_v24  ;;  %v4318_v24 = vrot.slane %v4044_v41, 4 }
 0x322   :  { %387 = vrot.lane.b32.xlu0 %v385_v52, %s3718_s5  ;;  %2746 = vrot.lane.b32.xlu1 %v2742_v54, %s3719_s19  ;;  %v830_v54 = vrot.slane %v826_v42, 1  ;;  %v858_v42 = vrot.slane %v854_v20, 2 }
 0x323   :  { %3423 = vmatprep.subr.mxu1 %v5513_v1  ;;  %5560 = vst [vmem:[#allocation25_spill] sm:$0xff] %v4318_v24  ;;  %v1060_v20 = vmul.f32 %v4318_v24, %v3878_v44 }
 0x324   :  { %v4187_v61 = vpop.permute.xlu1 %389  ;;  %v4189_v62 = vpop.permute.xlu0 %335  ;;  %3424 = vmatpush3.msra.mxu1 %v3133_v5  ;;  %v809_v5 = vmul.f32 %v4252_v9, %v3883_v45 }
 0x325   :  { %5546 = vst [vmem:[#allocation11_spill] sm:$0xff] %v4187_v61  ;;  %3428 = vmatprep.subr.mxu1 %v5513_v1  ;;  %v4344_v1 = vrot.slane %v3920_v57, 4 }
 0x326   :  { %407 = vrot.lane.b32.xlu0 %v405_v63, %s3719_s19  ;;  %2922 = vrot.lane.b32.xlu1 %v2918_v58, %s3718_s5  ;;  %v1016_v58 = vmul.f32 %v4252_v9, %v3878_v44  ;;  %v4270_v63 = vrot.slane %v3940_v2, 5 }
 0x327   :  { %5566 = vst [vmem:[#allocation31_spill] sm:$0xff] %v4344_v1  ;;  %v1015_v33 = vmul.f32 %v4344_v1, %v3883_v45  ;;  %v1222_v46 = vmul.f32 %v4344_v1, %v3878_v44 }
 0x328   :  { %v4209_v8 = vpop.permute.xlu1 %409  ;;  %v4211_v56 = vpop.permute.xlu0 %353  ;;  %v1020_v0 = vrot.slane %v1016_v58, 1  ;;  %v870_v58 = vmul.f32 %v4148_v37, %v3878_v44 }
 0x329   :  { %5547 = vst [vmem:[#allocation12_spill] sm:$0xff] %v4209_v8 }
 0x32a   :  { %2934 = vrot.lane.b32.xlu1 %v2930_v7, %s3719_s19  ;;  %445 = vrot.lane.b32.xlu0 %v443_v10, %s3718_s5 }
 0x32c   :  { %v4227_v14 = vpop.permute.xlu1 %775  ;;  %v4229_v16 = vpop.permute.xlu0 %773 }
 0x32d   :  { %5548 = vst [vmem:[#allocation13_spill] sm:$0xff] %v4227_v14  ;;  %5549 = vst [vmem:[#allocation14_spill] sm:$0xff] %v4229_v16 }
 0x32e   :  { %533 = vrot.lane.b32.xlu1 %v531_v6, %s3718_s5  ;;  %466 = vrot.lane.b32.xlu0 %v464_v12, %s3719_s19  ;;  %v1032_v6 = vmul.f32 %v4270_v63, %v3878_v44  ;;  %v4290_v12 = vrot.slane %v4044_v41, 7 }
 0x330   :  { %v4245_v35 = vpop.permute.xlu1 %789  ;;  %v4247_v36 = vpop.permute.xlu0 %787  ;;  %v1036_v31 = vrot.slane %v1032_v6, 1  ;;  %v874_v6 = vrot.slane %v870_v58, 2 }
 0x331   :  { %5550 = vst [vmem:[#allocation15_spill] sm:$0xff] %v4245_v35  ;;  %5551 = vst [vmem:[#allocation16_spill] sm:$0xff] %v4247_v36 }
 0x332   :  { %549 = vrot.lane.b32.xlu1 %v547_v60, %s3719_s19  ;;  %817 = vrot.lane.b32.xlu0 %v814_v40, %s3718_s5  ;;  %v440_v60 = vmul.f32 %v4290_v12, %v3878_v44  ;;  %v4305_v40 = vrot.slane %v4067_v59, 7 }
 0x334   :  { %v4261_v49 = vpop.permute.xlu1 %981  ;;  %v4263_v52 = vpop.permute.xlu0 %979  ;;  %v461_v55 = vmul.f32 %v4305_v40, %v3878_v44 }
 0x335   :  { %5552 = vst [vmem:[#allocation17_spill] sm:$0xff] %v4261_v49  ;;  %5553 = vst [vmem:[#allocation18_spill] sm:$0xff] %v4263_v52 }
 0x336   :  { %577 = vrot.lane.b32.xlu1 %v575_v48, %s3718_s5  ;;  %833 = vrot.lane.b32.xlu0 %v830_v54, %s3719_s19  ;;  %v444_v54 = vrot.slane %v440_v60, 2 }
 0x338   :  { %v4283_v7 = vpop.permute.xlu1 %993  ;;  %v4285_v10 = vpop.permute.xlu0 %995 }
 0x339   :  { %5554 = vst [vmem:[#allocation19_spill] sm:$0xff] %v4283_v7  ;;  %5555 = vst [vmem:[#allocation20_spill] sm:$0xff] %v4285_v10 }
 0x33a   :  { %579 = vrot.lane.b32.xlu1 %v576_v11, %s3718_s5  ;;  %1023 = vrot.lane.b32.xlu0 %v1020_v0, %s3718_s5  ;;  %v465_v0 = vrot.slane %v461_v55, 2  ;;  %v1064_v55 = vrot.slane %v1060_v20, 2 }
 0x33c   :  { %v4298_v22 = vpop.permute.xlu1 %1185  ;;  %v4300_v28 = vpop.permute.xlu0 %1187 }
 0x33d   :  { %5556 = vst [vmem:[#allocation21_spill] sm:$0xff] %v4298_v22  ;;  %5557 = vst [vmem:[#allocation22_spill] sm:$0xff] %v4300_v28 }
 0x33e   :  { %595 = vrot.lane.b32.xlu1 %v592_v29, %s3719_s19  ;;  %1039 = vrot.lane.b32.xlu0 %v1036_v31, %s3719_s19  ;;  %v4331_v29 = vrot.slane %v4067_v59, 4  ;;  %v825_v31 = vmul.f32 %v4270_v63, %v3883_v45 }
 0x340   :  { %v4309_v47 = vpop.permute.xlu1 %1199  ;;  %v4311_v48 = vpop.permute.xlu0 %1201  ;;  %5563 = vst [vmem:[#allocation28_spill] sm:$0xff] %v4331_v29  ;;  %v1076_v58 = vmul.f32 %v4331_v29, %v3878_v44 }
 0x341   :  { %5558 = vst [vmem:[#allocation23_spill] sm:$0xff] %v4309_v47  ;;  %5559 = vst [vmem:[#allocation24_spill] sm:$0xff] %v4311_v48 }
 0x342   :  { %447 = vrot.lane.b32.xlu1 %v444_v54, %s3718_s5  ;;  %861 = vrot.lane.b32.xlu0 %v858_v42, %s3718_s5  ;;  %v813_v54 = vrot.slane %v809_v5, 1  ;;  %v3147_v5 = vld [vmem:[%s5510_s9 + $0x98] sm:$0xff]  ;;  %v1080_v51 = vrot.slane %v1076_v58, 2  ;;  %v4372_v58 = vrot.slane %v3920_v57, 3 }
 0x344   :  { %v4324_v27 = vpop.permute.xlu1 %1391  ;;  %v4326_v11 = vpop.permute.xlu0 %1393  ;;  %5571 = vst [vmem:[#allocation35_spill] sm:$0xff] %v4372_v58 }
 0x345   :  { %5561 = vst [vmem:[#allocation26_spill] sm:$0xff] %v4324_v27  ;;  %5562 = vst [vmem:[#allocation27_spill] sm:$0xff] %v4326_v11  ;;  %v1428_v27 = vmul.f32 %v4372_v58, %v3878_v44  ;;  %v4399_v11 = vrot.slane %v3940_v2, 3 }
 0x346   :  { %468 = vrot.lane.b32.xlu1 %v465_v0, %s3719_s19  ;;  %877 = vrot.lane.b32.xlu0 %v874_v6, %s3719_s19  ;;  %v3148_v0 = vld [vmem:[%s5510_s9 + $0xa0] sm:$0xff]  ;;  %v829_v6 = vrot.slane %v825_v31, 1  ;;  %v5570_v31 = vmov 0.0  }
 0x347   :  { %3446 = vmatpush3.msra.mxu0 %v3148_v0  ;;  %5575 = vst [vmem:[#allocation39_spill] sm:$0xff] %v4399_v11  ;;  %v1432_v28 = vrot.slane %v1428_v27, 1  ;;  %v1444_v7 = vmul.f32 %v4399_v11, %v3878_v44 }
 0x348   :  { %v4337_v60 = vpop.permute.xlu1 %1405  ;;  %v4339_v42 = vpop.permute.xlu0 %1407  ;;  %3447 = vmatprep.subr.mxu0 %v5570_v31 }
 0x349   :  { %5564 = vst [vmem:[#allocation29_spill] sm:$0xff] %v4337_v60  ;;  %5565 = vst [vmem:[#allocation30_spill] sm:$0xff] %v4339_v42  ;;  %3448 = vmatpush3.msra.mxu0 %v3147_v5  ;;  %v1226_v60 = vrot.slane %v1222_v46, 1 }
 0x34a   :  { %815 = vrot.lane.b32.xlu1 %v813_v54, %s3718_s5  ;;  %1067 = vrot.lane.b32.xlu0 %v1064_v55, %s3718_s5  ;;  %v4363_v54 = vrot.slane %v3940_v2, 4  ;;  %v3146_v55 = vld [vmem:[%s5510_s9 + $0x90] sm:$0xff] }
 0x34b   :  { %3449 = vmatprep.subr.mxu0 %v5570_v31 }
 0x34c   :  { %v4354_v20 = vpop.permute.xlu1 %1597  ;;  %v4356_v38 = vpop.permute.xlu0 %1599  ;;  %5569 = vst [vmem:[#allocation34_spill] sm:$0xff] %v4363_v54  ;;  %v1031_v5 = vmul.f32 %v4363_v54, %v3883_v45  ;;  %v1238_v42 = vmul.f32 %v4363_v54, %v3878_v44  ;;  %3450 = vmatpush3.msra.mxu0 %v3146_v55 }
 0x34d   :  { %5567 = vst [vmem:[#allocation32_spill] sm:$0xff] %v4354_v20  ;;  %5568 = vst [vmem:[#allocation33_spill] sm:$0xff] %v4356_v38  ;;  %v1019_v38 = vrot.slane %v1015_v33, 1  ;;  %3451 = vmatprep.subr.mxu0 %v5570_v31  ;;  %v853_v33 = vmul.f32 %v4318_v24, %v3883_v45 }
 0x34e   :  { %831 = vrot.lane.b32.xlu1 %v829_v6, %s3719_s19  ;;  %1083 = vrot.lane.b32.xlu0 %v1080_v51, %s3719_s19  ;;  %v3145_v51 = vld [vmem:[%s5510_s9 + $0x88] sm:$0xff]  ;;  %v4387_v6 = vrot.slane %v4103_v17, 1  ;;  %v1035_v55 = vrot.slane %v1031_v5, 1 }
 0x34f   :  { %3452 = vmatpush3.msra.mxu0 %v3145_v51  ;;  %v3144_v51 = vld [vmem:[%s5510_s9 + $0x80] sm:$0xff]  ;;  %v857_v22 = vrot.slane %v853_v33, 2 }
 0x350   :  { %v4375_v0 = vpop.permute.xlu1 %1611  ;;  %v4377_v20 = vpop.permute.xlu0 %1613  ;;  %3453 = vmatprep.subr.mxu0 %v5570_v31 }
 0x351   :  { %5572 = vst [vmem:[#allocation36_spill] sm:$0xff] %v4375_v0  ;;  %5573 = vst [vmem:[#allocation37_spill] sm:$0xff] %v4377_v20  ;;  %v1242_v20 = vrot.slane %v1238_v42, 1  ;;  %v3143_v42 = vld [vmem:[%s5510_s9 + $0x78] sm:$0xff]  ;;  %3454 = vmatpush3.msra.mxu0 %v3144_v51 }
 0x352   :  { %1021 = vrot.lane.b32.xlu1 %v1019_v38, %s3718_s5  ;;  %1229 = vrot.lane.b32.xlu0 %v1226_v60, %s3718_s5  ;;  %v1790_v38 = vmul.f32 %v4387_v6, %v3883_v45  ;;  %v1816_v60 = vmul.f32 %v4111_v15, %v3896_v50 }
 0x353   :  { %3455 = vmatprep.subr.mxu0 %v5570_v31 }
 0x354   :  { %v1797_v46 = vpop.permute.xlu1 %1796  ;;  %v4394_v0 = vpop.permute.xlu0 %1798  ;;  %v1820_v52 = vrot.slane %v1816_v60, 1  ;;  %3456 = vmatpush3.msra.mxu0 %v3143_v42 }
 0x355   :  { %5574 = vst [vmem:[#allocation38_spill] sm:$0xff] %v4394_v0  ;;  %v1802_v5 = vadd.f32 %v1797_v46, %v1790_v38  ;;  %v869_v0 = vmul.f32 %v4331_v29, %v3883_v45  ;;  %v4425_v46 = vrot.slane %v4113_v19, 7  ;;  %v3142_v38 = vld [vmem:[%s5510_s9 + $0x70] sm:$0xff]  ;;  %3457 = vmatprep.subr.mxu0 %v5570_v31 }
 0x356   :  { %1037 = vrot.lane.b32.xlu1 %v1035_v55, %s3719_s19  ;;  %1245 = vrot.lane.b32.xlu0 %v1242_v20, %s3719_s19  ;;  %v4421_v55 = vrot.slane %v4044_v41, 3 }
 0x357   :  { %5578 = vst [vmem:[#allocation42_spill] sm:$0xff] %v4425_v46  ;;  %v873_v33 = vrot.slane %v869_v0, 2  ;;  %3458 = vmatpush3.msra.mxu0 %v3142_v38 }
 0x358   :  { %v1809_v47 = vpop.permute.xlu1 %1808  ;;  %v4416_v48 = vpop.permute.xlu0 %1810  ;;  %5577 = vst [vmem:[#allocation41_spill] sm:$0xff] %v4421_v55  ;;  %v1059_v60 = vmul.f32 %v4421_v55, %v3883_v45  ;;  %v1266_v42 = vmul.f32 %v4421_v55, %v3878_v44  ;;  %3479 = vmatprep.subr.mxu0 %v5570_v31  ;;  %v4514_v55 = vrot.slane %v4111_v15, 6  ;;  %v4532_v31 = vrot.slane %v4111_v15, 4 }
 0x359   :  { %5576 = vst [vmem:[#allocation40_spill] sm:$0xff] %v4416_v48  ;;  %v1814_v20 = vadd.f32 %v1809_v47, %v1802_v5  ;;  %v1448_v47 = vrot.slane %v1444_v7, 1  ;;  %v4440_v5 = vrot.slane %v4067_v59, 3 }
 0x35a   :  { %859 = vrot.lane.b32.xlu1 %v857_v22, %s3718_s5  ;;  %1435 = vrot.lane.b32.xlu0 %v1432_v28, %s3718_s5  ;;  %v4448_v22 = vrot.slane %v4044_v41, 2 }
 0x35b   :  { %v1824_v27 = vadd.f32 %v1820_v52, %v1814_v20  ;;  %5580 = vst [vmem:[#allocation44_spill] sm:$0xff] %v4440_v5  ;;  %v1854_v52 = vmul.f32 %v4425_v46, %v3896_v50  ;;  %v1063_v20 = vrot.slane %v1059_v60, 2  ;;  %v1075_v38 = vmul.f32 %v4440_v5, %v3883_v45 }
 0x35c   :  { %v1833_v51 = vpop.permute.xlu1 %1832  ;;  %v4433_v48 = vpop.permute.xlu0 %1872  ;;  %5581 = vst [vmem:[#allocation45_spill] sm:$0xff] %v4448_v22  ;;  %v1282_v10 = vmul.f32 %v4440_v5, %v3878_v44  ;;  %v1472_v5 = vmul.f32 %v4448_v22, %v3878_v44 }
 0x35d   :  { %5579 = vst [vmem:[#allocation43_spill] sm:$0xff] %v4433_v48  ;;  %v1838_v7 = vadd.f32 %v1833_v51, %v1824_v27  ;;  %v1270_v48 = vrot.slane %v1266_v42, 2  ;;  %v1858_v36 = vrot.slane %v1854_v52, 2  ;;  %v1221_v27 = vmul.f32 %v4372_v58, %v3883_v45 }
 0x35e   :  { %875 = vrot.lane.b32.xlu1 %v873_v33, %s3719_s19  ;;  %1451 = vrot.lane.b32.xlu0 %v1448_v47, %s3719_s19  ;;  %v1079_v60 = vrot.slane %v1075_v38, 2  ;;  %v1286_v42 = vrot.slane %v1282_v10, 2  ;;  %v4469_v52 = vrot.slane %v4067_v59, 2  ;;  %v4487_v38 = vrot.slane %v3940_v2, 2 }
 0x360   :  { %v1847_v28 = vpop.permute.xlu1 %1846  ;;  %v4450_v0 = vpop.permute.xlu0 %2171  ;;  %5584 = vst [vmem:[#allocation48_spill] sm:$0xff] %v4469_v52  ;;  %v1488_v10 = vmul.f32 %v4469_v52, %v3878_v44  ;;  %5587 = vst [vmem:[#allocation51_spill] sm:$0xff] %v4487_v38  ;;  %v1650_v58 = vmul.f32 %v4487_v38, %v3878_v44 }
 0x361   :  { %v1852_v49 = vadd.f32 %v1847_v28, %v1838_v7  ;;  %v1237_v28 = vmul.f32 %v4399_v11, %v3883_v45 }
 0x362   :  { %1065 = vrot.lane.b32.xlu1 %v1063_v20, %s3718_s5  ;;  %1273 = vrot.lane.b32.xlu0 %v1270_v48, %s3718_s5  ;;  %v1225_v48 = vrot.slane %v1221_v27, 1  ;;  %v4482_v20 = vrot.slane %v3920_v57, 2  ;;  %v1654_v16 = vrot.slane %v1650_v58, 1  ;;  %v1281_v58 = vmul.f32 %v4469_v52, %v3883_v45 }
 0x363   :  { %v4460_v33 = vadd.f32 %v1858_v36, %v1852_v49  ;;  %v1476_v49 = vrot.slane %v1472_v5, 2  ;;  %v1241_v5 = vrot.slane %v1237_v28, 1 }
 0x364   :  { %v4462_v51 = vpop.permute.xlu1 %1681  ;;  %v4464_v47 = vpop.permute.xlu0 %2022  ;;  %5586 = vst [vmem:[#allocation50_spill] sm:$0xff] %v4482_v20 }
 0x365   :  { %5582 = vst [vmem:[#allocation46_spill] sm:$0xff] %v4460_v33  ;;  %5583 = vst [vmem:[#allocation47_spill] sm:$0xff] %v4462_v51  ;;  %v1634_v33 = vmul.f32 %v4482_v20, %v3878_v44 }
 0x366   :  { %1081 = vrot.lane.b32.xlu1 %v1079_v60, %s3719_s19  ;;  %1289 = vrot.lane.b32.xlu0 %v1286_v42, %s3719_s19  ;;  %v1492_v42 = vrot.slane %v1488_v10, 2 }
 0x367   :  { %v1638_v11 = vrot.slane %v1634_v33, 1  ;;  %v4519_v33 = vrot.slane %v4103_v17, 5 }
 0x368   :  { %v4473_v7 = vpop.permute.xlu1 %1696  ;;  %v4475_v36 = vpop.permute.xlu0 %2360 }
 0x369   :  { %5585 = vst [vmem:[#allocation49_spill] sm:$0xff] %v4473_v7  ;;  %v1427_v7 = vmul.f32 %v4482_v20, %v3883_v45  ;;  %v1265_v20 = vmul.f32 %v4448_v22, %v3883_v45  ;;  %v5590_v22 = vrot.slane %v3940_v2, 1 }
 0x36a   :  { %1227 = vrot.lane.b32.xlu1 %v1225_v48, %s3718_s5  ;;  %1479 = vrot.lane.b32.xlu0 %v1476_v49, %s3718_s5  ;;  %v4498_v48 = vrot.slane %v4103_v17, 7  ;;  %v1443_v49 = vmul.f32 %v4487_v38, %v3883_v45 }
 0x36b   :  { %v1431_v10 = vrot.slane %v1427_v7, 1  ;;  %v1841_v54 = vmul.f32 %v5590_v22, %v3907_v53  ;;  %v4562_v22 = vrot.slane %v4067_v59, 1  ;;  %v4575_v59 = vrot.slane %v4111_v15, 3 }
 0x36c   :  { %v1987_v27 = vpop.permute.xlu1 %1986  ;;  %v4489_v60 = vpop.permute.xlu0 %2370  ;;  %v2165_v44 = vmul.f32 %v4498_v48, %v3896_v50  ;;  %v1447_v35 = vrot.slane %v1443_v49, 1 }
 0x36d   :  { %5592 = vst [vmem:[#allocation54_spill] sm:$0xff] %v4562_v22  ;;  %v1845_v1 = vrot.slane %v1841_v54, 1  ;;  %v1487_v54 = vmul.f32 %v4562_v22, %v3883_v45 }
 0x36e   :  { %1243 = vrot.lane.b32.xlu1 %v1241_v5, %s3719_s19  ;;  %1495 = vrot.lane.b32.xlu0 %v1492_v42, %s3719_s19  ;;  %v1979_v5 = vmul.f32 %v4387_v6, %v3907_v53  ;;  %v2005_v42 = vmul.f32 %v4111_v15, %v3907_v53  ;;  %v2177_v49 = vadd.f32 %v4450_v0, %v2165_v44 }
 0x36f   :  { %v2043_v0 = vmul.f32 %v4425_v46, %v3907_v53  ;;  %v1878_v46 = vmul.f32 %v4305_v40, %v3896_v50 }
 0x370   :  { %v4502_v51 = vpop.permute.xlu1 %1886  ;;  %v4504_v28 = vpop.permute.xlu0 %2546  ;;  %v1991_v7 = vadd.f32 %v1987_v27, %v1979_v5  ;;  %v2009_v24 = vrot.slane %v2005_v42, 1  ;;  %v2191_v27 = vmul.f32 %v4514_v55, %v3896_v50 }
 0x371   :  { %5588 = vst [vmem:[#allocation52_spill] sm:$0xff] %v4502_v51 }
 0x372   :  { %1433 = vrot.lane.b32.xlu1 %v1431_v10, %s3718_s5  ;;  %1641 = vrot.lane.b32.xlu0 %v1638_v11, %s3718_s5  ;;  %v5589_v10 = vrot.slane %v3920_v57, 1  ;;  %v2195_v8 = vrot.slane %v2191_v27, 1  ;;  %v4566_v27 = vrot.slane %v4111_v15, 5 }
 0x374   :  { %v1999_v51 = vpop.permute.xlu1 %1998  ;;  %v4525_v38 = vpop.permute.xlu0 %2560  ;;  %v1827_v14 = vmul.f32 %v5589_v10, %v3907_v53  ;;  %v1269_v10 = vrot.slane %v1265_v20, 2 }
 0x375   :  { %v2003_v29 = vadd.f32 %v1999_v51, %v1991_v7  ;;  %v2729_v51 = vmul.f32 %v4519_v33, %v3907_v53 }
 0x376   :  { %1449 = vrot.lane.b32.xlu1 %v1447_v35, %s3719_s19  ;;  %1657 = vrot.lane.b32.xlu0 %v1654_v16, %s3719_s19  ;;  %v1831_v11 = vrot.slane %v1827_v14, 1  ;;  %v4547_v35 = vrot.slane %v4044_v41, 1  ;;  %v4557_v14 = vrot.slane %v4103_v17, 4  ;;  %v1285_v41 = vrot.slane %v1281_v58, 2 }
 0x377   :  { %v2013_v5 = vadd.f32 %v2009_v24, %v2003_v29  ;;  %v2755_v24 = vmul.f32 %v4532_v31, %v3907_v53  ;;  %v4554_v29 = vrot.slane %v4103_v17, 6 }
 0x378   :  { %v2184_v42 = vpop.permute.xlu1 %2183  ;;  %v2737_v7 = vpop.permute.xlu0 %2736  ;;  %5591 = vst [vmem:[#allocation53_spill] sm:$0xff] %v4547_v35 }
 0x379   :  { %v2189_v16 = vadd.f32 %v2184_v42, %v2177_v49  ;;  %v2741_v20 = vadd.f32 %v2737_v7, %v2729_v51  ;;  %v2027_v44 = vadd.f32 %v4464_v47, %v2013_v5  ;;  %v2047_v47 = vrot.slane %v2043_v0, 2 }
 0x37a   :  { %1271 = vrot.lane.b32.xlu1 %v1269_v10, %s3718_s5  ;;  %1834 = vrot.lane.b32.xlu0 %v1831_v11, %s3718_s5  ;;  %v1471_v10 = vmul.f32 %v4547_v35, %v3883_v45  ;;  %v1676_v11 = vmul.f32 %v4547_v35, %v3907_v53  ;;  %v2759_v5 = vrot.slane %v2755_v24, 1 }
 0x37b   :  { %v4568_v49 = vadd.f32 %v2195_v8, %v2189_v16  ;;  %v2352_v8 = vmul.f32 %v4554_v29, %v3896_v50  ;;  %v2378_v16 = vmul.f32 %v4566_v27, %v3896_v50 }
 0x37c   :  { %v2037_v42 = vpop.permute.xlu1 %2036  ;;  %v2749_v52 = vpop.permute.xlu0 %2748  ;;  %v1475_v24 = vrot.slane %v1471_v10, 2  ;;  %v5596_v10 = vrot.slane %v3920_v57, 1 }
 0x37d   :  { %5593 = vst [vmem:[#allocation55_spill] sm:$0xff] %v4568_v49  ;;  %v2041_v58 = vadd.f32 %v2037_v42, %v2027_v44  ;;  %v2753_v51 = vadd.f32 %v2749_v52, %v2741_v20  ;;  %v1680_v20 = vrot.slane %v1676_v11, 2  ;;  %v2353_v44 = vmul.f32 %v4498_v48, %v3907_v53 }
 0x37e   :  { %1287 = vrot.lane.b32.xlu1 %v1285_v41, %s3719_s19  ;;  %1848 = vrot.lane.b32.xlu0 %v1845_v1, %s3719_s19  ;;  %v1691_v1 = vmul.f32 %v4562_v22, %v3907_v53  ;;  %v2379_v41 = vmul.f32 %v4514_v55, %v3907_v53  ;;  %v1633_v11 = vmul.f32 %v5596_v10, %v3883_v45  ;;  %v1491_v22 = vrot.slane %v1487_v54, 2 }
 0x37f   :  { %v4583_v7 = vadd.f32 %v2047_v47, %v2041_v58  ;;  %v4587_v49 = vadd.f32 %v2759_v5, %v2753_v51  ;;  %v2917_v58 = vmul.f32 %v4557_v14, %v3907_v53  ;;  %v2943_v51 = vmul.f32 %v4575_v59, %v3907_v53 }
 0x380   :  { %v2359_v52 = vpop.permute.xlu1 %2358  ;;  %v2925_v0 = vpop.permute.xlu0 %2924  ;;  %v2365_v47 = vadd.f32 %v4475_v36, %v2353_v44  ;;  %v1695_v35 = vrot.slane %v1691_v1, 2  ;;  %v2541_v45 = vmul.f32 %v4554_v29, %v3907_v53 }
 0x381   :  { %5594 = vst [vmem:[#allocation56_spill] sm:$0xff] %v4583_v7  ;;  %5595 = vst [vmem:[#allocation57_spill] sm:$0xff] %v4587_v49  ;;  %v2364_v42 = vadd.f32 %v2359_v52, %v2352_v8  ;;  %v2929_v49 = vadd.f32 %v2925_v0, %v2917_v58  ;;  %v2382_v8 = vrot.slane %v2378_v16, 1  ;;  %v2947_v57 = vrot.slane %v2943_v51, 1 }
 0x382   :  { %1477 = vrot.lane.b32.xlu1 %v1475_v24, %s3718_s5  ;;  %1683 = vrot.lane.b32.xlu0 %v1680_v20, %s3718_s5  ;;  %v2383_v24 = vrot.slane %v2379_v41, 1 }
 0x383   :  { %v2376_v5 = vadd.f32 %v4489_v60, %v2364_v42  ;;  %v2567_v60 = vmul.f32 %v4566_v27, %v3907_v53  ;;  %v4633_v53 = vld [vmem:[%s5503_s2 + $0x8] sm:$0xff] }
 0x384   :  { %v2373_v52 = vpop.permute.xlu1 %2372  ;;  %v2937_v7 = vpop.permute.xlu0 %2936  ;;  %v2014_v0 = vmul.f32 %v4633_v53, %v4120_v23  ;;  %v2566_v41 = vmul.f32 %v4633_v53, %v4532_v31 }
 0x385   :  { %v2377_v61 = vadd.f32 %v2373_v52, %v2365_v47  ;;  %v2941_v20 = vadd.f32 %v2937_v7, %v2929_v49  ;;  %v4608_v39 = vadd.f32 %v2382_v8, %v2376_v5  ;;  %v1637_v49 = vrot.slane %v1633_v11, 1 }
 0x386   :  { %1493 = vrot.lane.b32.xlu1 %v1491_v22, %s3719_s19  ;;  %1698 = vrot.lane.b32.xlu0 %v1695_v35, %s3719_s19  ;;  %v1882_v7 = vrot.slane %v1878_v46, 2  ;;  %v4625_v22 = vld [vmem:[%s5503_s2] sm:$0xff]  ;;  %v5598_v35 = vrot.slane %v3940_v2, 1  ;;  %v2540_v46 = vmul.f32 %v4633_v53, %v4519_v33  ;;  %v2571_v42 = vrot.slane %v2567_v60, 1 }
 0x387   :  { %v4614_v36 = vadd.f32 %v2383_v24, %v2377_v61  ;;  %v4618_v54 = vadd.f32 %v2947_v57, %v2941_v20  ;;  %v2018_v11 = vrot.slane %v2014_v0, 1  ;;  %v1864_v47 = vmul.f32 %v4633_v53, %v4290_v12 }
 0x388   :  { %v2549_v50 = vpop.permute.xlu1 %2548  ;;  %v4620_v16 = vpop.permute.xlu0 %535  ;;  %v1649_v61 = vmul.f32 %v4625_v22, %v5598_v35  ;;  %v2552_v2 = vadd.f32 %v4504_v28, %v2540_v46  ;;  %v2201_v5 = vmul.f32 %v4633_v53, %v4194_v3  ;;  %v2570_v52 = vrot.slane %v2566_v41, 1 }
 0x389   :  { %5597 = vst [vmem:[#allocation58_spill] sm:$0xff] %v4618_v54  ;;  %v2553_v1 = vadd.f32 %v2549_v50, %v2541_v45  ;;  %v1868_v57 = vrot.slane %v1864_v47, 2  ;;  %v2028_v60 = vmul.f32 %v4633_v53, %v4135_v32  ;;  %v4664_v50 = vld [vmem:[%s5503_s2 + $0x18] sm:$0xff]  ;;  %v2754_v35 = vmul.f32 %v4633_v53, %v4575_v59 }
 0x38a   :  { %1639 = vrot.lane.b32.xlu1 %v1637_v49, %s3718_s5  ;;  %1884 = vrot.lane.b32.xlu0 %v1882_v7, %s3719_s19  ;;  %v1653_v10 = vrot.slane %v1649_v61, 1  ;;  %v2205_v45 = vrot.slane %v2201_v5, 1  ;;  %v2202_v49 = vmul.f32 %v4664_v50, %v4120_v23  ;;  %v2728_v7 = vmul.f32 %v4633_v53, %v4557_v14 }
 0x38b   :  { %v2565_v44 = vadd.f32 %v4525_v38, %v2553_v1  ;;  %v2032_v1 = vrot.slane %v2028_v60, 1  ;;  %v2053_v23 = vmul.f32 %v4664_v50, %v4290_v12  ;;  %v2216_v12 = vmul.f32 %v4664_v50, %v4135_v32 }
 0x38c   :  { %v2559_v58 = vpop.permute.xlu1 %2558  ;;  %v4645_v51 = vpop.permute.xlu0 %551  ;;  %v2206_v41 = vrot.slane %v2202_v49, 1  ;;  %v4705_v49 = vld [vmem:[%s5503_s2 + $0x10] sm:$0xff] }
 0x38d   :  { %v2564_v8 = vadd.f32 %v2559_v58, %v2552_v2  ;;  %v4651_v24 = vadd.f32 %v2571_v42, %v2565_v44  ;;  %v2215_v2 = vmul.f32 %v4633_v53, %v4218_v13  ;;  %v4681_v44 = vrot.slane %v4103_v17, 3 }
 0x38e   :  { %1655 = vrot.lane.b32.xlu1 %v1653_v10, %s3719_s19  ;;  %2020 = vrot.lane.b32.xlu0 %v2018_v11, %s3718_s5  ;;  %v4684_v58 = vrot.slane %v4111_v15, 2  ;;  %v2758_v10 = vrot.slane %v2754_v35, 1  ;;  %v484_v32 = vmul.f32 %v4705_v49, %v4103_v17  ;;  %v4713_v35 = vrot.slane %v4111_v15, 7 }
 0x38f   :  { %v4655_v38 = vadd.f32 %v2570_v52, %v2564_v8  ;;  %v2219_v8 = vrot.slane %v2215_v2, 1  ;;  %v2057_v52 = vrot.slane %v2053_v23, 2  ;;  %v2220_v2 = vrot.slane %v2216_v12, 1 }
 0x390   :  { %v2735_v28 = vpop.permute.xlu1 %2734  ;;  %v4657_v20 = vpop.permute.xlu0 %593  ;;  %v2942_v60 = vmul.f32 %v4633_v53, %v4684_v58  ;;  %v498_v12 = vadd.f32 %v4126_v26, %v484_v32  ;;  %v322_v26 = vmul.f32 %v4705_v49, %v4387_v6 }
 0x391   :  { %v2740_v61 = vadd.f32 %v2735_v28, %v2728_v7  ;;  %v2052_v28 = vmul.f32 %v4633_v53, %v4181_v21 }
 0x392   :  { %1870 = vrot.lane.b32.xlu1 %v1868_v57, %s3718_s5  ;;  %2207 = vrot.lane.b32.xlu0 %v2205_v45, %s3718_s5  ;;  %v483_v57 = vmul.f32 %v4625_v22, %v4498_v48  ;;  %v2916_v45 = vmul.f32 %v4633_v53, %v4681_v44 }
 0x393   :  { %v2056_v23 = vrot.slane %v2052_v28, 2  ;;  %v516_v28 = vmul.f32 %v4705_v49, %v4713_v35 }
 0x394   :  { %v2747_v0 = vpop.permute.xlu1 %2746  ;;  %v4674_v46 = vpop.permute.xlu0 %387  ;;  %v497_v7 = vadd.f32 %v4162_v43, %v483_v57 }
 0x395   :  { %v2752_v42 = vadd.f32 %v2747_v0, %v2740_v61  ;;  %v515_v0 = vmul.f32 %v4625_v22, %v4514_v55 }
 0x396   :  { %2034 = vrot.lane.b32.xlu1 %v2032_v1, %s3719_s19  ;;  %2209 = vrot.lane.b32.xlu0 %v2206_v41, %s3718_s5  ;;  %v511_v43 = vadd.f32 %v4172_v18, %v497_v7 }
 0x397   :  { %v4688_v11 = vadd.f32 %v2758_v10, %v2752_v42  ;;  %v2067_v42 = vmul.f32 %v4664_v50, %v4305_v40  ;;  %v2239_v10 = vmul.f32 %v4633_v53, %v4224_v30  ;;  %v519_v40 = vrot.slane %v515_v0, 1 }
 0x398   :  { %v2923_v47 = vpop.permute.xlu1 %2922  ;;  %v4690_v5 = vpop.permute.xlu0 %407 }
 0x399   :  { %v2928_v61 = vadd.f32 %v2923_v47, %v2916_v45  ;;  %v2946_v47 = vrot.slane %v2942_v60, 1  ;;  %v2071_v18 = vrot.slane %v2067_v42, 2  ;;  %v2243_v7 = vrot.slane %v2239_v10, 2 }
 0x39a   :  { %2221 = vrot.lane.b32.xlu1 %v2219_v8, %s3719_s19  ;;  %2060 = vrot.lane.b32.xlu0 %v2057_v52, %s3718_s5  ;;  %v4725_v52 = vrot.slane %v4113_v19, 5  ;;  %v2066_v60 = vmul.f32 %v4633_v53, %v4197_v4  ;;  %v523_v32 = vadd.f32 %v519_v40, %v511_v43  ;;  %v520_v42 = vrot.slane %v516_v28, 1 }
 0x39c   :  { %v2935_v1 = vpop.permute.xlu1 %2934  ;;  %v4717_v41 = vpop.permute.xlu0 %445  ;;  %v559_v0 = vmul.f32 %v4625_v22, %v4725_v52  ;;  %v2070_v43 = vrot.slane %v2066_v60, 2 }
 0x39d   :  { %v2940_v8 = vadd.f32 %v2935_v1, %v2928_v61  ;;  %v2240_v61 = vmul.f32 %v4664_v50, %v4181_v21  ;;  %v512_v1 = vadd.f32 %v4141_v34, %v498_v12  ;;  %v4751_v21 = vrot.slane %v4113_v19, 6 }
 0x39e   :  { %2223 = vrot.lane.b32.xlu1 %v2220_v2, %s3719_s19  ;;  %2058 = vrot.lane.b32.xlu0 %v2056_v23, %s3718_s5  ;;  %v366_v2 = vmul.f32 %v4705_v49, %v4111_v15  ;;  %v340_v23 = vadd.f32 %v4189_v62, %v322_v26  ;;  %v2254_v12 = vmul.f32 %v4664_v50, %v4197_v4  ;;  %v563_v28 = vrot.slane %v559_v0, 2 }
 0x39f   :  { %v4732_v57 = vadd.f32 %v2946_v47, %v2940_v8  ;;  %v2244_v8 = vrot.slane %v2240_v61, 2  ;;  %v2253_v47 = vmul.f32 %v4633_v53, %v4148_v37  ;;  %v560_v26 = vmul.f32 %v4705_v49, %v4751_v21 }
 0x3a0   :  { %v534_v45 = vpop.permute.xlu1 %533  ;;  %v4734_v54 = vpop.permute.xlu0 %466  ;;  %v358_v40 = vadd.f32 %v4211_v56, %v340_v23  ;;  %v2388_v0 = vmul.f32 %v4633_v53, %v4252_v9  ;;  %v2389_v23 = vmul.f32 %v4664_v50, %v4194_v3  ;;  %v2403_v3 = vmul.f32 %v4664_v50, %v4218_v13 }
 0x3a1   :  { %v539_v34 = vadd.f32 %v534_v45, %v523_v32  ;;  %v370_v45 = vrot.slane %v366_v2, 1  ;;  %v2257_v56 = vrot.slane %v2253_v47, 2  ;;  %v5599_v47 = vld [vmem:[#allocation8_spill] sm:$0xff] }
 0x3a2   :  { %2074 = vrot.lane.b32.xlu1 %v2071_v18, %s3719_s19  ;;  %2245 = vrot.lane.b32.xlu0 %v2243_v7, %s3718_s5  ;;  %v524_v18 = vadd.f32 %v520_v42, %v512_v1  ;;  %v321_v7 = vmul.f32 %v4625_v22, %v4103_v17  ;;  %v2258_v1 = vrot.slane %v2254_v12, 2  ;;  %v2407_v13 = vrot.slane %v2403_v3, 1 }
 0x3a3   :  { %v374_v42 = vadd.f32 %v370_v45, %v358_v40 }
 0x3a4   :  { %v550_v10 = vpop.permute.xlu1 %549  ;;  %v4753_v6 = vpop.permute.xlu0 %817  ;;  %v540_v60 = vadd.f32 %v4620_v16, %v524_v18  ;;  %v339_v16 = vadd.f32 %v4124_v25, %v321_v7  ;;  %v2392_v25 = vrot.slane %v2388_v0, 1  ;;  %v2393_v18 = vrot.slane %v2389_v23, 1  ;;  %v5602_v23 = vld [vmem:[#allocation31_spill] sm:$0xff] }
 0x3a5   :  { %v555_v62 = vadd.f32 %v550_v10, %v539_v34  ;;  %v365_v10 = vmul.f32 %v4625_v22, %v4713_v35 }
 0x3a6   :  { %2072 = vrot.lane.b32.xlu1 %v2070_v43, %s3719_s19  ;;  %2247 = vrot.lane.b32.xlu0 %v2244_v8, %s3718_s5  ;;  %v556_v2 = vadd.f32 %v4645_v51, %v540_v60  ;;  %v564_v43 = vrot.slane %v560_v26, 2  ;;  %v2402_v8 = vmul.f32 %v4633_v53, %v4270_v63  ;;  %v357_v12 = vadd.f32 %v5599_v47, %v339_v16 }
 0x3a7   :  { %v567_v61 = vadd.f32 %v563_v28, %v555_v62  ;;  %v5600_v62 = vld [vmem:[#allocation11_spill] sm:$0xff]  ;;  %v369_v60 = vrot.slane %v365_v10, 1  ;;  %v5603_v10 = vld [vmem:[#allocation12_spill] sm:$0xff]  ;;  %v422_v47 = vmul.f32 %v4625_v22, %v4751_v21 }
 0x3a8   :  { %v578_v4 = vpop.permute.xlu1 %577  ;;  %v4767_v32 = vpop.permute.xlu0 %833  ;;  %v394_v28 = vadd.f32 %v5600_v62, %v374_v42  ;;  %v568_v45 = vadd.f32 %v564_v43, %v556_v2  ;;  %v2406_v26 = vrot.slane %v2402_v8, 1  ;;  %v2577_v42 = vmul.f32 %v4664_v50, %v4252_v9  ;;  %v480_v8 = vld [vmem:[%s5510_s9 + $0x30] sm:$0xff]  ;;  %v479_v62 = vld [vmem:[%s5510_s9 + $0x28] sm:$0xff] }
 0x3a9   :  { %v583_v34 = vadd.f32 %v578_v4, %v567_v61  ;;  %v5601_v4 = vld [vmem:[#allocation42_spill] sm:$0xff] }
 0x3aa   :  { %2259 = vrot.lane.b32.xlu1 %v2257_v56, %s3719_s19  ;;  %2261 = vrot.lane.b32.xlu0 %v2258_v1, %s3719_s19  ;;  %v423_v56 = vmul.f32 %v4705_v49, %v5601_v4  ;;  %v373_v1 = vadd.f32 %v369_v60, %v357_v12  ;;  %v414_v43 = vadd.f32 %v5603_v10, %v394_v28  ;;  %v5604_v28 = vld [vmem:[#allocation34_spill] sm:$0xff]  ;;  %v2581_v60 = vrot.slane %v2577_v42, 1 }
 0x3ab   :  { %v599_v7 = vadd.f32 %v4657_v20, %v583_v34  ;;  %v2576_v20 = vmul.f32 %v4633_v53, %v5602_v23  ;;  %v426_v4 = vrot.slane %v422_v47, 2  ;;  %v765_v47 = vmul.f32 %v4625_v22, %v4554_v29 }
 0x3ac   :  { %v580_v51 = vpop.permute.xlu1 %579  ;;  %v4784_v40 = vpop.permute.xlu0 %1023  ;;  %v393_v3 = vadd.f32 %v4674_v46, %v373_v1  ;;  %v427_v12 = vrot.slane %v423_v56, 2 }
 0x3ad   :  { %v584_v61 = vadd.f32 %v580_v51, %v568_v45  ;;  %v611_v2 = vrot.slane %v599_v7, 1  ;;  %v2590_v7 = vmul.f32 %v4633_v53, %v5604_v28 }
 0x3ae   :  { %2394 = vrot.lane.b32.xlu1 %v2392_v25, %s3718_s5  ;;  %2396 = vrot.lane.b32.xlu0 %v2393_v18, %s3718_s5  ;;  %v2580_v18 = vrot.slane %v2576_v20, 1  ;;  %v413_v46 = vadd.f32 %v4690_v5, %v393_v3  ;;  %v431_v45 = vadd.f32 %v427_v12, %v414_v43  ;;  %v5606_v20 = vld [vmem:[#allocation25_spill] sm:$0xff]  ;;  %v2427_v43 = vmul.f32 %v4664_v50, %v4224_v30 }
 0x3af   :  { %v2594_v1 = vrot.slane %v2590_v7, 1  ;;  %v2426_v42 = vmul.f32 %v4633_v53, %v5606_v20  ;;  %v766_v3 = vmul.f32 %v4705_v49, %v4498_v48  ;;  %v798_v30 = vmul.f32 %v4705_v49, %v4514_v55  ;;  %v475_v48 = vld [vmem:[%s5510_s9 + $0x8] sm:$0xff] }
 0x3b0   :  { %v596_v16 = vpop.permute.xlu1 %595  ;;  %v4792_v0 = vpop.permute.xlu0 %1039  ;;  %v2441_v7 = vmul.f32 %v4664_v50, %v4148_v37 }
 0x3b1   :  { %v600_v34 = vadd.f32 %v596_v16, %v584_v61  ;;  %v2591_v61 = vmul.f32 %v4664_v50, %v4270_v63  ;;  %v477_v16 = vld [vmem:[%s5510_s9 + $0x18] sm:$0xff] }
 0x3b2   :  { %2408 = vrot.lane.b32.xlu1 %v2406_v26, %s3719_s19  ;;  %2410 = vrot.lane.b32.xlu0 %v2407_v13, %s3719_s19  ;;  %v5605_v26 = vmov 0.0   ;;  %v478_v13 = vld [vmem:[%s5510_s9 + $0x20] sm:$0xff] }
 0x3b3   :  { %v613_v9 = vsel %vm612_vm5, %v600_v34, %v611_v2  ;;  %v430_v2 = vadd.f32 %v426_v4, %v413_v46  ;;  %v2595_v10 = vrot.slane %v2591_v61, 1  ;;  %v5608_v46 = vld [vmem:[#allocation13_spill] sm:$0xff]  ;;  %v2431_v61 = vrot.slane %v2427_v43, 2 }
 0x3b4   :  { %v448_v51 = vpop.permute.xlu1 %447  ;;  %3426 = vmatmul.mubr.msk.f32.vlgmr.msra.gmra.mxu1 %vm614_vm6, %v613_v9  ;;  %v4809_v25 = vpop.permute.xlu0 %861  ;;  %v474_v4 = vld [vmem:[%s5510_s9] sm:$0xff] }
 0x3b5   :  { %3429 = vmatpush3.msra.mxu1 %v480_v8  ;;  %3442 = vmatprep.mubr.msk.f32.mxu1 %vm3707_vm0, %v5605_v26  ;;  %v452_v56 = vadd.f32 %v448_v51, %v431_v45  ;;  %v476_v8 = vld [vmem:[%s5510_s9 + $0x10] sm:$0xff]  ;;  %v2430_v51 = vrot.slane %v2426_v42, 2  ;;  %v780_v45 = vadd.f32 %v5608_v46, %v766_v3  ;;  %v451_v55 = vadd.f32 %v4717_v41, %v430_v2 }
 0x3b6   :  { %3430 = vmatprep.subr.mxu1 %v5605_v26  ;;  %2582 = vrot.lane.b32.xlu1 %v2580_v18, %s3718_s5  ;;  %v5607_v18 = vld [vmem:[#allocation28_spill] sm:$0xff] }
 0x3b7   :  { %2584 = vrot.lane.b32.xlu0 %v2581_v60, %s3718_s5  ;;  %3431 = vmatpush3.msra.mxu1 %v479_v62  ;;  %v2440_v62 = vmul.f32 %v4633_v53, %v5607_v18  ;;  %v472_v41 = vadd.f32 %v4734_v54, %v451_v55  ;;  %v2615_v54 = vmul.f32 %v4664_v50, %v5606_v20  ;;  %v5613_v55 = vld [vmem:[#allocation17_spill] sm:$0xff] }
 0x3b8   :  { %3432 = vmatprep.subr.mxu1 %v5605_v26  ;;  %v469_v5 = vpop.permute.xlu1 %468  ;;  %v4828_v63 = vpop.permute.xlu0 %877  ;;  %v1004_v20 = vmul.f32 %v4705_v49, %v4566_v27 }
 0x3b9   :  { %v473_v34 = vadd.f32 %v469_v5, %v452_v56  ;;  %3433 = vmatpush3.msra.mxu1 %v478_v13  ;;  %v797_v13 = vmul.f32 %v4625_v22, %v4566_v27  ;;  %v5609_v56 = vld [vmem:[#allocation14_spill] sm:$0xff]  ;;  %v5610_v5 = vld [vmem:[#allocation15_spill] sm:$0xff]  ;;  %v5614_v27 = vld [vmem:[#allocation44_spill] sm:$0xff] }
 0x3ba   :  { %3434 = vmatprep.subr.mxu1 %v5605_v26  ;;  %2596 = vrot.lane.b32.xlu1 %v2594_v1, %s3719_s19  ;;  %v779_v37 = vadd.f32 %v5609_v56, %v765_v47  ;;  %v794_v1 = vadd.f32 %v5610_v5, %v780_v45 }
 0x3bb   :  { %2598 = vrot.lane.b32.xlu0 %v2595_v10, %s3719_s19  ;;  %3435 = vmatpush3.msra.mxu1 %v477_v16  ;;  %v689_v60 = vrot.slane %v473_v34, 7  ;;  %v802_v16 = vrot.slane %v798_v30, 1  ;;  %v2444_v34 = vrot.slane %v2440_v62, 2  ;;  %v5611_v10 = vld [vmem:[#allocation41_spill] sm:$0xff]  ;;  %v4889_v62 = vrot.slane %v4113_v19, 4 }
 0x3bc   :  { %3436 = vmatprep.subr.mxu1 %v5605_v26  ;;  %v4850_v12 = vpop.permute.xlu1 %815  ;;  %v4852_v9 = vpop.permute.xlu0 %1067  ;;  %v2614_v43 = vmul.f32 %v4633_v53, %v5611_v10  ;;  %v3156_v30 = vld [vmem:[%s5510_s9 + $0xd8] sm:$0xff]  ;;  %v801_v45 = vrot.slane %v797_v13, 1  ;;  %v2628_v13 = vmul.f32 %v4633_v53, %v5614_v27 }
 0x3bd   :  { %3437 = vmatpush3.msra.mxu1 %v476_v8  ;;  %v5612_v8 = vld [vmem:[#allocation16_spill] sm:$0xff]  ;;  %v690_v47 = vsel %vm612_vm5, %v689_v60, %v472_v41  ;;  %v806_v46 = vadd.f32 %v802_v16, %v794_v1  ;;  %v2619_v41 = vrot.slane %v2615_v54, 2  ;;  %v2629_v16 = vmul.f32 %v4664_v50, %v5607_v18 }
 0x3be   :  { %3438 = vmatprep.subr.mxu1 %v5605_v26  ;;  %2432 = vrot.lane.b32.xlu1 %v2430_v51, %s3718_s5  ;;  %v793_v3 = vadd.f32 %v5612_v8, %v779_v37  ;;  %v2445_v51 = vrot.slane %v2441_v7, 2  ;;  %v971_v7 = vmul.f32 %v4625_v22, %v4519_v33  ;;  %v2618_v37 = vrot.slane %v2614_v43, 2  ;;  %v5615_v43 = vld [vmem:[#allocation20_spill] sm:$0xff] }
 0x3bf   :  { %2434 = vrot.lane.b32.xlu0 %v2431_v61, %s3718_s5  ;;  %3439 = vmatpush3.msra.mxu1 %v475_v48  ;;  %v972_v48 = vmul.f32 %v4705_v49, %v4554_v29  ;;  %v3155_v29 = vld [vmem:[%s5510_s9 + $0xd0] sm:$0xff]  ;;  %v842_v61 = vmul.f32 %v4705_v49, %v4725_v52  ;;  %v822_v5 = vadd.f32 %v4753_v6, %v806_v46 }
 0x3c0   :  { %3440 = vmatprep.subr.mxu1 %v5605_v26  ;;  %v832_v42 = vpop.permute.xlu1 %831  ;;  %v4875_v2 = vpop.permute.xlu0 %1083  ;;  %v805_v1 = vadd.f32 %v801_v45, %v793_v3  ;;  %v841_v6 = vmul.f32 %v4625_v22, %v4889_v62  ;;  %v5616_v3 = vld [vmem:[#allocation18_spill] sm:$0xff] }
 0x3c1   :  { %3441 = vmatpush3.msra.mxu1 %v474_v4  ;;  %v986_v60 = vadd.f32 %v5613_v55, %v972_v48  ;;  %v838_v18 = vadd.f32 %v4767_v32, %v822_v5  ;;  %v1008_v48 = vrot.slane %v1004_v20, 1  ;;  %v846_v46 = vrot.slane %v842_v61, 2  ;;  %v5618_v32 = vld [vmem:[#allocation19_spill] sm:$0xff]  ;;  %v3152_v20 = vld [vmem:[%s5510_s9 + $0xb8] sm:$0xff] }
 0x3c2   :  { %3443 = vmatmul.mubr.msk.f32.vlgmr.msra.gmra.mxu1 %vm614_vm6, %v690_v47  ;;  %2446 = vrot.lane.b32.xlu1 %v2444_v34, %s3719_s19  ;;  %v3154_v34 = vld [vmem:[%s5510_s9 + $0xc8] sm:$0xff]  ;;  %v1003_v47 = vmul.f32 %v4625_v22, %v4532_v31  ;;  %v821_v54 = vadd.f32 %v4850_v12, %v805_v1  ;;  %v2633_v5 = vrot.slane %v2629_v16, 2  ;;  %v2765_v1 = vmul.f32 %v4664_v50, %v5602_v23 }
 0x3c3   :  { %2448 = vrot.lane.b32.xlu0 %v2445_v51, %s3719_s19  ;;  %3462 = vmatprep.subr.mxu1 %v5605_v26  ;;  %v1000_v8 = vadd.f32 %v5615_v43, %v986_v60  ;;  %v985_v51 = vadd.f32 %v5616_v3, %v971_v7  ;;  %v5617_v60 = vld [vmem:[#allocation35_spill] sm:$0xff]  ;;  %v845_v23 = vrot.slane %v841_v6, 2 }
 0x3c4   :  { %v4905_v4 = vpop.permute.xlu1 %1021  ;;  %v4907_v56 = vpop.permute.xlu0 %1229  ;;  %3463 = vmatpush3.msra.mxu1 %v3156_v30  ;;  %3476 = vmatprep.mubr.msk.f32.mxu1 %vm3707_vm0, %v5605_v26  ;;  %v3153_v30 = vld [vmem:[%s5510_s9 + $0xc0] sm:$0xff]  ;;  %v2764_v7 = vmul.f32 %v4633_v53, %v5617_v60  ;;  %v1007_v16 = vrot.slane %v1003_v47, 1  ;;  %v2779_v47 = vmul.f32 %v4664_v50, %v5604_v28 }
 0x3c5   :  { %3464 = vmatprep.subr.mxu1 %v5605_v26  ;;  %v999_v12 = vadd.f32 %v5618_v32, %v985_v51  ;;  %v1012_v61 = vadd.f32 %v1008_v48, %v1000_v8 }
 0x3c6   :  { %2620 = vrot.lane.b32.xlu1 %v2618_v37, %s3718_s5  ;;  %3465 = vmatpush3.msra.mxu1 %v3155_v29  ;;  %v2632_v29 = vrot.slane %v2628_v13, 2  ;;  %v837_v37 = vadd.f32 %v832_v42, %v821_v54  ;;  %v4947_v13 = vrot.slane %v4113_v19, 3  ;;  %v1048_v42 = vmul.f32 %v4705_v49, %v4889_v62 }
 0x3c7   :  { %2622 = vrot.lane.b32.xlu0 %v2619_v41, %s3718_s5  ;;  %3466 = vmatprep.subr.mxu1 %v5605_v26  ;;  %v850_v41 = vadd.f32 %v846_v46, %v838_v18  ;;  %v1028_v43 = vadd.f32 %v4784_v40, %v1012_v61  ;;  %v2768_v51 = vrot.slane %v2764_v7, 1  ;;  %v5619_v18 = vld [vmem:[#allocation39_spill] sm:$0xff]  ;;  %v2769_v46 = vrot.slane %v2765_v1, 1 }
 0x3c8   :  { %v1038_v45 = vpop.permute.xlu1 %1037  ;;  %v4934_v55 = vpop.permute.xlu0 %1245  ;;  %3467 = vmatpush3.msra.mxu1 %v3154_v34  ;;  %v3151_v34 = vld [vmem:[%s5510_s9 + $0xb0] sm:$0xff]  ;;  %v2778_v54 = vmul.f32 %v4633_v53, %v5619_v18  ;;  %v849_v48 = vadd.f32 %v845_v23, %v837_v37  ;;  %v3150_v40 = vld [vmem:[%s5510_s9 + $0xa8] sm:$0xff]  ;;  %v1047_v7 = vmul.f32 %v4625_v22, %v4947_v13  ;;  %v1052_v61 = vrot.slane %v1048_v42, 2 }
 0x3c9   :  { %3468 = vmatprep.subr.mxu1 %v5605_v26  ;;  %v866_v6 = vadd.f32 %v4809_v25, %v850_v41  ;;  %v3164_v42 = vld [vmem:[%s5510_s9 + $0x110] sm:$0xff] }
 0x3ca   :  { %2634 = vrot.lane.b32.xlu1 %v2632_v29, %s3719_s19  ;;  %3469 = vmatpush3.msra.mxu1 %v3153_v30  ;;  %v1011_v30 = vadd.f32 %v1007_v16, %v999_v12  ;;  %v1044_v29 = vadd.f32 %v4792_v0, %v1028_v43  ;;  %v5620_v0 = vld [vmem:[#allocation50_spill] sm:$0xff]  ;;  %v1051_v43 = vrot.slane %v1047_v7, 2 }
 0x3cb   :  { %2636 = vrot.lane.b32.xlu0 %v2633_v5, %s3719_s19  ;;  %3470 = vmatprep.subr.mxu1 %v5605_v26  ;;  %v882_v28 = vadd.f32 %v4828_v63, %v866_v6  ;;  %v2782_v5 = vrot.slane %v2778_v54, 1  ;;  %v2952_v1 = vmul.f32 %v4633_v53, %v5620_v0  ;;  %v5621_v6 = vld [vmem:[#allocation51_spill] sm:$0xff]  ;;  %v2803_v0 = vmul.f32 %v4664_v50, %v5611_v10 }
 0x3cc   :  { %v860_v8 = vpop.permute.xlu1 %859  ;;  %v4957_v3 = vpop.permute.xlu0 %1435  ;;  %3471 = vmatpush3.msra.mxu1 %v3152_v20  ;;  %v1027_v25 = vadd.f32 %v4905_v4, %v1011_v30  ;;  %v2953_v20 = vmul.f32 %v4664_v50, %v5617_v60  ;;  %v2783_v4 = vrot.slane %v2779_v47, 1  ;;  %v1056_v23 = vadd.f32 %v1052_v61, %v1044_v29 }
 0x3cd   :  { %3472 = vmatprep.subr.mxu1 %v5605_v26  ;;  %v865_v32 = vadd.f32 %v860_v8, %v849_v48  ;;  %v894_v16 = vrot.slane %v882_v28, 1  ;;  %v2956_v54 = vrot.slane %v2952_v1, 1  ;;  %v3161_v1 = vld [vmem:[%s5510_s9 + $0xf8] sm:$0xff]  ;;  %v1177_v10 = vmul.f32 %v4625_v22, %v4557_v14 }
 0x3ce   :  { %2770 = vrot.lane.b32.xlu1 %v2768_v51, %s3718_s5  ;;  %3473 = vmatpush3.msra.mxu1 %v3151_v34  ;;  %v1043_v63 = vadd.f32 %v1038_v45, %v1027_v25  ;;  %v2957_v60 = vrot.slane %v2953_v20, 1  ;;  %v2966_v45 = vmul.f32 %v4633_v53, %v5621_v6  ;;  %v1072_v47 = vadd.f32 %v4852_v9, %v1056_v23 }
 0x3cf   :  { %2772 = vrot.lane.b32.xlu0 %v2769_v46, %s3718_s5  ;;  %3474 = vmatprep.subr.mxu1 %v5605_v26  ;;  %v2967_v46 = vmul.f32 %v4664_v50, %v5619_v18  ;;  %v1178_v20 = vmul.f32 %v4705_v49, %v4519_v33  ;;  %v5624_v33 = vld [vmem:[#allocation22_spill] sm:$0xff]  ;;  %v2817_v6 = vmul.f32 %v4664_v50, %v5614_v27 }
 0x3d0   :  { %v876_v12 = vpop.permute.xlu1 %875  ;;  %v4976_v37 = vpop.permute.xlu0 %1451  ;;  %3475 = vmatpush3.msra.mxu1 %v3150_v40  ;;  %v1055_v48 = vadd.f32 %v1051_v43, %v1043_v63  ;;  %v3163_v40 = vld [vmem:[%s5510_s9 + $0x108] sm:$0xff]  ;;  %v1088_v29 = vadd.f32 %v4875_v2, %v1072_v47  ;;  %v2970_v25 = vrot.slane %v2966_v45, 1  ;;  %v1209_v27 = vmul.f32 %v4625_v22, %v4575_v59 }
 0x3d1   :  { %v881_v41 = vadd.f32 %v876_v12, %v865_v32  ;;  %3496 = vmatprep.subr.mxu1 %v5605_v26  ;;  %v5622_v32 = vld [vmem:[#allocation45_spill] sm:$0xff]  ;;  %v3172_v45 = vld [vmem:[%s5510_s9 + $0x148] sm:$0xff] }
 0x3d2   :  { %2784 = vrot.lane.b32.xlu1 %v2782_v5, %s3719_s19  ;;  %v2802_v18 = vmul.f32 %v4633_v53, %v5622_v32  ;;  %v3162_v12 = vld [vmem:[%s5510_s9 + $0x100] sm:$0xff]  ;;  %v2971_v5 = vrot.slane %v2967_v46, 1  ;;  %v1100_v61 = vrot.slane %v1088_v29, 2  ;;  %v3159_v46 = vld [vmem:[%s5510_s9 + $0xe8] sm:$0xff] }
 0x3d3   :  { %v893_v34 = vrot.slane %v881_v41, 2  ;;  %2786 = vrot.lane.b32.xlu0 %v2783_v4, %s3719_s19  ;;  %v1210_v41 = vmul.f32 %v4705_v49, %v4532_v31  ;;  %v3160_v31 = vld [vmem:[%s5510_s9 + $0xf0] sm:$0xff] }
 0x3d4   :  { %v1066_v8 = vpop.permute.xlu1 %1065  ;;  %v4985_v51 = vpop.permute.xlu0 %1273  ;;  %v2806_v23 = vrot.slane %v2802_v18, 2  ;;  %v3171_v18 = vld [vmem:[%s5510_s9 + $0x140] sm:$0xff] }
 0x3d5   :  { %v895_v30 = vsel %vm612_vm5, %v894_v16, %v893_v34  ;;  %v1071_v7 = vadd.f32 %v1066_v8, %v1055_v48  ;;  %v5623_v34 = vld [vmem:[#allocation48_spill] sm:$0xff]  ;;  %v1192_v8 = vadd.f32 %v5624_v33, %v1178_v20  ;;  %v1384_v20 = vmul.f32 %v4705_v49, %v4557_v14 }
 0x3d6   :  { %2958 = vrot.lane.b32.xlu1 %v2956_v54, %s3718_s5  ;;  %3460 = vmatmul.mubr.msk.f32.vlgmr.msra.gmra.mxu0 %vm614_vm6, %v895_v30  ;;  %v2816_v43 = vmul.f32 %v4633_v53, %v5623_v34  ;;  %v5626_v30 = vld [vmem:[#allocation24_spill] sm:$0xff]  ;;  %v1416_v14 = vmul.f32 %v4705_v49, %v4575_v59 }
 0x3d7   :  { %2960 = vrot.lane.b32.xlu0 %v2957_v60, %s3718_s5  ;;  %3480 = vmatpush3.msra.mxu0 %v3164_v42  ;;  %v2807_v60 = vrot.slane %v2803_v0, 2  ;;  %v5625_v42 = vld [vmem:[#allocation21_spill] sm:$0xff]  ;;  %v1206_v48 = vadd.f32 %v5626_v30, %v1192_v8  ;;  %v2821_v0 = vrot.slane %v2817_v6, 2  ;;  %v3169_v59 = vld [vmem:[%s5510_s9 + $0x130] sm:$0xff] }
 0x3d8   :  { %v1082_v9 = vpop.permute.xlu1 %1081  ;;  %v5003_v28 = vpop.permute.xlu0 %1289  ;;  %3481 = vmatprep.subr.mxu0 %v5605_v26  ;;  %3493 = vmatprep.mubr.msk.f32.mxu0 %vm3707_vm0, %v5605_v26  ;;  %v1191_v47 = vadd.f32 %v5625_v42, %v1177_v10  ;;  %v1383_v10 = vmul.f32 %v4625_v22, %v4681_v44 }
 0x3d9   :  { %v1087_v2 = vadd.f32 %v1082_v9, %v1071_v7  ;;  %3482 = vmatpush3.msra.mxu0 %v3163_v40  ;;  %v2820_v7 = vrot.slane %v2816_v43, 2  ;;  %v5627_v9 = vld [vmem:[#allocation53_spill] sm:$0xff]  ;;  %v1254_v43 = vmul.f32 %v4705_v49, %v4947_v13 }
 0x3da   :  { %2972 = vrot.lane.b32.xlu1 %v2970_v25, %s3719_s19  ;;  %3483 = vmatprep.subr.mxu0 %v5605_v26  ;;  %v2990_v25 = vmul.f32 %v4633_v53, %v5627_v9 }
 0x3db   :  { %v1099_v63 = vrot.slane %v1087_v2, 3  ;;  %2974 = vrot.lane.b32.xlu0 %v2971_v5, %s3719_s19  ;;  %3484 = vmatpush3.msra.mxu0 %v3162_v12  ;;  %v5628_v12 = vld [vmem:[#allocation23_spill] sm:$0xff]  ;;  %v1214_v5 = vrot.slane %v1210_v41, 1 }
 0x3dc   :  { %v5027_v4 = vpop.permute.xlu1 %1227  ;;  %v5029_v16 = vpop.permute.xlu0 %1479  ;;  %3485 = vmatprep.subr.mxu0 %v5605_v26  ;;  %v1205_v2 = vadd.f32 %v5628_v12, %v1191_v47  ;;  %v1587_v12 = vrot.slane %v4103_v17, 2 }
 0x3dd   :  { %v1101_v54 = vsel %vm612_vm5, %v1100_v61, %v1099_v63  ;;  %3486 = vmatpush3.msra.mxu0 %v3161_v1  ;;  %v2991_v1 = vmul.f32 %v4664_v50, %v5622_v32  ;;  %v5070_v61 = vrot.slane %v4113_v19, 2  ;;  %v3158_v63 = vld [vmem:[%s5510_s9 + $0xe0] sm:$0xff]  ;;  %v3170_v32 = vld [vmem:[%s5510_s9 + $0x138] sm:$0xff]  ;;  %v1218_v41 = vadd.f32 %v1214_v5, %v1206_v48 }
 0x3de   :  { %2808 = vrot.lane.b32.xlu1 %v2806_v23, %s3718_s5  ;;  %3477 = vmatmul.mubr.msk.f32.vlgmr.msra.gmra.mxu1 %vm614_vm6, %v1101_v54  ;;  %v1213_v23 = vrot.slane %v1209_v27, 1  ;;  %v2994_v54 = vrot.slane %v2990_v25, 2 }
 0x3df   :  { %2810 = vrot.lane.b32.xlu0 %v2807_v60, %s3718_s5  ;;  %3487 = vmatprep.subr.mxu0 %v5605_v26  ;;  %v5629_v60 = vld [vmem:[#allocation54_spill] sm:$0xff]  ;;  %v1234_v47 = vadd.f32 %v4907_v56, %v1218_v41  ;;  %v2995_v48 = vrot.slane %v2991_v1, 2  ;;  %v1619_v41 = vrot.slane %v4111_v15, 1  ;;  %v1460_v15 = vmul.f32 %v4705_v49, %v5070_v61 }
 0x3e0   :  { %v1244_v40 = vpop.permute.xlu1 %1243  ;;  %v5055_v29 = vpop.permute.xlu0 %1495  ;;  %3488 = vmatpush3.msra.mxu0 %v3160_v31  ;;  %3497 = vmatpush3.msra.mxu1 %v3172_v45  ;;  %v3004_v6 = vmul.f32 %v4633_v53, %v5629_v60  ;;  %v3005_v31 = vmul.f32 %v4664_v50, %v5623_v34  ;;  %v5630_v45 = vld [vmem:[#allocation27_spill] sm:$0xff]  ;;  %v1217_v30 = vadd.f32 %v1213_v23, %v1205_v2  ;;  %v5631_v53 = vld [vmem:[#allocation26_spill] sm:$0xff]  ;;  %v1420_v2 = vrot.slane %v1416_v14, 1  ;;  %v3166_v23 = vld [vmem:[%s5510_s9 + $0x118] sm:$0xff] }
 0x3e1   :  { %3489 = vmatprep.subr.mxu0 %v5605_v26  ;;  %3498 = vmatprep.subr.mxu1 %v5605_v26  ;;  %v1398_v42 = vadd.f32 %v5630_v45, %v1384_v20  ;;  %v1397_v27 = vadd.f32 %v5631_v53, %v1383_v10  ;;  %v1415_v34 = vmul.f32 %v4625_v22, %v4684_v58  ;;  %v3168_v56 = vld [vmem:[%s5510_s9 + $0x128] sm:$0xff]  ;;  %v3167_v20 = vld [vmem:[%s5510_s9 + $0x120] sm:$0xff]  ;;  %v5129_v14 = vrot.slane %v4113_v19, 1 }
 0x3e2   :  { %2822 = vrot.lane.b32.xlu1 %v2820_v7, %s3719_s19  ;;  %3490 = vmatpush3.msra.mxu0 %v3159_v46  ;;  %v1253_v46 = vmul.f32 %v4625_v22, %v5070_v61  ;;  %v5632_v7 = vld [vmem:[#allocation30_spill] sm:$0xff]  ;;  %v1250_v25 = vadd.f32 %v4934_v55, %v1234_v47  ;;  %v3008_v1 = vrot.slane %v3004_v6, 2  ;;  %v5633_v55 = vld [vmem:[#allocation29_spill] sm:$0xff]  ;;  %v3009_v10 = vrot.slane %v3005_v31, 2 }
 0x3e3   :  { %2824 = vrot.lane.b32.xlu0 %v2821_v0, %s3719_s19  ;;  %3499 = vmatpush3.msra.mxu1 %v3171_v18  ;;  %v1412_v9 = vadd.f32 %v5632_v7, %v1398_v42  ;;  %v1233_v18 = vadd.f32 %v5027_v4, %v1217_v30  ;;  %v1411_v4 = vadd.f32 %v5633_v55, %v1397_v27 }
 0x3e4   :  { %v5086_v33 = vpop.permute.xlu1 %1433  ;;  %v5088_v8 = vpop.permute.xlu0 %1641  ;;  %3491 = vmatprep.subr.mxu0 %v5605_v26  ;;  %3500 = vmatprep.subr.mxu1 %v5605_v26  ;;  %v1257_v60 = vrot.slane %v1253_v46, 2  ;;  %v1791_v6 = vmul.f32 %v4705_v49, %v1587_v12  ;;  %v1817_v27 = vmul.f32 %v4664_v50, %v1619_v41 }
 0x3e5   :  { %3492 = vmatpush3.msra.mxu0 %v3158_v63  ;;  %3501 = vmatpush3.msra.mxu1 %v3170_v32  ;;  %v1258_v63 = vrot.slane %v1254_v43, 2  ;;  %v1249_v32 = vadd.f32 %v1244_v40, %v1233_v18  ;;  %v1419_v40 = vrot.slane %v1415_v34, 1  ;;  %v1459_v34 = vmul.f32 %v4625_v22, %v5129_v14 }
 0x3e6   :  { %2996 = vrot.lane.b32.xlu1 %v2994_v54, %s3718_s5  ;;  %3502 = vmatprep.subr.mxu1 %v5605_v26  ;;  %v1424_v54 = vadd.f32 %v1420_v2, %v1412_v9  ;;  %v1590_v2 = vmul.f32 %v4705_v49, %v4681_v44  ;;  %v3180_v44 = vld [vmem:[%s5510_s9 + $0x180] sm:$0xff] }
 0x3e7   :  { %2998 = vrot.lane.b32.xlu0 %v2995_v48, %s3718_s5  ;;  %3503 = vmatpush3.msra.mxu1 %v3169_v59  ;;  %v1262_v43 = vadd.f32 %v1258_v63, %v1250_v25  ;;  %v1423_v47 = vadd.f32 %v1419_v40, %v1411_v4  ;;  %v1261_v30 = vadd.f32 %v1257_v60, %v1249_v32  ;;  %v5634_v48 = vld [vmem:[#allocation38_spill] sm:$0xff]  ;;  %v1821_v63 = vrot.slane %v1817_v27, 1  ;;  %v5636_v32 = vld [vmem:[#allocation33_spill] sm:$0xff] }
 0x3e8   :  { %v1450_v5 = vpop.permute.xlu1 %1449  ;;  %v5116_v0 = vpop.permute.xlu0 %1657  ;;  %3504 = vmatprep.subr.mxu1 %v5605_v26  ;;  %3510 = vmatprep.mubr.msk.f32.mxu1 %vm3707_vm0, %v5605_v26  ;;  %v1440_v45 = vadd.f32 %v4957_v3, %v1424_v54  ;;  %v1803_v53 = vadd.f32 %v5634_v48, %v1791_v6  ;;  %v1622_v4 = vmul.f32 %v4705_v49, %v4684_v58 }
 0x3e9   :  { %3505 = vmatpush3.msra.mxu1 %v3168_v56  ;;  %3513 = vmatprep.subr.mxu0 %v5605_v26  ;;  %v1278_v42 = vadd.f32 %v4985_v51, %v1262_v43  ;;  %v1439_v3 = vadd.f32 %v5086_v33, %v1423_v47  ;;  %v5635_v51 = vld [vmem:[#allocation40_spill] sm:$0xff]  ;;  %v1589_v54 = vmul.f32 %v4625_v22, %v1587_v12 }
 0x3ea   :  { %3010 = vrot.lane.b32.xlu1 %v3008_v1, %s3719_s19  ;;  %3506 = vmatprep.subr.mxu1 %v5605_v26  ;;  %v1456_v46 = vadd.f32 %v4976_v37, %v1440_v45  ;;  %v1815_v9 = vadd.f32 %v5635_v51, %v1803_v53  ;;  %v1464_v1 = vrot.slane %v1460_v15, 2  ;;  %v1463_v37 = vrot.slane %v1459_v34, 2  ;;  %v5638_v47 = vld [vmem:[#allocation32_spill] sm:$0xff] }
 0x3eb   :  { %3012 = vrot.lane.b32.xlu0 %v3009_v10, %s3719_s19  ;;  %3507 = vmatpush3.msra.mxu1 %v3167_v20  ;;  %v1294_v56 = vadd.f32 %v5003_v28, %v1278_v42  ;;  %v1455_v20 = vadd.f32 %v1450_v5, %v1439_v3  ;;  %v1604_v28 = vadd.f32 %v5636_v32, %v1590_v2  ;;  %v5637_v5 = vld [vmem:[#allocation37_spill] sm:$0xff]  ;;  %v5186_v3 = vld [vmem:[%s5503_s2 + $0x8] sm:$0xff] }
 0x3ec   :  { %v1272_v31 = vpop.permute.xlu1 %1271  ;;  %v1835_v59 = vpop.permute.xlu0 %1834  ;;  %3508 = vmatprep.subr.mxu1 %v5605_v26  ;;  %v1468_v33 = vadd.f32 %v1464_v1, %v1456_v46  ;;  %v1825_v43 = vadd.f32 %v1821_v63, %v1815_v9  ;;  %v1855_v45 = vmul.f32 %v4664_v50, %v4113_v19  ;;  %v1621_v12 = vmul.f32 %v4625_v22, %v1619_v41  ;;  %v3179_v42 = vld [vmem:[%s5510_s9 + $0x178] sm:$0xff]  ;;  %v3178_v22 = vld [vmem:[%s5510_s9 + $0x170] sm:$0xff] }
 0x3ed   :  { %3509 = vmatpush3.msra.mxu1 %v3166_v23  ;;  %v1277_v7 = vadd.f32 %v1272_v31, %v1261_v30  ;;  %v1306_v10 = vrot.slane %v1294_v56, 3  ;;  %v1618_v6 = vadd.f32 %v5637_v5, %v1604_v28  ;;  %v1467_v15 = vadd.f32 %v1463_v37, %v1455_v20  ;;  %v5639_v41 = vld [vmem:[#allocation36_spill] sm:$0xff]  ;;  %v3176_v28 = vld [vmem:[%s5510_s9 + $0x160] sm:$0xff] }
 0x3ee   :  { %3530 = vmatprep.subr.mxu1 %v5605_v26  ;;  %v1484_v58 = vadd.f32 %v5029_v16, %v1468_v33  ;;  %v1839_v31 = vadd.f32 %v1835_v59, %v1825_v43  ;;  %v1603_v30 = vadd.f32 %v5638_v47, %v1589_v54  ;;  %v1626_v16 = vrot.slane %v1622_v4, 1  ;;  %v3187_v43 = vld [vmem:[%s5510_s9 + $0x1b0] sm:$0xff] }
 0x3ef   :  { %v1859_v51 = vrot.slane %v1855_v45, 2  ;;  %v1665_v9 = vmul.f32 %v4664_v50, %v5129_v14  ;;  %v1625_v20 = vrot.slane %v1621_v12, 1  ;;  %v3188_v50 = vld [vmem:[%s5510_s9 + $0x1b8] sm:$0xff]  ;;  %v2004_v54 = vmul.f32 %v5186_v3, %v4713_v35  ;;  %v3174_v45 = vld [vmem:[%s5510_s9 + $0x150] sm:$0xff] }
 0x3f0   :  { %v1288_v25 = vpop.permute.xlu1 %1287  ;;  %v1849_v18 = vpop.permute.xlu0 %1848  ;;  %v1500_v48 = vadd.f32 %v5055_v29, %v1484_v58  ;;  %v1617_v46 = vadd.f32 %v5639_v41, %v1603_v30  ;;  %v1630_v56 = vadd.f32 %v1626_v16, %v1618_v6  ;;  %v5642_v6 = vld [vmem:[#allocation43_spill] sm:$0xff]  ;;  %v5232_v30 = vld [vmem:[%s5503_s2 + $0x18] sm:$0xff]  ;;  %v5643_v41 = vld [vmem:[#allocation10_spill] sm:$0xff] }
 0x3f1   :  { %v1293_v55 = vadd.f32 %v1288_v25, %v1277_v7  ;;  %v1853_v59 = vadd.f32 %v1849_v18, %v1839_v31  ;;  %v1978_v7 = vmul.f32 %v5186_v3, %v4103_v17  ;;  %v3177_v25 = vld [vmem:[%s5510_s9 + $0x168] sm:$0xff]  ;;  %v2008_v16 = vrot.slane %v2004_v54, 1 }
 0x3f2   :  { %v1512_v18 = vrot.slane %v1500_v48, 4  ;;  %v1646_v2 = vadd.f32 %v5088_v8, %v1630_v56  ;;  %v1629_v33 = vadd.f32 %v1625_v20, %v1617_v46  ;;  %v3186_v31 = vld [vmem:[%s5510_s9 + $0x1a8] sm:$0xff]  ;;  %v2166_v48 = vmul.f32 %v5232_v30, %v4103_v17  ;;  %v5644_v17 = vld [vmem:[#allocation52_spill] sm:$0xff] }
 0x3f3   :  { %v1305_v23 = vrot.slane %v1293_v55, 4  ;;  %v5640_v55 = vld [vmem:[#allocation9_spill] sm:$0xff]  ;;  %v1863_v63 = vadd.f32 %v1859_v51, %v1853_v59  ;;  %v2192_v20 = vmul.f32 %v5232_v30, %v4713_v35  ;;  %v3182_v35 = vld [vmem:[%s5510_s9 + $0x188] sm:$0xff]  ;;  %v2229_v54 = vmul.f32 %v5186_v3, %v4725_v52 }
 0x3f4   :  { %v1478_v40 = vpop.permute.xlu1 %1477  ;;  %v5157_v60 = vpop.permute.xlu0 %1683  ;;  %v1990_v4 = vadd.f32 %v5640_v55, %v1978_v7  ;;  %v1662_v8 = vadd.f32 %v5116_v0, %v1646_v2  ;;  %v3175_v0 = vld [vmem:[%s5510_s9 + $0x158] sm:$0xff]  ;;  %v2178_v46 = vadd.f32 %v5643_v41, %v2166_v48  ;;  %v5646_v2 = vld [vmem:[#allocation46_spill] sm:$0xff]  ;;  %v3183_v55 = vld [vmem:[%s5510_s9 + $0x190] sm:$0xff] }
 0x3f5   :  { %v1307_v49 = vsel %vm612_vm5, %v1306_v10, %v1305_v23  ;;  %v1483_v53 = vadd.f32 %v1478_v40, %v1467_v15  ;;  %v1664_v23 = vmul.f32 %v5186_v3, %v4113_v19  ;;  %v1669_v40 = vrot.slane %v1665_v9, 2  ;;  %v5641_v19 = vld [vmem:[#allocation6_spill] sm:$0xff]  ;;  %v3184_v9 = vld [vmem:[%s5510_s9 + $0x198] sm:$0xff] }
 0x3f6   :  { %3494 = vmatmul.mubr.msk.f32.vlgmr.msra.gmra.mxu0 %vm614_vm6, %v1307_v49  ;;  %v2002_v5 = vadd.f32 %v5641_v19, %v1990_v4  ;;  %v1877_v58 = vadd.f32 %v5642_v6, %v1863_v63  ;;  %v5647_v4 = vld [vmem:[#allocation49_spill] sm:$0xff]  ;;  %v3196_v19 = vld [vmem:[%s5510_s9 + $0x1f0] sm:$0xff] }
 0x3f7   :  { %3514 = vmatpush3.msra.mxu0 %v3180_v44  ;;  %3527 = vmatprep.mubr.msk.f32.mxu0 %vm3707_vm0, %v5605_v26  ;;  %v1673_v12 = vadd.f32 %v1669_v40, %v1662_v8 }
 0x3f8   :  { %v1494_v27 = vpop.permute.xlu1 %1493  ;;  %v5176_v34 = vpop.permute.xlu0 %1698  ;;  %3515 = vmatprep.subr.mxu0 %v5605_v26  ;;  %v1891_v56 = vadd.f32 %v5644_v17, %v1877_v58 }
 0x3f9   :  { %v1499_v29 = vadd.f32 %v1494_v27, %v1483_v53  ;;  %3516 = vmatpush3.msra.mxu0 %v3179_v42  ;;  %v1668_v42 = vrot.slane %v1664_v23, 2  ;;  %v3185_v53 = vld [vmem:[%s5510_s9 + $0x1a0] sm:$0xff]  ;;  %v1688_v59 = vadd.f32 %v5157_v60, %v1673_v12 }
 0x3fa   :  { %3517 = vmatprep.subr.mxu0 %v5605_v26  ;;  %v1903_v8 = vrot.slane %v1891_v56, 6 }
 0x3fb   :  { %v1511_v1 = vrot.slane %v1499_v29, 5  ;;  %3518 = vmatpush3.msra.mxu0 %v3178_v22  ;;  %v2042_v22 = vmul.f32 %v5186_v3, %v4751_v21  ;;  %v2012_v29 = vadd.f32 %v2008_v16, %v2002_v5  ;;  %v1703_v60 = vadd.f32 %v5176_v34, %v1688_v59  ;;  %v5649_v5 = vld [vmem:[#allocation55_spill] sm:$0xff] }
 0x3fc   :  { %v1640_v37 = vpop.permute.xlu1 %1639  ;;  %v1885_v32 = vpop.permute.xlu0 %1884  ;;  %3519 = vmatprep.subr.mxu0 %v5605_v26  ;;  %v2233_v16 = vrot.slane %v2229_v54, 2  ;;  %v2230_v59 = vmul.f32 %v5232_v30, %v4751_v21  ;;  %v3193_v21 = vld [vmem:[%s5510_s9 + $0x1d8] sm:$0xff] }
 0x3fd   :  { %v1513_v10 = vsel %vm612_vm5, %v1512_v18, %v1511_v1  ;;  %3520 = vmatpush3.msra.mxu0 %v3177_v25  ;;  %v1645_v44 = vadd.f32 %v1640_v37, %v1629_v33  ;;  %v5645_v25 = vld [vmem:[#allocation47_spill] sm:$0xff]  ;;  %v2046_v23 = vrot.slane %v2042_v22, 2 }
 0x3fe   :  { %3511 = vmatmul.mubr.msk.f32.vlgmr.msra.gmra.mxu1 %vm614_vm6, %v1513_v10  ;;  %3521 = vmatprep.subr.mxu0 %v5605_v26 }
 0x3ff   :  { %3531 = vmatpush3.msra.mxu1 %v3188_v50  ;;  %3522 = vmatpush3.msra.mxu0 %v3176_v28  ;;  %v5648_v50 = vld [vmem:[#allocation7_spill] sm:$0xff] }
 0x400   :  { %v1656_v49 = vpop.permute.xlu1 %1655  ;;  %3532 = vmatprep.subr.mxu1 %v5605_v26  ;;  %v2021_v15 = vpop.permute.xlu0 %2020  ;;  %3523 = vmatprep.subr.mxu0 %v5605_v26  ;;  %v2190_v28 = vadd.f32 %v5648_v50, %v2178_v46  ;;  %v3202_v46 = vld [vmem:[%s5510_s9 + $0x218] sm:$0xff] }
 0x401   :  { %v1661_v47 = vadd.f32 %v1656_v49, %v1645_v44  ;;  %3533 = vmatpush3.msra.mxu1 %v3187_v43  ;;  %3524 = vmatpush3.msra.mxu0 %v3175_v0  ;;  %v2026_v37 = vadd.f32 %v2021_v15, %v2012_v29  ;;  %v1715_v43 = vrot.slane %v1703_v60, 5  ;;  %v2196_v44 = vrot.slane %v2192_v20, 1  ;;  %v5650_v60 = vld [vmem:[#allocation56_spill] sm:$0xff]  ;;  %v3191_v20 = vld [vmem:[%s5510_s9 + $0x1c8] sm:$0xff] }
 0x402   :  { %3534 = vmatprep.subr.mxu1 %v5605_v26  ;;  %3525 = vmatprep.subr.mxu0 %v5605_v26 }
 0x403   :  { %v1672_v27 = vadd.f32 %v1668_v42, %v1661_v47  ;;  %3535 = vmatpush3.msra.mxu1 %v3186_v31  ;;  %3526 = vmatpush3.msra.mxu0 %v3174_v45  ;;  %v3204_v31 = vld [vmem:[%s5510_s9 + $0x228] sm:$0xff]  ;;  %v2200_v47 = vadd.f32 %v2196_v44, %v2190_v28 }
 0x404   :  { %v1871_v7 = vpop.permute.xlu1 %1870  ;;  %3536 = vmatprep.subr.mxu1 %v5605_v26  ;;  %v2208_v51 = vpop.permute.xlu0 %2207  ;;  %3544 = vmatprep.mubr.msk.f32.mxu1 %vm3707_vm0, %v5605_v26  ;;  %v3195_v42 = vld [vmem:[%s5510_s9 + $0x1e8] sm:$0xff] }
 0x405   :  { %v1687_v18 = vadd.f32 %v5645_v25, %v1672_v27  ;;  %v1876_v1 = vadd.f32 %v1871_v7, %v5646_v2  ;;  %3537 = vmatpush3.msra.mxu1 %v3185_v53  ;;  %3547 = vmatprep.subr.mxu0 %v5605_v26  ;;  %v2213_v6 = vadd.f32 %v2208_v51, %v5649_v5  ;;  %v3203_v53 = vld [vmem:[%s5510_s9 + $0x220] sm:$0xff]  ;;  %v2234_v7 = vrot.slane %v2230_v59, 2  ;;  %v3192_v51 = vld [vmem:[%s5510_s9 + $0x1d0] sm:$0xff] }
 0x406   :  { %3538 = vmatprep.subr.mxu1 %v5605_v26  ;;  %v3194_v27 = vld [vmem:[%s5510_s9 + $0x1e0] sm:$0xff] }
 0x407   :  { %v1702_v63 = vadd.f32 %v5647_v4, %v1687_v18  ;;  %v1890_v34 = vadd.f32 %v1885_v32, %v1876_v1  ;;  %3539 = vmatpush3.msra.mxu1 %v3184_v9  ;;  %v3201_v9 = vld [vmem:[%s5510_s9 + $0x210] sm:$0xff] }
 0x408   :  { %v2035_v10 = vpop.permute.xlu1 %2034  ;;  %3540 = vmatprep.subr.mxu1 %v5605_v26  ;;  %v2210_v33 = vpop.permute.xlu0 %2209 }
 0x409   :  { %v1714_v0 = vrot.slane %v1702_v63, 6  ;;  %v1902_v40 = vrot.slane %v1890_v34, 7  ;;  %v2040_v32 = vadd.f32 %v2035_v10, %v2026_v37  ;;  %3541 = vmatpush3.msra.mxu1 %v3183_v55  ;;  %v2214_v22 = vadd.f32 %v2210_v33, %v2200_v47  ;;  %v3200_v55 = vld [vmem:[%s5510_s9 + $0x208] sm:$0xff]  ;;  %v3190_v63 = vld [vmem:[%s5510_s9 + $0x1c0] sm:$0xff] }
 0x40a   :  { %3542 = vmatprep.subr.mxu1 %v5605_v26  ;;  %v3199_v37 = vld [vmem:[%s5510_s9 + $0x200] sm:$0xff] }
 0x40b   :  { %3543 = vmatpush3.msra.mxu1 %v3182_v35  ;;  %v1716_v58 = vsel %vm612_vm5, %v1715_v43, %v1714_v0  ;;  %v1904_v49 = vsel %vm612_vm5, %v1903_v8, %v1902_v40  ;;  %v2050_v15 = vadd.f32 %v2046_v23, %v2040_v32  ;;  %v3198_v8 = vld [vmem:[%s5510_s9 + $0x1f8] sm:$0xff]  ;;  %v3212_v35 = vld [vmem:[%s5510_s9 + $0x260] sm:$0xff] }
 0x40c   :  { %v2222_v45 = vpop.permute.xlu1 %2221  ;;  %3528 = vmatmul.mubr.msk.f32.vlgmr.msra.gmra.mxu0 %vm614_vm6, %v1716_v58  ;;  %3545 = vmatmul.mubr.msk.f32.vlgmr.msra.gmra.mxu1 %vm614_vm6, %v1904_v49  ;;  %v2061_v12 = vpop.permute.xlu0 %2060  ;;  %v3211_v40 = vld [vmem:[%s5510_s9 + $0x258] sm:$0xff]  ;;  %v3208_v47 = vld [vmem:[%s5510_s9 + $0x240] sm:$0xff] }
 0x40d   :  { %v2227_v48 = vadd.f32 %v2222_v45, %v2213_v6  ;;  %3548 = vmatpush3.msra.mxu0 %v3196_v19  ;;  %3564 = vmatprep.subr.mxu1 %v5605_v26  ;;  %v2065_v25 = vadd.f32 %v2061_v12, %v5650_v60  ;;  %v3210_v19 = vld [vmem:[%s5510_s9 + $0x250] sm:$0xff]  ;;  %v2416_v12 = vmul.f32 %v5186_v3, %v4889_v62 }
 0x40e   :  { %3549 = vmatprep.subr.mxu0 %v5605_v26  ;;  %3565 = vmatpush3.msra.mxu1 %v3204_v31  ;;  %v3220_v31 = vld [vmem:[%s5510_s9 + $0x298] sm:$0xff]  ;;  %v2604_v60 = vmul.f32 %v5186_v3, %v4947_v13 }
 0x40f   :  { %3550 = vmatpush3.msra.mxu0 %v3195_v42  ;;  %v2237_v41 = vadd.f32 %v2233_v16, %v2227_v48  ;;  %3566 = vmatprep.subr.mxu1 %v5605_v26  ;;  %v2417_v42 = vmul.f32 %v5232_v30, %v4725_v52  ;;  %v3219_v48 = vld [vmem:[%s5510_s9 + $0x290] sm:$0xff] }
 0x410   :  { %v2224_v17 = vpop.permute.xlu1 %2223  ;;  %v2059_v56 = vpop.permute.xlu0 %2058  ;;  %3551 = vmatprep.subr.mxu0 %v5605_v26  ;;  %3567 = vmatpush3.msra.mxu1 %v3203_v53 }
 0x411   :  { %v2228_v29 = vadd.f32 %v2224_v17, %v2214_v22  ;;  %3552 = vmatpush3.msra.mxu0 %v3194_v27  ;;  %3568 = vmatprep.subr.mxu1 %v5605_v26  ;;  %v2064_v34 = vadd.f32 %v2059_v56, %v2050_v15  ;;  %v3209_v15 = vld [vmem:[%s5510_s9 + $0x248] sm:$0xff]  ;;  %v3207_v27 = vld [vmem:[%s5510_s9 + $0x238] sm:$0xff]  ;;  %v3206_v17 = vld [vmem:[%s5510_s9 + $0x230] sm:$0xff] }
 0x412   :  { %3553 = vmatprep.subr.mxu0 %v5605_v26  ;;  %3569 = vmatpush3.msra.mxu1 %v3202_v46  ;;  %v3218_v22 = vld [vmem:[%s5510_s9 + $0x288] sm:$0xff]  ;;  %v2420_v46 = vrot.slane %v2416_v12, 2  ;;  %v3217_v56 = vld [vmem:[%s5510_s9 + $0x280] sm:$0xff] }
 0x413   :  { %3554 = vmatpush3.msra.mxu0 %v3193_v21  ;;  %v2238_v18 = vadd.f32 %v2234_v7, %v2228_v29  ;;  %3570 = vmatprep.subr.mxu1 %v5605_v26 }
 0x414   :  { %v2075_v2 = vpop.permute.xlu1 %2074  ;;  %v2246_v1 = vpop.permute.xlu0 %2245  ;;  %3555 = vmatprep.subr.mxu0 %v5605_v26  ;;  %3561 = vmatprep.mubr.msk.f32.mxu0 %vm3707_vm0, %v5605_v26 }
 0x415   :  { %v2079_v4 = vadd.f32 %v2075_v2, %v2065_v25  ;;  %3556 = vmatpush3.msra.mxu0 %v3192_v51  ;;  %3571 = vmatpush3.msra.mxu1 %v3201_v9  ;;  %v2251_v23 = vadd.f32 %v2246_v1, %v2237_v41  ;;  %v3216_v51 = vld [vmem:[%s5510_s9 + $0x278] sm:$0xff]  ;;  %v2605_v25 = vmul.f32 %v5232_v30, %v4889_v62  ;;  %v3214_v62 = vld [vmem:[%s5510_s9 + $0x268] sm:$0xff] }
 0x416   :  { %3557 = vmatprep.subr.mxu0 %v5605_v26  ;;  %3572 = vmatprep.subr.mxu1 %v5605_v26 }
 0x417   :  { %3558 = vmatpush3.msra.mxu0 %v3191_v20  ;;  %3573 = vmatpush3.msra.mxu1 %v3200_v55  ;;  %v2090_v10 = vrot.slane %v2079_v4, 7 }
 0x418   :  { %v2073_v50 = vpop.permute.xlu1 %2072  ;;  %v2248_v28 = vpop.permute.xlu0 %2247  ;;  %3559 = vmatprep.subr.mxu0 %v5605_v26  ;;  %3574 = vmatprep.subr.mxu1 %v5605_v26 }
 0x419   :  { %v2078_v33 = vadd.f32 %v2073_v50, %v2064_v34  ;;  %3560 = vmatpush3.msra.mxu0 %v3190_v63  ;;  %3575 = vmatpush3.msra.mxu1 %v3199_v37  ;;  %v2252_v32 = vadd.f32 %v2248_v28, %v2238_v18  ;;  %v3215_v18 = vld [vmem:[%s5510_s9 + $0x270] sm:$0xff]  ;;  %v2608_v63 = vrot.slane %v2604_v60, 2  ;;  %v2609_v34 = vrot.slane %v2605_v25, 2 }
 0x41a   :  { %3576 = vmatprep.subr.mxu1 %v5605_v26  ;;  %3578 = vmatprep.mubr.msk.f32.mxu1 %vm3707_vm0, %v5605_v26 }
 0x41b   :  { %v2091_v54 = vsel %vm612_vm5, %v2090_v10, %v2078_v33  ;;  %3577 = vmatpush3.msra.mxu1 %v3198_v8  ;;  %3581 = vmatprep.subr.mxu0 %v5605_v26 }
 0x41c   :  { %v2260_v43 = vpop.permute.xlu1 %2259  ;;  %3562 = vmatmul.mubr.msk.f32.vlgmr.msra.gmra.mxu0 %vm614_vm6, %v2091_v54  ;;  %v2262_v0 = vpop.permute.xlu0 %2261  ;;  %3598 = vmatprep.subr.mxu1 %v5605_v26 }
 0x41d   :  { %v2265_v44 = vadd.f32 %v2260_v43, %v2251_v23  ;;  %3582 = vmatpush3.msra.mxu0 %v3212_v35  ;;  %3595 = vmatprep.mubr.msk.f32.mxu0 %vm3707_vm0, %v5605_v26  ;;  %v2266_v6 = vadd.f32 %v2262_v0, %v2252_v32 }
 0x41e   :  { %3583 = vmatprep.subr.mxu0 %v5605_v26 }
 0x41f   :  { %v2277_v5 = vrot.slane %v2265_v44, 1  ;;  %3584 = vmatpush3.msra.mxu0 %v3211_v40  ;;  %v3228_v44 = vld [vmem:[%s5510_s9 + $0x2d0] sm:$0xff] }
 0x420   :  { %v2395_v58 = vpop.permute.xlu1 %2394  ;;  %v2397_v49 = vpop.permute.xlu0 %2396  ;;  %3585 = vmatprep.subr.mxu0 %v5605_v26 }
 0x421   :  { %v2278_v45 = vsel %vm612_vm5, %v2266_v6, %v2277_v5  ;;  %3586 = vmatpush3.msra.mxu0 %v3210_v19  ;;  %v2400_v16 = vadd.f32 %v2395_v58, %v4608_v39  ;;  %v2401_v53 = vadd.f32 %v2397_v49, %v4614_v36  ;;  %v2421_v36 = vrot.slane %v2417_v42, 2  ;;  %v3227_v6 = vld [vmem:[%s5510_s9 + $0x2c8] sm:$0xff] }
 0x422   :  { %3579 = vmatmul.mubr.msk.f32.vlgmr.msra.gmra.mxu1 %vm614_vm6, %v2278_v45  ;;  %3587 = vmatprep.subr.mxu0 %v5605_v26  ;;  %v3226_v45 = vld [vmem:[%s5510_s9 + $0x2c0] sm:$0xff] }
 0x423   :  { %3588 = vmatpush3.msra.mxu0 %v3209_v15  ;;  %3599 = vmatpush3.msra.mxu1 %v3220_v31 }
 0x424   :  { %v2409_v52 = vpop.permute.xlu1 %2408  ;;  %v2411_v59 = vpop.permute.xlu0 %2410  ;;  %3589 = vmatprep.subr.mxu0 %v5605_v26  ;;  %3600 = vmatprep.subr.mxu1 %v5605_v26 }
 0x425   :  { %v2414_v41 = vadd.f32 %v2409_v52, %v2400_v16  ;;  %v2415_v39 = vadd.f32 %v2411_v59, %v2401_v53  ;;  %3590 = vmatpush3.msra.mxu0 %v3208_v47  ;;  %3601 = vmatpush3.msra.mxu1 %v3219_v48  ;;  %v3225_v47 = vld [vmem:[%s5510_s9 + $0x2b8] sm:$0xff]  ;;  %v2792_v52 = vmul.f32 %v5186_v3, %v5070_v61  ;;  %v3224_v59 = vld [vmem:[%s5510_s9 + $0x2b0] sm:$0xff] }
 0x426   :  { %3591 = vmatprep.subr.mxu0 %v5605_v26  ;;  %3602 = vmatprep.subr.mxu1 %v5605_v26 }
 0x427   :  { %v2424_v21 = vadd.f32 %v2420_v46, %v2414_v41  ;;  %v2425_v29 = vadd.f32 %v2421_v36, %v2415_v39  ;;  %3592 = vmatpush3.msra.mxu0 %v3207_v27  ;;  %3603 = vmatpush3.msra.mxu1 %v3218_v22  ;;  %v3236_v27 = vld [vmem:[%s5510_s9 + $0x308] sm:$0xff]  ;;  %v2793_v41 = vmul.f32 %v5232_v30, %v4947_v13  ;;  %v3235_v36 = vld [vmem:[%s5510_s9 + $0x300] sm:$0xff] }
 0x428   :  { %v2583_v7 = vpop.permute.xlu1 %2582  ;;  %3593 = vmatprep.subr.mxu0 %v5605_v26  ;;  %3604 = vmatprep.subr.mxu1 %v5605_v26  ;;  %v3223_v46 = vld [vmem:[%s5510_s9 + $0x2a8] sm:$0xff] }
 0x429   :  { %v2585_v9 = vpop.permute.xlu0 %2584  ;;  %3594 = vmatpush3.msra.mxu0 %v3206_v17  ;;  %3605 = vmatpush3.msra.mxu1 %v3217_v56  ;;  %v2588_v2 = vadd.f32 %v2583_v7, %v4655_v38  ;;  %v5651_v17 = vld [vmem:[#allocation57_spill] sm:$0xff]  ;;  %v2797_v60 = vrot.slane %v2793_v41, 2 }
 0x42a   :  { %3606 = vmatprep.subr.mxu1 %v5605_v26  ;;  %3612 = vmatprep.mubr.msk.f32.mxu1 %vm3707_vm0, %v5605_v26  ;;  %v2589_v1 = vadd.f32 %v2585_v9, %v4651_v24  ;;  %v3222_v7 = vld [vmem:[%s5510_s9 + $0x2a0] sm:$0xff] }
 0x42b   :  { %3607 = vmatpush3.msra.mxu1 %v3216_v51  ;;  %3615 = vmatprep.subr.mxu0 %v5605_v26  ;;  %v3234_v51 = vld [vmem:[%s5510_s9 + $0x2f8] sm:$0xff] }
 0x42c   :  { %v2597_v20 = vpop.permute.xlu1 %2596  ;;  %3608 = vmatprep.subr.mxu1 %v5605_v26 }
 0x42d   :  { %v2602_v55 = vadd.f32 %v2597_v20, %v2588_v2  ;;  %v2599_v4 = vpop.permute.xlu0 %2598  ;;  %3609 = vmatpush3.msra.mxu1 %v3215_v18  ;;  %v3233_v18 = vld [vmem:[%s5510_s9 + $0x2f0] sm:$0xff] }
 0x42e   :  { %v2603_v37 = vadd.f32 %v2599_v4, %v2589_v1  ;;  %3610 = vmatprep.subr.mxu1 %v5605_v26  ;;  %v2981_v4 = vmul.f32 %v5232_v30, %v5070_v61  ;;  %v3230_v61 = vld [vmem:[%s5510_s9 + $0x2d8] sm:$0xff] }
 0x42f   :  { %v2612_v38 = vadd.f32 %v2608_v63, %v2602_v55  ;;  %3611 = vmatpush3.msra.mxu1 %v3214_v62  ;;  %v2980_v62 = vmul.f32 %v5186_v3, %v5129_v14  ;;  %v3232_v55 = vld [vmem:[%s5510_s9 + $0x2e8] sm:$0xff]  ;;  %v3231_v14 = vld [vmem:[%s5510_s9 + $0x2e0] sm:$0xff] }
 0x430   :  { %v2433_v50 = vpop.permute.xlu1 %2432  ;;  %v2613_v28 = vadd.f32 %v2609_v34, %v2603_v37  ;;  %3632 = vmatprep.subr.mxu1 %v5605_v26  ;;  %v5652_v3 = vld [vmem:[#allocation58_spill] sm:$0xff]  ;;  %v2985_v30 = vrot.slane %v2981_v4, 2 }
 0x431   :  { %v2435_v24 = vpop.permute.xlu0 %2434  ;;  %v2438_v8 = vadd.f32 %v2433_v50, %v2424_v21 }
 0x432   :  { %v2439_v10 = vadd.f32 %v2435_v24, %v2425_v29 }
 0x434   :  { %v2447_v33 = vpop.permute.xlu1 %2446 }
 0x435   :  { %v2452_v35 = vadd.f32 %v2447_v33, %v2438_v8  ;;  %v2449_v23 = vpop.permute.xlu0 %2448 }
 0x436   :  { %v2453_v54 = vadd.f32 %v2449_v23, %v2439_v10 }
 0x437   :  { %v2464_v43 = vrot.slane %v2452_v35, 2 }
 0x438   :  { %v2465_v0 = vrot.slane %v2453_v54, 1  ;;  %v2621_v40 = vpop.permute.xlu1 %2620 }
 0x439   :  { %v2623_v32 = vpop.permute.xlu0 %2622  ;;  %v2626_v5 = vadd.f32 %v2621_v40, %v2612_v38 }
 0x43a   :  { %v2466_v19 = vsel %vm612_vm5, %v2465_v0, %v2464_v43  ;;  %v2627_v58 = vadd.f32 %v2623_v32, %v2613_v28  ;;  %v2984_v28 = vrot.slane %v2980_v62, 2 }
 0x43b   :  { %3596 = vmatmul.mubr.msk.f32.vlgmr.msra.gmra.mxu0 %vm614_vm6, %v2466_v19 }
 0x43c   :  { %v2635_v49 = vpop.permute.xlu1 %2634  ;;  %3616 = vmatpush3.msra.mxu0 %v3228_v44  ;;  %3629 = vmatprep.mubr.msk.f32.mxu0 %vm3707_vm0, %v5605_v26 }
 0x43d   :  { %v2640_v15 = vadd.f32 %v2635_v49, %v2626_v5  ;;  %v2637_v31 = vpop.permute.xlu0 %2636  ;;  %3617 = vmatprep.subr.mxu0 %v5605_v26 }
 0x43e   :  { %v2641_v12 = vadd.f32 %v2637_v31, %v2627_v58  ;;  %3618 = vmatpush3.msra.mxu0 %v3227_v6 }
 0x43f   :  { %v2652_v42 = vrot.slane %v2640_v15, 3  ;;  %3619 = vmatprep.subr.mxu0 %v5605_v26 }
 0x440   :  { %v2653_v48 = vrot.slane %v2641_v12, 2  ;;  %v2771_v16 = vpop.permute.xlu1 %2770  ;;  %3620 = vmatpush3.msra.mxu0 %v3226_v45 }
 0x441   :  { %v2773_v53 = vpop.permute.xlu0 %2772  ;;  %3621 = vmatprep.subr.mxu0 %v5605_v26  ;;  %v2776_v39 = vadd.f32 %v2771_v16, %v4688_v11  ;;  %v2796_v11 = vrot.slane %v2792_v52, 2 }
 0x442   :  { %v2654_v22 = vsel %vm612_vm5, %v2653_v48, %v2652_v42  ;;  %3622 = vmatpush3.msra.mxu0 %v3225_v47  ;;  %v2777_v56 = vadd.f32 %v2773_v53, %v5651_v17 }
 0x443   :  { %3613 = vmatmul.mubr.msk.f32.vlgmr.msra.gmra.mxu1 %vm614_vm6, %v2654_v22  ;;  %3623 = vmatprep.subr.mxu0 %v5605_v26 }
 0x444   :  { %v2785_v21 = vpop.permute.xlu1 %2784  ;;  %3624 = vmatpush3.msra.mxu0 %v3224_v59  ;;  %3633 = vmatpush3.msra.mxu1 %v3236_v27 }
 0x445   :  { %v2790_v13 = vadd.f32 %v2785_v21, %v2776_v39  ;;  %v2787_v29 = vpop.permute.xlu0 %2786  ;;  %3625 = vmatprep.subr.mxu0 %v5605_v26  ;;  %3634 = vmatprep.subr.mxu1 %v5605_v26 }
 0x446   :  { %v2791_v9 = vadd.f32 %v2787_v29, %v2777_v56  ;;  %3626 = vmatpush3.msra.mxu0 %v3223_v46  ;;  %3635 = vmatpush3.msra.mxu1 %v3235_v36 }
 0x447   :  { %v2800_v25 = vadd.f32 %v2796_v11, %v2790_v13  ;;  %3627 = vmatprep.subr.mxu0 %v5605_v26  ;;  %3636 = vmatprep.subr.mxu1 %v5605_v26 }
 0x448   :  { %v2959_v2 = vpop.permute.xlu1 %2958  ;;  %v2801_v1 = vadd.f32 %v2797_v60, %v2791_v9  ;;  %3628 = vmatpush3.msra.mxu0 %v3222_v7  ;;  %3637 = vmatpush3.msra.mxu1 %v3234_v51 }
 0x449   :  { %v2961_v20 = vpop.permute.xlu0 %2960  ;;  %3638 = vmatprep.subr.mxu1 %v5605_v26  ;;  %3646 = vmatprep.mubr.msk.f32.mxu1 %vm3707_vm0, %v5605_v26  ;;  %v2964_v63 = vadd.f32 %v2959_v2, %v4732_v57 }
 0x44a   :  { %3639 = vmatpush3.msra.mxu1 %v3233_v18  ;;  %v2965_v37 = vadd.f32 %v2961_v20, %v5652_v3 }
 0x44b   :  { %3640 = vmatprep.subr.mxu1 %v5605_v26 }
 0x44c   :  { %v2973_v34 = vpop.permute.xlu1 %2972  ;;  %3641 = vmatpush3.msra.mxu1 %v3232_v55 }
 0x44d   :  { %v2978_v38 = vadd.f32 %v2973_v34, %v2964_v63  ;;  %v2975_v50 = vpop.permute.xlu0 %2974  ;;  %3642 = vmatprep.subr.mxu1 %v5605_v26 }
 0x44e   :  { %v2979_v57 = vadd.f32 %v2975_v50, %v2965_v37  ;;  %3643 = vmatpush3.msra.mxu1 %v3231_v14 }
 0x44f   :  { %v2988_v24 = vadd.f32 %v2984_v28, %v2978_v38  ;;  %3644 = vmatprep.subr.mxu1 %v5605_v26 }
 0x450   :  { %v2809_v8 = vpop.permute.xlu1 %2808  ;;  %v2989_v10 = vadd.f32 %v2985_v30, %v2979_v57  ;;  %3645 = vmatpush3.msra.mxu1 %v3230_v61  ;;  %v3238_v30 = vld [vmem:[%s5511_s10] ss:$0 sm:$0xff] }
 0x451   :  { %v2811_v33 = vpop.permute.xlu0 %2810  ;;  %v2814_v35 = vadd.f32 %v2809_v8, %v2800_v25 }
 0x452   :  { %v2815_v23 = vadd.f32 %v2811_v33, %v2801_v1 }
 0x454   :  { %v2823_v54 = vpop.permute.xlu1 %2822 }
 0x455   :  { %v2828_v43 = vadd.f32 %v2823_v54, %v2814_v35  ;;  %v2825_v0 = vpop.permute.xlu0 %2824 }
 0x456   :  { %v2829_v40 = vadd.f32 %v2825_v0, %v2815_v23 }
 0x457   :  { %v2840_v32 = vrot.slane %v2828_v43, 4 }
 0x458   :  { %v2841_v44 = vrot.slane %v2829_v40, 3  ;;  %v2997_v19 = vpop.permute.xlu1 %2996 }
 0x459   :  { %v2999_v5 = vpop.permute.xlu0 %2998  ;;  %v3002_v58 = vadd.f32 %v2997_v19, %v2988_v24 }
 0x45a   :  { %v2842_v6 = vsel %vm612_vm5, %v2841_v44, %v2840_v32  ;;  %v3003_v26 = vadd.f32 %v2999_v5, %v2989_v10 }
 0x45b   :  { %3630 = vmatmul.mubr.msk.f32.vlgmr.msra.gmra.mxu0 %vm614_vm6, %v2842_v6 }
 0x45c   :  { %v3011_v49 = vpop.permute.xlu1 %3010 }
 0x45d   :  { %v3016_v15 = vadd.f32 %v3011_v49, %v3002_v58  ;;  %v3013_v31 = vpop.permute.xlu0 %3012 }
 0x45e   :  { %v3017_v45 = vadd.f32 %v3013_v31, %v3003_v26 }
 0x45f   :  { %v3028_v12 = vrot.slane %v3016_v15, 5 }
 0x460   :  { %v3029_v42 = vrot.slane %v3017_v45, 4 }
 0x462   :  { %v3030_v47 = vsel %vm612_vm5, %v3029_v42, %v3028_v12 }
 0x463   :  { %3647 = vmatmul.mubr.msk.f32.vlgmr.msra.gmra.mxu1 %vm614_vm6, %v3030_v47 }
 0x474   :  { %v683_v48 = vpop.f32.mrf.mxu1 }
 0x476   :  { %v3427_v16 = vpop.f32.mrf.mxu1 }
 0x482   :  { %v759_v53 = vpop.f32.mrf.mxu1 }
 0x483   :  { %v760_v52 = vadd.f32 %v759_v53, %v683_v48 }
 0x484   :  { %v3444_v59 = vpop.f32.mrf.mxu1 }
 0x496   :  { %v964_v27 = vpop.f32.mrf.mxu0 }
 0x497   :  { %v968_v22 = vadd.f32 %v964_v27, %v760_v52 }
 0x498   :  { %v3461_v41 = vpop.f32.mrf.mxu0 }
 0x49e   :  { %v1170_v39 = vpop.f32.mrf.mxu1 }
 0x49f   :  { %v1174_v46 = vadd.f32 %v1170_v39, %v968_v22 }
 0x4a0   :  { %v3478_v36 = vpop.f32.mrf.mxu1 }
 0x4b6   :  { %v1376_v17 = vpop.f32.mrf.mxu0 }
 0x4b7   :  { %v1380_v56 = vadd.f32 %v1376_v17, %v1174_v46 }
 0x4b8   :  { %v3495_v21 = vpop.f32.mrf.mxu0 }
 0x4be   :  { %v1582_v13 = vpop.f32.mrf.mxu1 }
 0x4bf   :  { %v1586_v29 = vadd.f32 %v1582_v13, %v1380_v56 }
 0x4c0   :  { %v3512_v11 = vpop.f32.mrf.mxu1 }
 0x4cc   :  { %v1785_v7 = vpop.f32.mrf.mxu0  ;;  %v1973_v51 = vpop.f32.mrf.mxu1 }
 0x4cd   :  { %v1789_v9 = vadd.f32 %v1785_v7, %v1586_v29 }
 0x4ce   :  { %v3529_v60 = vpop.f32.mrf.mxu0  ;;  %v3546_v25 = vpop.f32.mrf.mxu1 }
 0x4cf   :  { %v1977_v18 = vadd.f32 %v1973_v51, %v1789_v9 }
 0x4dc   :  { %v2160_v2 = vpop.f32.mrf.mxu0 }
 0x4dd   :  { %v2164_v3 = vadd.f32 %v2160_v2, %v1977_v18 }
 0x4de   :  { %v3563_v1 = vpop.f32.mrf.mxu0 }
 0x4e2   :  { %v2347_v20 = vpop.f32.mrf.mxu1 }
 0x4e3   :  { %v2351_v34 = vadd.f32 %v2347_v20, %v2164_v3 }
 0x4e4   :  { %v3580_v62 = vpop.f32.mrf.mxu1 }
 0x4fb   :  { %v2535_v55 = vpop.f32.mrf.mxu0 }
 0x4fc   :  { %v2539_v50 = vadd.f32 %v2535_v55, %v2351_v34 }
 0x4fd   :  { %v3597_v4 = vpop.f32.mrf.mxu0 }
 0x503   :  { %v2723_v63 = vpop.f32.mrf.mxu1 }
 0x504   :  { %v2727_v28 = vadd.f32 %v2723_v63, %v2539_v50 }
 0x505   :  { %v3614_v14 = vpop.f32.mrf.mxu1 }
 0x51b   :  { %v2911_v37 = vpop.f32.mrf.mxu0 }
 0x51c   :  { %v2915_v61 = vadd.f32 %v2911_v37, %v2727_v28 }
 0x51d   :  { %v3631_v38 = vpop.f32.mrf.mxu0 }
 0x523   :  { %v3099_v57 = vpop.f32.mrf.mxu1 }
 0x524   :  { %v3103_v24 = vadd.f32 %v3099_v57, %v2915_v61 }
 0x525   :  { %v3648_v8 = vpop.f32.mrf.mxu1 }
 0x526   :  { %v3111_v10 = vadd.f32 %v3238_v30, %v3103_v24 }
 0x528   :  { %3112 = vst.msk [vmem:[#allocation3] sm:$0x3] %vm211_vm2, %v3111_v10 }
 0x529   :  { %3695 = shalt.err (!%p3692_p4)
}
 0x52a   :  { %3122 = dma.vmem_to_hbm [thread:$0]  %s3120_s16, 32, %s5512_s11, [#allocation4]  }
 0x52b   :  { %3704 = dma.done.wait [#allocation4], 32  }
 0x52c   :  { %3705 = vsyncadd [#allocation4], 4294967264 }
 0x52d   :  { %3126 = vsyncpa [#allocation4], 1 }

</bundles_post_ra>
